<compile_context>
chip_gen: v5e
topology: v5e:2x2
jax: 0.10.0
libtpu: 0.0.40
codegen_flags: <defaults>
</compile_context>

<pallas_src>
import jax
import jax.numpy as jnp
from jax import lax
from jax.experimental import pallas as pl
from jax.experimental.pallas import tpu as pltpu

# Quantization precisions from the module defaults.
ACT_BIT = 6
W_BIT = 6
B_BIT = 6
N_ACT = 2 ** (ACT_BIT - 1) - 1   # 31
N_W = 2 ** (W_BIT - 1) - 1       # 31
N_B = 2 ** (B_BIT - 1) - 1       # 31

# hls4ml jet-tagging "three layer" geometry implied by the model:
#   dense_1: 16 -> 64, dense_2: 64 -> 32, dense_3: 32 -> 32, dense_4: 32 -> 5
IN_F, H1, H2, H3, OUT_F = 16, 64, 32, 32, 5
OUT_PAD = 8                       # dense_4 outputs padded 5 -> 8 (sublane aligned)

# Packed feat-major output slab: [a1 | a2 | a3 | a4(pad 8) | probs(pad 8) | 0s]
SLAB_F = 256                      # lane-tile aligned in both transpose orientations
_A1_OFF = 0
_A2_OFF = _A1_OFF + H1            # 64
_A3_OFF = _A2_OFF + H2            # 96
_A4_OFF = _A3_OFF + H3            # 128
_PR_OFF = _A4_OFF + OUT_PAD       # 136
_PAD_ROWS = SLAB_F - (_PR_OFF + OUT_PAD)   # 112


# ------------------------- in-kernel quant helpers -------------------------
def _qlinear_folded(h_bf16, s_prev, inv_s_prev, w_ref, p_ref):
    """QuantLinear with pre-quantized weights and the /s_prev folded out.

    Reference: (dot(W_int, h/s_prev) + b_int) * (w_scale*s_prev)
    Folded:     dot(W_int, h)*w_scale + b_int*(w_scale*s_prev)
    (identical up to the bf16 operand rounding already accepted below).

    h_bf16:  (in, TB)  bf16 activation (NOT divided by s_prev)
    w_ref:   (out, in) bf16, exact 6-bit integer weights
    p_ref:   (out, 2)  f32  [w_scale | bias/w_scale]
    """
    p = p_ref[...]
    ws = p[:, 0:1]                                                   # (out, 1)
    b_int = jnp.clip(jnp.round(p[:, 1:2] * inv_s_prev), -N_B - 1, N_B)
    # TODO(synk): the bf16 cast of the activation operand adds <=2^-8 relative
    # rounding (well below the 6-bit quantization noise); weights and the
    # layer-1 integer operand are exact in bf16.
    acc = jnp.dot(w_ref[...], h_bf16, preferred_element_type=jnp.float32)
    return acc * ws + b_int * (ws * s_prev)                          # (out, TB)


# --------------------------------- kernel ----------------------------------
def _qmlp_kernel(x_ref,
                 w1_ref, p1_ref, w2_ref, p2_ref, w3_ref, p3_ref, w4_ref, p4_ref,
                 probs_ref, a1_ref, a2_ref, a3_ref, a4_ref):
    f32 = jnp.float32

    # ---- quant_input: x, s0 = quant_input(x) -------------------------------
    # Done on the (TB, 16) batch-major tile so no input transpose is needed;
    # layer 1 then contracts the feature axis of both operands (NT matmul).
    xb = x_ref[...].astype(f32)                                      # (TB, 16)
    # TODO(synk): per-tile (not per-batch) min/max stats when grid > 1, and the
    # asymmetric clip range [-n-1, n] are HAWQ conventions kept from before.
    s0 = jnp.maximum(jnp.max(jnp.abs(xb)), 1e-8) / N_ACT
    inv_s0 = 1.0 / s0                                                # exact scalar recip
    x_int = jnp.clip(jnp.round(xb * inv_s0), -N_ACT - 1, N_ACT)      # exact small ints
    x_int_bf = x_int.astype(jnp.bfloat16)

    # quant_act_1 is applied to the fake-quantized INPUT (its value is then
    # discarded by the torch forward; only the scale feeds dense_2).
    s1 = jnp.maximum(jnp.max(jnp.abs(x_int)) * s0, 1e-8) / N_ACT

    # ---- dense_1 (exact integer operand) -----------------------------------
    p1 = p1_ref[...]
    ws1 = p1[:, 0:1]
    b1_int = jnp.clip(jnp.round(p1[:, 1:2] * inv_s0), -N_B - 1, N_B)
    acc1 = lax.dot_general(w1_ref[...], x_int_bf,
                           (((1,), (1,)), ((), ())),                 # contract IN_F
                           preferred_element_type=f32)               # (64, TB)
    a1 = (acc1 + b1_int) * (ws1 * s0)
    h1 = jnp.maximum(a1, 0.0)
    h1_bf = h1.astype(jnp.bfloat16)
    s2 = jnp.maximum(jnp.max(h1), 1e-8) / N_ACT     # quant_act_2 of relu(a1) (>=0)

    # ---- dense_2 / dense_3 (scale-folded, no tile-wide divides) ------------
    a2 = _qlinear_folded(h1_bf, s1, 1.0 / s1, w2_ref, p2_ref)        # (32, TB)
    h2 = jnp.maximum(a2, 0.0)
    h2_bf = h2.astype(jnp.bfloat16)
    s3 = jnp.maximum(jnp.max(h2), 1e-8) / N_ACT     # quant_act_3 of relu(a2)

    a3 = _qlinear_folded(h2_bf, s2, 1.0 / s2, w3_ref, p3_ref)        # (32, TB)
    h3_bf = jnp.maximum(a3, 0.0).astype(jnp.bfloat16)

    # ---- dense_4 (output channels padded 5 -> 8; padded rows are exactly 0) -
    a4p = _qlinear_folded(h3_bf, s3, 1.0 / s3, w4_ref, p4_ref)       # (8, TB)

    # ---- quant_output + softmax over the 5 real classes --------------------
    s4 = jnp.maximum(jnp.max(jnp.abs(a4p)), 1e-8) / N_ACT
    inv_s4 = 1.0 / s4
    xo = jnp.clip(jnp.round(a4p * inv_s4), -N_ACT - 1, N_ACT) * s4
    row = lax.broadcasted_iota(jnp.int32, xo.shape, 0)
    xo = jnp.where(row < OUT_F, xo, -jnp.inf)                        # mask pad rows
    m = jnp.max(xo, axis=0, keepdims=True)
    e = jnp.exp(xo - m)
    probs = e * (1.0 / jnp.sum(e, axis=0, keepdims=True))            # exact normalizer

    # ---- pack -> one aligned transpose -> [batch, feature] stores ----------
    tb = xb.shape[0]
    slab = jnp.concatenate(
        [a1, a2, a3, a4p, probs, jnp.zeros((_PAD_ROWS, tb), f32)], axis=0)  # (256, TB)
    t = jnp.transpose(slab, (1, 0))                                  # (TB, 256)

    a1_ref[...] = t[:, _A1_OFF:_A1_OFF + H1].astype(a1_ref.dtype)
    a2_ref[...] = t[:, _A2_OFF:_A2_OFF + H2].astype(a2_ref.dtype)
    a3_ref[...] = t[:, _A3_OFF:_A3_OFF + H3].astype(a3_ref.dtype)
    a4_ref[...] = t[:, _A4_OFF:_A4_OFF + OUT_F].astype(a4_ref.dtype)
    probs_ref[...] = t[:, _PR_OFF:_PR_OFF + OUT_F].astype(probs_ref.dtype)


# -------------------------------- wrappers ----------------------------------
def quantize_params(params):
    """Hoisted (static) weight quantization, done once outside the kernel.

    Per layer returns exact 6-bit integer weights stored as bf16 (out, in) and
    one packed (out, 2) f32 array [w_scale | bias/w_scale].  dense_4 is padded
    to 8 output channels (zero weights / zero bias -> padded rows are exactly
    zero in the kernel).
    """
    dims = [(H1, IN_F), (H2, H1), (H3, H2), (OUT_F, H3)]
    qp = {}
    for i, (out_f, in_f) in enumerate(dims, start=1):
        w = params[f"w{i}"].astype(jnp.float32)                      # (out, in)
        b = params[f"b{i}"].astype(jnp.float32).reshape(-1, 1)       # (out, 1)
        w_scale = jnp.maximum(jnp.max(jnp.abs(w), axis=1, keepdims=True), 1e-8) / N_W
        w_int = jnp.clip(jnp.round(w / w_scale), -N_W - 1, N_W)
        b_over_ws = b / w_scale
        if out_f == OUT_F:                                           # pad 5 -> 8
            pad = OUT_PAD - OUT_F
            w_int = jnp.pad(w_int, ((0, pad), (0, 0)))
            w_scale = jnp.pad(w_scale, ((0, pad), (0, 0)), constant_values=1.0)
            b_over_ws = jnp.pad(b_over_ws, ((0, pad), (0, 0)))
        qp[f"w{i}_int"] = w_int.astype(jnp.bfloat16)                 # exact: |int| <= 32
        qp[f"p{i}"] = jnp.concatenate([w_scale, b_over_ws], axis=1).astype(jnp.float32)
    return qp


def _pick_block_b(batch, target=2048):
    """Largest multiple-of-128 divisor of `batch` that is <= target and leaves
    at least 2 grid steps (v7x megacore + double-buffered pipeline); falls back
    to a single full-batch tile."""
    cap = min(target, batch // 2)
    tb = (cap // 128) * 128
    while tb >= 128:
        if batch % tb == 0:
            return tb
        tb -= 128
    return batch


def qthreelayer_coral_forward(x, qparams, *, block_b=None, out_dtype=jnp.float32):
    """x: (B, 16) float32, B a multiple of 128. qparams: quantize_params(...).

    Returns (softmax_probs (B,5) f32, (a1 (B,64), a2 (B,32), a3 (B,32),
    a4 (B,5)) in `out_dtype`) — set out_dtype=jnp.bfloat16 to halve writeback
    bytes if downstream allows.
    """
    B = x.shape[0]
    if B % 128 != 0:
        # TODO(synk): ragged batches would need a padded final tile.
        raise ValueError("batch must be a multiple of 128")
    if block_b is None:
        block_b = _pick_block_b(B)
    assert B % block_b == 0 and (block_b == B or block_b % 128 == 0)
    tb = block_b
    grid = (B // tb,)

    def tile_spec(feat):
        return pl.BlockSpec((tb, feat), lambda i: (i, 0))

    def param_spec(shape):
        return pl.BlockSpec(shape, lambda i: (0, 0))

    w_shapes = [(H1, IN_F), (H2, H1), (H3, H2), (OUT_PAD, H3)]
    in_specs = [tile_spec(IN_F)]
    inputs = [x]
    for i, wshape in enumerate(w_shapes, start=1):
        in_specs += [param_spec(wshape), param_spec((wshape[0], 2))]
        inputs += [qparams[f"w{i}_int"], qparams[f"p{i}"]]

    out_shapes = (
        jax.ShapeDtypeStruct((B, OUT_F), jnp.float32),   # softmax probs
        jax.ShapeDtypeStruct((B, H1), out_dtype),        # a1
        jax.ShapeDtypeStruct((B, H2), out_dtype),        # a2
        jax.ShapeDtypeStruct((B, H3), out_dtype),        # a3
        jax.ShapeDtypeStruct((B, OUT_F), out_dtype),     # a4
    )
    out_specs = (tile_spec(OUT_F), tile_spec(H1), tile_spec(H2),
                 tile_spec(H3), tile_spec(OUT_F))

    # TODO(synk): with more than one batch tile, per-tensor activation min/max
    # scales become per-tile (the torch QuantAct uses running stats); pass
    # frozen scales via scalar prefetch if exact per-batch stats are required.
    probs, a1, a2, a3, a4 = pl.pallas_call(
        _qmlp_kernel,
        out_shape=out_shapes,
        grid=grid,
        in_specs=in_specs,
        out_specs=out_specs,
        compiler_params=pltpu.CompilerParams(
            dimension_semantics=("parallel",),   # shard batch tiles over TCs (v7x)
            vmem_limit_bytes=32 << 20,           # working set ~9 MiB at TB=2048
        ),
    )(*inputs)
    return probs, (a1, a2, a3, a4)


def init_params(key):
    """Deterministic torch.nn.Linear-style init: U(-1/sqrt(fan_in), 1/sqrt(fan_in))."""
    dims = [(H1, IN_F), (H2, H1), (H3, H2), (OUT_F, H3)]
    params = {}
    for i, (out_f, in_f) in enumerate(dims, start=1):
        key, kw, kb = jax.random.split(key, 3)
        bound = 1.0 / jnp.sqrt(float(in_f))
        params[f"w{i}"] = jax.random.uniform(
            kw, (out_f, in_f), jnp.float32, minval=-bound, maxval=bound)
        params[f"b{i}"] = jax.random.uniform(
            kb, (out_f,), jnp.float32, minval=-bound, maxval=bound)
    return params


if __name__ == "__main__":
    key = jax.random.PRNGKey(0)
    key, kx = jax.random.split(key)
    # Small problem, but batch is sized so the tile picker yields two 256-row
    # tiles: the batch grid, megacore sharding and the packed-transpose store
    # path are all exercised.
    batch = 512
    x = jax.random.normal(kx, (batch, IN_F), jnp.float32)

    params = init_params(key)
    qparams = quantize_params(params)   # weight quantization hoisted, done once

    probs, (a1, a2, a3, a4) = qthreelayer_coral_forward(x, qparams)
    jax.block_until_ready((probs, a1, a2, a3, a4))

    assert probs.shape == (batch, OUT_F)
    assert a1.shape == (batch, H1) and a2.shape == (batch, H2)
    assert a3.shape == (batch, H3) and a4.shape == (batch, OUT_F)
    assert bool(jnp.all(jnp.isfinite(probs)))
    # exact softmax normalizer -> tight row sums
    assert bool(jnp.allclose(jnp.sum(probs, axis=1), 1.0, atol=1e-4))

    print("KERNEL_OK")
</pallas_src>

<mosaic_0001>
module attributes {stable_mosaic.version = 11 : i64} {
  func.func @_qmlp_kernel(%arg0: i32, %arg1: memref<256x16xf32, #tpu.memory_space<vmem>>, %arg2: memref<64x16xbf16, #tpu.memory_space<vmem>>, %arg3: memref<64x2xf32, #tpu.memory_space<vmem>>, %arg4: memref<32x64xbf16, #tpu.memory_space<vmem>>, %arg5: memref<32x2xf32, #tpu.memory_space<vmem>>, %arg6: memref<32x32xbf16, #tpu.memory_space<vmem>>, %arg7: memref<32x2xf32, #tpu.memory_space<vmem>>, %arg8: memref<8x32xbf16, #tpu.memory_space<vmem>>, %arg9: memref<8x2xf32, #tpu.memory_space<vmem>>, %arg10: memref<256x5xf32, #tpu.memory_space<vmem>>, %arg11: memref<256x64xf32, #tpu.memory_space<vmem>>, %arg12: memref<256x32xf32, #tpu.memory_space<vmem>>, %arg13: memref<256x32xf32, #tpu.memory_space<vmem>>, %arg14: memref<256x5xf32, #tpu.memory_space<vmem>>) attributes {dimension_semantics = [#tpu.dimension_semantics<parallel>], iteration_bounds = array<i64: 2>, scalar_prefetch = 0 : i64, scratch_operands = 0 : i64, tpu.core_type = #tpu.core_type<tc>, window_params = [{transform_indices = @transform_0, window_bounds = array<i64: 256, 16>}, {pipeline_mode = #tpu.pipeline_mode<synchronous>, transform_indices = @transform_1, window_bounds = array<i64: 64, 16>}, {pipeline_mode = #tpu.pipeline_mode<synchronous>, transform_indices = @transform_2, window_bounds = array<i64: 64, 2>}, {pipeline_mode = #tpu.pipeline_mode<synchronous>, transform_indices = @transform_3, window_bounds = array<i64: 32, 64>}, {pipeline_mode = #tpu.pipeline_mode<synchronous>, transform_indices = @transform_4, window_bounds = array<i64: 32, 2>}, {pipeline_mode = #tpu.pipeline_mode<synchronous>, transform_indices = @transform_5, window_bounds = array<i64: 32, 32>}, {pipeline_mode = #tpu.pipeline_mode<synchronous>, transform_indices = @transform_6, window_bounds = array<i64: 32, 2>}, {pipeline_mode = #tpu.pipeline_mode<synchronous>, transform_indices = @transform_7, window_bounds = array<i64: 8, 32>}, {pipeline_mode = #tpu.pipeline_mode<synchronous>, transform_indices = @transform_8, window_bounds = array<i64: 8, 2>}, {transform_indices = @transform_9, window_bounds = array<i64: 256, 5>}, {transform_indices = @transform_10, window_bounds = array<i64: 256, 64>}, {transform_indices = @transform_11, window_bounds = array<i64: 256, 32>}, {transform_indices = @transform_12, window_bounds = array<i64: 256, 32>}, {transform_indices = @transform_13, window_bounds = array<i64: 256, 5>}]} {
    %c0 = arith.constant 0 : index
    %c0_0 = arith.constant 0 : index
    %0 = vector.load %arg1[%c0, %c0_0] : memref<256x16xf32, #tpu.memory_space<vmem>>, vector<256x16xf32>
    %1 = math.absf %0 : vector<256x16xf32>
    %2 = vector.shape_cast %1 : vector<256x16xf32> to vector<1x256x16xf32>
    %cst = arith.constant dense<0xFF800000> : vector<1xf32>
    %3 = vector.multi_reduction <maximumf>, %2, %cst [1, 2] : vector<1x256x16xf32> to vector<1xf32>
    %4 = vector.shape_cast %3 : vector<1xf32> to vector<1x1x1xf32>
    %5 = vector.extract %4[0, 0, 0] : f32 from vector<1x1x1xf32>
    %cst_1 = arith.constant 9.99999993E-9 : f32
    %6 = arith.maximumf %5, %cst_1 : f32
    %cst_2 = arith.constant 3.100000e+01 : f32
    %7 = arith.divf %6, %cst_2 : f32
    %cst_3 = arith.constant 1.000000e+00 : f32
    %8 = arith.divf %cst_3, %7 : f32
    %9 = vector.broadcast %8 : f32 to vector<256x16xf32>
    %10 = arith.mulf %0, %9 : vector<256x16xf32>
    %11 = math.roundeven %10 : vector<256x16xf32>
    %c-32_i32 = arith.constant -32 : i32
    %c31_i32 = arith.constant 31 : i32
    %12 = arith.sitofp %c-32_i32 : i32 to f32
    %13 = vector.broadcast %12 : f32 to vector<256x16xf32>
    %14 = arith.maximumf %13, %11 : vector<256x16xf32>
    %15 = arith.sitofp %c31_i32 : i32 to f32
    %16 = vector.broadcast %15 : f32 to vector<256x16xf32>
    %17 = arith.minimumf %16, %14 : vector<256x16xf32>
    %18 = arith.truncf %17 : vector<256x16xf32> to vector<256x16xbf16>
    %19 = math.absf %17 : vector<256x16xf32>
    %20 = vector.shape_cast %19 : vector<256x16xf32> to vector<1x256x16xf32>
    %cst_4 = arith.constant dense<0xFF800000> : vector<1xf32>
    %21 = vector.multi_reduction <maximumf>, %20, %cst_4 [1, 2] : vector<1x256x16xf32> to vector<1xf32>
    %22 = vector.shape_cast %21 : vector<1xf32> to vector<1x1x1xf32>
    %23 = vector.extract %22[0, 0, 0] : f32 from vector<1x1x1xf32>
    %24 = arith.mulf %23, %7 : f32
    %cst_5 = arith.constant 9.99999993E-9 : f32
    %25 = arith.maximumf %24, %cst_5 : f32
    %cst_6 = arith.constant 3.100000e+01 : f32
    %26 = arith.divf %25, %cst_6 : f32
    %c0_7 = arith.constant 0 : index
    %c0_8 = arith.constant 0 : index
    %27 = vector.load %arg3[%c0_7, %c0_8] : memref<64x2xf32, #tpu.memory_space<vmem>>, vector<64x2xf32>
    %28 = vector.extract_strided_slice %27 {offsets = [0, 0], sizes = [64, 1], strides = [1, 1]} : vector<64x2xf32> to vector<64x1xf32>
    %29 = vector.extract_strided_slice %27 {offsets = [0, 1], sizes = [64, 1], strides = [1, 1]} : vector<64x2xf32> to vector<64x1xf32>
    %30 = vector.broadcast %8 : f32 to vector<64x1xf32>
    %31 = arith.mulf %29, %30 : vector<64x1xf32>
    %32 = math.roundeven %31 : vector<64x1xf32>
    %c-32_i32_9 = arith.constant -32 : i32
    %c31_i32_10 = arith.constant 31 : i32
    %33 = arith.sitofp %c-32_i32_9 : i32 to f32
    %34 = vector.broadcast %33 : f32 to vector<64x1xf32>
    %35 = arith.maximumf %34, %32 : vector<64x1xf32>
    %36 = arith.sitofp %c31_i32_10 : i32 to f32
    %37 = vector.broadcast %36 : f32 to vector<64x1xf32>
    %38 = arith.minimumf %37, %35 : vector<64x1xf32>
    %c0_11 = arith.constant 0 : index
    %c0_12 = arith.constant 0 : index
    %39 = vector.load %arg2[%c0_11, %c0_12] : memref<64x16xbf16, #tpu.memory_space<vmem>>, vector<64x16xbf16>
    %cst_13 = arith.constant dense<0.000000e+00> : vector<64x256xf32>
    %40 = tpu.matmul %39, %18, %cst_13 {dimension_numbers = #tpu.dot_dimension_numbers<[1], [1], [0], [0], [0, 0, 1, 0], [], []>} : vector<64x16xbf16>, vector<256x16xbf16>, vector<64x256xf32> -> vector<64x256xf32>
    %41 = vector.broadcast %38 : vector<64x1xf32> to vector<64x256xf32>
    %42 = arith.addf %40, %41 : vector<64x256xf32>
    %43 = vector.broadcast %7 : f32 to vector<64x1xf32>
    %44 = arith.mulf %28, %43 : vector<64x1xf32>
    %45 = vector.broadcast %44 : vector<64x1xf32> to vector<64x256xf32>
    %46 = arith.mulf %42, %45 : vector<64x256xf32>
    %cst_14 = arith.constant 0.000000e+00 : f32
    %47 = vector.broadcast %cst_14 : f32 to vector<64x256xf32>
    %48 = arith.maximumf %46, %47 : vector<64x256xf32>
    %49 = arith.truncf %48 : vector<64x256xf32> to vector<64x256xbf16>
    %50 = vector.shape_cast %48 : vector<64x256xf32> to vector<1x64x256xf32>
    %cst_15 = arith.constant dense<0xFF800000> : vector<1xf32>
    %51 = vector.multi_reduction <maximumf>, %50, %cst_15 [1, 2] : vector<1x64x256xf32> to vector<1xf32>
    %52 = vector.shape_cast %51 : vector<1xf32> to vector<1x1x1xf32>
    %53 = vector.extract %52[0, 0, 0] : f32 from vector<1x1x1xf32>
    %cst_16 = arith.constant 9.99999993E-9 : f32
    %54 = arith.maximumf %53, %cst_16 : f32
    %cst_17 = arith.constant 3.100000e+01 : f32
    %55 = arith.divf %54, %cst_17 : f32
    %cst_18 = arith.constant 1.000000e+00 : f32
    %56 = arith.divf %cst_18, %26 : f32
    %c0_19 = arith.constant 0 : index
    %c0_20 = arith.constant 0 : index
    %57 = vector.load %arg5[%c0_19, %c0_20] : memref<32x2xf32, #tpu.memory_space<vmem>>, vector<32x2xf32>
    %58 = vector.extract_strided_slice %57 {offsets = [0, 0], sizes = [32, 1], strides = [1, 1]} : vector<32x2xf32> to vector<32x1xf32>
    %59 = vector.extract_strided_slice %57 {offsets = [0, 1], sizes = [32, 1], strides = [1, 1]} : vector<32x2xf32> to vector<32x1xf32>
    %60 = vector.broadcast %56 : f32 to vector<32x1xf32>
    %61 = arith.mulf %59, %60 : vector<32x1xf32>
    %62 = math.roundeven %61 : vector<32x1xf32>
    %c-32_i32_21 = arith.constant -32 : i32
    %c31_i32_22 = arith.constant 31 : i32
    %63 = arith.sitofp %c-32_i32_21 : i32 to f32
    %64 = vector.broadcast %63 : f32 to vector<32x1xf32>
    %65 = arith.maximumf %64, %62 : vector<32x1xf32>
    %66 = arith.sitofp %c31_i32_22 : i32 to f32
    %67 = vector.broadcast %66 : f32 to vector<32x1xf32>
    %68 = arith.minimumf %67, %65 : vector<32x1xf32>
    %c0_23 = arith.constant 0 : index
    %c0_24 = arith.constant 0 : index
    %69 = vector.load %arg4[%c0_23, %c0_24] : memref<32x64xbf16, #tpu.memory_space<vmem>>, vector<32x64xbf16>
    %cst_25 = arith.constant dense<0.000000e+00> : vector<32x256xf32>
    %70 = tpu.matmul %69, %49, %cst_25 {dimension_numbers = #tpu.dot_dimension_numbers<[1], [0], [0], [1], [0, 0, 1, 1], [], []>} : vector<32x64xbf16>, vector<64x256xbf16>, vector<32x256xf32> -> vector<32x256xf32>
    %71 = vector.broadcast %58 : vector<32x1xf32> to vector<32x256xf32>
    %72 = arith.mulf %70, %71 : vector<32x256xf32>
    %73 = vector.broadcast %26 : f32 to vector<32x1xf32>
    %74 = arith.mulf %58, %73 : vector<32x1xf32>
    %75 = arith.mulf %68, %74 : vector<32x1xf32>
    %76 = vector.broadcast %75 : vector<32x1xf32> to vector<32x256xf32>
    %77 = arith.addf %72, %76 : vector<32x256xf32>
    %cst_26 = arith.constant 0.000000e+00 : f32
    %78 = vector.broadcast %cst_26 : f32 to vector<32x256xf32>
    %79 = arith.maximumf %77, %78 : vector<32x256xf32>
    %80 = arith.truncf %79 : vector<32x256xf32> to vector<32x256xbf16>
    %81 = vector.shape_cast %79 : vector<32x256xf32> to vector<1x32x256xf32>
    %cst_27 = arith.constant dense<0xFF800000> : vector<1xf32>
    %82 = vector.multi_reduction <maximumf>, %81, %cst_27 [1, 2] : vector<1x32x256xf32> to vector<1xf32>
    %83 = vector.shape_cast %82 : vector<1xf32> to vector<1x1x1xf32>
    %84 = vector.extract %83[0, 0, 0] : f32 from vector<1x1x1xf32>
    %cst_28 = arith.constant 9.99999993E-9 : f32
    %85 = arith.maximumf %84, %cst_28 : f32
    %cst_29 = arith.constant 3.100000e+01 : f32
    %86 = arith.divf %85, %cst_29 : f32
    %cst_30 = arith.constant 1.000000e+00 : f32
    %87 = arith.divf %cst_30, %55 : f32
    %c0_31 = arith.constant 0 : index
    %c0_32 = arith.constant 0 : index
    %88 = vector.load %arg7[%c0_31, %c0_32] : memref<32x2xf32, #tpu.memory_space<vmem>>, vector<32x2xf32>
    %89 = vector.extract_strided_slice %88 {offsets = [0, 0], sizes = [32, 1], strides = [1, 1]} : vector<32x2xf32> to vector<32x1xf32>
    %90 = vector.extract_strided_slice %88 {offsets = [0, 1], sizes = [32, 1], strides = [1, 1]} : vector<32x2xf32> to vector<32x1xf32>
    %91 = vector.broadcast %87 : f32 to vector<32x1xf32>
    %92 = arith.mulf %90, %91 : vector<32x1xf32>
    %93 = math.roundeven %92 : vector<32x1xf32>
    %c-32_i32_33 = arith.constant -32 : i32
    %c31_i32_34 = arith.constant 31 : i32
    %94 = arith.sitofp %c-32_i32_33 : i32 to f32
    %95 = vector.broadcast %94 : f32 to vector<32x1xf32>
    %96 = arith.maximumf %95, %93 : vector<32x1xf32>
    %97 = arith.sitofp %c31_i32_34 : i32 to f32
    %98 = vector.broadcast %97 : f32 to vector<32x1xf32>
    %99 = arith.minimumf %98, %96 : vector<32x1xf32>
    %c0_35 = arith.constant 0 : index
    %c0_36 = arith.constant 0 : index
    %100 = vector.load %arg6[%c0_35, %c0_36] : memref<32x32xbf16, #tpu.memory_space<vmem>>, vector<32x32xbf16>
    %cst_37 = arith.constant dense<0.000000e+00> : vector<32x256xf32>
    %101 = tpu.matmul %100, %80, %cst_37 {dimension_numbers = #tpu.dot_dimension_numbers<[1], [0], [0], [1], [0, 0, 1, 1], [], []>} : vector<32x32xbf16>, vector<32x256xbf16>, vector<32x256xf32> -> vector<32x256xf32>
    %102 = vector.broadcast %89 : vector<32x1xf32> to vector<32x256xf32>
    %103 = arith.mulf %101, %102 : vector<32x256xf32>
    %104 = vector.broadcast %55 : f32 to vector<32x1xf32>
    %105 = arith.mulf %89, %104 : vector<32x1xf32>
    %106 = arith.mulf %99, %105 : vector<32x1xf32>
    %107 = vector.broadcast %106 : vector<32x1xf32> to vector<32x256xf32>
    %108 = arith.addf %103, %107 : vector<32x256xf32>
    %cst_38 = arith.constant 0.000000e+00 : f32
    %109 = vector.broadcast %cst_38 : f32 to vector<32x256xf32>
    %110 = arith.maximumf %108, %109 : vector<32x256xf32>
    %111 = arith.truncf %110 : vector<32x256xf32> to vector<32x256xbf16>
    %cst_39 = arith.constant 1.000000e+00 : f32
    %112 = arith.divf %cst_39, %86 : f32
    %c0_40 = arith.constant 0 : index
    %c0_41 = arith.constant 0 : index
    %113 = vector.load %arg9[%c0_40, %c0_41] : memref<8x2xf32, #tpu.memory_space<vmem>>, vector<8x2xf32>
    %114 = vector.extract_strided_slice %113 {offsets = [0, 0], sizes = [8, 1], strides = [1, 1]} : vector<8x2xf32> to vector<8x1xf32>
    %115 = vector.extract_strided_slice %113 {offsets = [0, 1], sizes = [8, 1], strides = [1, 1]} : vector<8x2xf32> to vector<8x1xf32>
    %116 = vector.broadcast %112 : f32 to vector<8x1xf32>
    %117 = arith.mulf %115, %116 : vector<8x1xf32>
    %118 = math.roundeven %117 : vector<8x1xf32>
    %c-32_i32_42 = arith.constant -32 : i32
    %c31_i32_43 = arith.constant 31 : i32
    %119 = arith.sitofp %c-32_i32_42 : i32 to f32
    %120 = vector.broadcast %119 : f32 to vector<8x1xf32>
    %121 = arith.maximumf %120, %118 : vector<8x1xf32>
    %122 = arith.sitofp %c31_i32_43 : i32 to f32
    %123 = vector.broadcast %122 : f32 to vector<8x1xf32>
    %124 = arith.minimumf %123, %121 : vector<8x1xf32>
    %c0_44 = arith.constant 0 : index
    %c0_45 = arith.constant 0 : index
    %125 = vector.load %arg8[%c0_44, %c0_45] : memref<8x32xbf16, #tpu.memory_space<vmem>>, vector<8x32xbf16>
    %cst_46 = arith.constant dense<0.000000e+00> : vector<8x256xf32>
    %126 = tpu.matmul %125, %111, %cst_46 {dimension_numbers = #tpu.dot_dimension_numbers<[1], [0], [0], [1], [0, 0, 1, 1], [], []>} : vector<8x32xbf16>, vector<32x256xbf16>, vector<8x256xf32> -> vector<8x256xf32>
    %127 = vector.broadcast %114 : vector<8x1xf32> to vector<8x256xf32>
    %128 = arith.mulf %126, %127 : vector<8x256xf32>
    %129 = vector.broadcast %86 : f32 to vector<8x1xf32>
    %130 = arith.mulf %114, %129 : vector<8x1xf32>
    %131 = arith.mulf %124, %130 : vector<8x1xf32>
    %132 = vector.broadcast %131 : vector<8x1xf32> to vector<8x256xf32>
    %133 = arith.addf %128, %132 : vector<8x256xf32>
    %134 = math.absf %133 : vector<8x256xf32>
    %135 = vector.shape_cast %134 : vector<8x256xf32> to vector<1x8x256xf32>
    %cst_47 = arith.constant dense<0xFF800000> : vector<1xf32>
    %136 = vector.multi_reduction <maximumf>, %135, %cst_47 [1, 2] : vector<1x8x256xf32> to vector<1xf32>
    %137 = vector.shape_cast %136 : vector<1xf32> to vector<1x1x1xf32>
    %138 = vector.extract %137[0, 0, 0] : f32 from vector<1x1x1xf32>
    %cst_48 = arith.constant 9.99999993E-9 : f32
    %139 = arith.maximumf %138, %cst_48 : f32
    %cst_49 = arith.constant 3.100000e+01 : f32
    %140 = arith.divf %139, %cst_49 : f32
    %cst_50 = arith.constant 1.000000e+00 : f32
    %141 = arith.divf %cst_50, %140 : f32
    %142 = vector.broadcast %141 : f32 to vector<8x256xf32>
    %143 = arith.mulf %133, %142 : vector<8x256xf32>
    %144 = math.roundeven %143 : vector<8x256xf32>
    %c-32_i32_51 = arith.constant -32 : i32
    %c31_i32_52 = arith.constant 31 : i32
    %145 = arith.sitofp %c-32_i32_51 : i32 to f32
    %146 = vector.broadcast %145 : f32 to vector<8x256xf32>
    %147 = arith.maximumf %146, %144 : vector<8x256xf32>
    %148 = arith.sitofp %c31_i32_52 : i32 to f32
    %149 = vector.broadcast %148 : f32 to vector<8x256xf32>
    %150 = arith.minimumf %149, %147 : vector<8x256xf32>
    %151 = vector.broadcast %140 : f32 to vector<8x256xf32>
    %152 = arith.mulf %150, %151 : vector<8x256xf32>
    %153 = tpu.iota {dimensions = array<i32: 0>} : vector<8x256xi32>
    %c5_i32 = arith.constant 5 : i32
    %154 = vector.broadcast %c5_i32 : i32 to vector<8x256xi32>
    %155 = arith.cmpi slt, %153, %154 : vector<8x256xi32>
    %cst_53 = arith.constant 0xFF800000 : f32
    %156 = vector.broadcast %cst_53 : f32 to vector<8x256xf32>
    %157 = arith.select %155, %152, %156 : vector<8x256xi1>, vector<8x256xf32>
    %cst_54 = arith.constant dense<0xFF800000> : vector<256xf32>
    %158 = vector.multi_reduction <maximumf>, %157, %cst_54 [0] : vector<8x256xf32> to vector<256xf32>
    %159 = vector.shape_cast %158 : vector<256xf32> to vector<1x256xf32>
    %160 = vector.broadcast %159 : vector<1x256xf32> to vector<8x256xf32>
    %161 = arith.subf %157, %160 : vector<8x256xf32>
    %162 = math.exp %161 : vector<8x256xf32>
    %cst_55 = arith.constant dense<0.000000e+00> : vector<256xf32>
    %163 = vector.multi_reduction <add>, %162, %cst_55 [0] : vector<8x256xf32> to vector<256xf32>
    %164 = vector.shape_cast %163 : vector<256xf32> to vector<1x256xf32>
    %cst_56 = arith.constant 1.000000e+00 : f32
    %165 = vector.broadcast %cst_56 : f32 to vector<1x256xf32>
    %166 = arith.divf %165, %164 : vector<1x256xf32>
    %167 = vector.broadcast %166 : vector<1x256xf32> to vector<8x256xf32>
    %168 = arith.mulf %162, %167 : vector<8x256xf32>
    %cst_57 = arith.constant 0.000000e+00 : f32
    %169 = vector.broadcast %cst_57 : f32 to vector<112x256xf32>
    %170 = tpu.concatenate %46, %77, %108, %133, %168, %169 in 0 : vector<64x256xf32>, vector<32x256xf32>, vector<32x256xf32>, vector<8x256xf32>, vector<8x256xf32>, vector<112x256xf32> -> vector<256x256xf32>
    %171 = tpu.transpose %170, [1, 0] : vector<256x256xf32> -> vector<256x256xf32>
    %172 = vector.extract_strided_slice %171 {offsets = [0, 0], sizes = [256, 64], strides = [1, 1]} : vector<256x256xf32> to vector<256x64xf32>
    %c0_58 = arith.constant 0 : index
    %c0_59 = arith.constant 0 : index
    %173 = vector.load %arg11[%c0_58, %c0_59] : memref<256x64xf32, #tpu.memory_space<vmem>>, vector<256x64xf32>
    tpu.vector_store %arg11[%c0_58, %c0_59], %172 {strides = array<i32>} : memref<256x64xf32, #tpu.memory_space<vmem>>, vector<256x64xf32>,
    %174 = vector.extract_strided_slice %171 {offsets = [0, 64], sizes = [256, 32], strides = [1, 1]} : vector<256x256xf32> to vector<256x32xf32>
    %c0_60 = arith.constant 0 : index
    %c0_61 = arith.constant 0 : index
    %175 = vector.load %arg12[%c0_60, %c0_61] : memref<256x32xf32, #tpu.memory_space<vmem>>, vector<256x32xf32>
    tpu.vector_store %arg12[%c0_60, %c0_61], %174 {strides = array<i32>} : memref<256x32xf32, #tpu.memory_space<vmem>>, vector<256x32xf32>,
    %176 = vector.extract_strided_slice %171 {offsets = [0, 96], sizes = [256, 32], strides = [1, 1]} : vector<256x256xf32> to vector<256x32xf32>
    %c0_62 = arith.constant 0 : index
    %c0_63 = arith.constant 0 : index
    %177 = vector.load %arg13[%c0_62, %c0_63] : memref<256x32xf32, #tpu.memory_space<vmem>>, vector<256x32xf32>
    tpu.vector_store %arg13[%c0_62, %c0_63], %176 {strides = array<i32>} : memref<256x32xf32, #tpu.memory_space<vmem>>, vector<256x32xf32>,
    %178 = vector.extract_strided_slice %171 {offsets = [0, 128], sizes = [256, 5], strides = [1, 1]} : vector<256x256xf32> to vector<256x5xf32>
    %c0_64 = arith.constant 0 : index
    %c0_65 = arith.constant 0 : index
    %179 = vector.load %arg14[%c0_64, %c0_65] : memref<256x5xf32, #tpu.memory_space<vmem>>, vector<256x5xf32>
    tpu.vector_store %arg14[%c0_64, %c0_65], %178 {strides = array<i32>} : memref<256x5xf32, #tpu.memory_space<vmem>>, vector<256x5xf32>,
    %180 = vector.extract_strided_slice %171 {offsets = [0, 136], sizes = [256, 5], strides = [1, 1]} : vector<256x256xf32> to vector<256x5xf32>
    %c0_66 = arith.constant 0 : index
    %c0_67 = arith.constant 0 : index
    %181 = vector.load %arg10[%c0_66, %c0_67] : memref<256x5xf32, #tpu.memory_space<vmem>>, vector<256x5xf32>
    tpu.vector_store %arg10[%c0_66, %c0_67], %180 {strides = array<i32>} : memref<256x5xf32, #tpu.memory_space<vmem>>, vector<256x5xf32>,
    return
  }
  func.func @transform_0(%arg0: i32) -> (i32, i32) {
    %c0_i32 = arith.constant 0 : i32
    %c0_i32_0 = arith.constant 0 : i32
    return %arg0, %c0_i32 : i32, i32
  }
  func.func @transform_1(%arg0: i32) -> (i32, i32) {
    %c0_i32 = arith.constant 0 : i32
    %c0_i32_0 = arith.constant 0 : i32
    %c0_i32_1 = arith.constant 0 : i32
    return %c0_i32, %c0_i32_0 : i32, i32
  }
  func.func @transform_2(%arg0: i32) -> (i32, i32) {
    %c0_i32 = arith.constant 0 : i32
    %c0_i32_0 = arith.constant 0 : i32
    %c0_i32_1 = arith.constant 0 : i32
    return %c0_i32, %c0_i32_0 : i32, i32
  }
  func.func @transform_3(%arg0: i32) -> (i32, i32) {
    %c0_i32 = arith.constant 0 : i32
    %c0_i32_0 = arith.constant 0 : i32
    %c0_i32_1 = arith.constant 0 : i32
    return %c0_i32, %c0_i32_0 : i32, i32
  }
  func.func @transform_4(%arg0: i32) -> (i32, i32) {
    %c0_i32 = arith.constant 0 : i32
    %c0_i32_0 = arith.constant 0 : i32
    %c0_i32_1 = arith.constant 0 : i32
    return %c0_i32, %c0_i32_0 : i32, i32
  }
  func.func @transform_5(%arg0: i32) -> (i32, i32) {
    %c0_i32 = arith.constant 0 : i32
    %c0_i32_0 = arith.constant 0 : i32
    %c0_i32_1 = arith.constant 0 : i32
    return %c0_i32, %c0_i32_0 : i32, i32
  }
  func.func @transform_6(%arg0: i32) -> (i32, i32) {
    %c0_i32 = arith.constant 0 : i32
    %c0_i32_0 = arith.constant 0 : i32
    %c0_i32_1 = arith.constant 0 : i32
    return %c0_i32, %c0_i32_0 : i32, i32
  }
  func.func @transform_7(%arg0: i32) -> (i32, i32) {
    %c0_i32 = arith.constant 0 : i32
    %c0_i32_0 = arith.constant 0 : i32
    %c0_i32_1 = arith.constant 0 : i32
    return %c0_i32, %c0_i32_0 : i32, i32
  }
  func.func @transform_8(%arg0: i32) -> (i32, i32) {
    %c0_i32 = arith.constant 0 : i32
    %c0_i32_0 = arith.constant 0 : i32
    %c0_i32_1 = arith.constant 0 : i32
    return %c0_i32, %c0_i32_0 : i32, i32
  }
  func.func @transform_9(%arg0: i32) -> (i32, i32) {
    %c0_i32 = arith.constant 0 : i32
    %c0_i32_0 = arith.constant 0 : i32
    return %arg0, %c0_i32 : i32, i32
  }
  func.func @transform_10(%arg0: i32) -> (i32, i32) {
    %c0_i32 = arith.constant 0 : i32
    %c0_i32_0 = arith.constant 0 : i32
    return %arg0, %c0_i32 : i32, i32
  }
  func.func @transform_11(%arg0: i32) -> (i32, i32) {
    %c0_i32 = arith.constant 0 : i32
    %c0_i32_0 = arith.constant 0 : i32
    return %arg0, %c0_i32 : i32, i32
  }
  func.func @transform_12(%arg0: i32) -> (i32, i32) {
    %c0_i32 = arith.constant 0 : i32
    %c0_i32_0 = arith.constant 0 : i32
    return %arg0, %c0_i32 : i32, i32
  }
  func.func @transform_13(%arg0: i32) -> (i32, i32) {
    %c0_i32 = arith.constant 0 : i32
    %c0_i32_0 = arith.constant 0 : i32
    return %arg0, %c0_i32 : i32, i32
  }
}

</mosaic_0001>

<bundles_post_ra>
// kernel: tpu_custom_call.1
= control target key start
LH: loop header
LB: loop body
LE: loop exit
PB: predicated region body
PF: predicated region fallthrough
CT: control target
= control target key end

     0   :  { %s3344_s25 = smov 0   ;;  %s5120_s0 = inlined_call_operand.vmem [shape: f32[512,16], index: 0, kind: input, shape index: {}]   ;;  %s5121_s1 = inlined_call_operand.vmem [shape: bf16[64,16], index: 1, kind: input, shape index: {}]   ;;  %s5122_s2 = inlined_call_operand.vmem [shape: f32[64,2], index: 2, kind: input, shape index: {}]   ;;  %s5123_s3 = inlined_call_operand.vmem [shape: bf16[32,64], index: 3, kind: input, shape index: {}]   ;;  %s5124_s4 = inlined_call_operand.vmem [shape: f32[32,2], index: 4, kind: input, shape index: {}]   ;;  %s5125_s5 = inlined_call_operand.vmem [shape: bf16[32,32], index: 5, kind: input, shape index: {}]   ;;  %s5126_s6 = inlined_call_operand.vmem [shape: f32[32,2], index: 6, kind: input, shape index: {}]   ;;  %s5127_s7 = inlined_call_operand.vmem [shape: bf16[8,32], index: 7, kind: input, shape index: {}]   ;;  %s5128_s8 = inlined_call_operand.vmem [shape: f32[8,2], index: 8, kind: input, shape index: {}]   ;;  %s5129_s9 = inlined_call_operand.vmem [shape: f32[512,5], index: 9, kind: output, shape index: {0}]   ;;  %s5130_s10 = inlined_call_operand.vmem [shape: f32[512,64], index: 10, kind: output, shape index: {1}]   ;;  %s5131_s11 = inlined_call_operand.vmem [shape: f32[512,32], index: 11, kind: output, shape index: {2}]   ;;  %s5132_s12 = inlined_call_operand.vmem [shape: f32[512,32], index: 12, kind: output, shape index: {3}]   ;;  %s5133_s13 = inlined_call_operand.vmem [shape: f32[512,5], index: 13, kind: output, shape index: {4}]  }
   0x1 LB: > { %s2697_s26 = sadd.s32 4294967295, %s3264_s25   ;;  %p2701_p0 = scmp.ge.s32.totalorder %s3264_s25, 1  ;;  %s3264_s25 = sphi %s3344_s25, %s24_s25  }
   0x2   : > { %p397_p1 = scmp.lt.s32.totalorder %s3264_s25, 3 }
   0x4   : > { %p398_p2 = pnand %p2701_p0, %p397_p1 }
   0x6   : > { %401 = sbr.rel (%p398_p2) target bundleno = 2428 (0x97c), region = 56 }
   0xb   : > { %s2702_s27 = sshll.u32 %s2697_s26, 5  ;;  %vm562_vm0 = vcmask 130048   ;;  %s3268_s16 = smov 1e-08  }
   0xc   : > { %p462_p3 = scmp.lt.s32.totalorder %s2702_s27, 63  ;;  %s3270_s30 = smov 1  }
   0xe   : > { %s5233_s27 = smov (!%p462_p3, %s2702_s27), 63 }
   0xf   : > { %s3352_s28 = sshll.u32 %s5233_s27, 3 }
  0x10   : > { %s3358_s14 = scalar_lea.vmem %s5120_s0, %s3352_s28 }
  0x11   : > { %v3361_v0 = vld [vmem:[%s3358_s14] sm:$0xff]  ;;  %v3364_v1 = vld [vmem:[%s3358_s14 + $0x8] sm:$0xff]  ;;  %v3367_v2 = vld [vmem:[%s3358_s14 + $0x10] sm:$0xff] }
  0x12   : > { %v3370_v3 = vld [vmem:[%s3358_s14 + $0x18] sm:$0xff]  ;;  %v3373_v4 = vld [vmem:[%s3358_s14 + $0x20] sm:$0xff]  ;;  %v3376_v5 = vld [vmem:[%s3358_s14 + $0x28] sm:$0xff]  ;;  %v530_v7 = vand.u32 2147483647, %v3361_v0 }
  0x13   : > { %v504_v6 = vld [vmem:[%s3358_s14 + $0x30] sm:$0xff]  ;;  %v3381_v8 = vld [vmem:[%s3358_s14 + $0x38] sm:$0xff]  ;;  %v531_v9 = vand.u32 2147483647, %v3364_v1  ;;  %v532_v10 = vand.u32 2147483647, %v3367_v2 }
  0x14   : > { %v533_v11 = vand.u32 2147483647, %v3370_v3  ;;  %v3387_v12 = vld [vmem:[%s3358_s14 + $0x40] sm:$0xff]  ;;  %v3390_v13 = vld [vmem:[%s3358_s14 + $0x48] sm:$0xff]  ;;  %v3393_v14 = vld [vmem:[%s3358_s14 + $0x50] sm:$0xff]  ;;  %v563_v24 = vsel %vm562_vm0, %v530_v7, -inf }
  0x15   : > { %5154 = vst [vmem:[#allocation2_spill] sm:$0xff] %v3387_v12  ;;  %v534_v15 = vand.u32 2147483647, %v3373_v4  ;;  %v3397_v16 = vld [vmem:[%s3358_s14 + $0x58] sm:$0xff]  ;;  %v3400_v17 = vld [vmem:[%s3358_s14 + $0x60] sm:$0xff]  ;;  %v3403_v18 = vld [vmem:[%s3358_s14 + $0x68] sm:$0xff] }
  0x16   : > { %5155 = vst [vmem:[#allocation3_spill] sm:$0xff] %v3390_v13  ;;  %v535_v19 = vand.u32 2147483647, %v3376_v5  ;;  %v3407_v20 = vld [vmem:[%s3358_s14 + $0x70] sm:$0xff]  ;;  %v3410_v21 = vld [vmem:[%s3358_s14 + $0x78] sm:$0xff]  ;;  %v3413_v22 = vld [vmem:[%s3358_s14 + $0x80] sm:$0xff] }
  0x17   : > { %5156 = vst [vmem:[#allocation4_spill] sm:$0xff] %v3393_v14  ;;  %v536_v23 = vand.u32 2147483647, %v504_v6  ;;  %v3417_v25 = vld [vmem:[%s3358_s14 + $0x88] sm:$0xff]  ;;  %v3420_v26 = vld [vmem:[%s3358_s14 + $0x90] sm:$0xff]  ;;  %v3423_v27 = vld [vmem:[%s3358_s14 + $0x98] sm:$0xff] }
  0x18   : > { %5157 = vst [vmem:[#allocation5_spill] sm:$0xff] %v3397_v16  ;;  %v564_v28 = vsel %vm562_vm0, %v531_v9, -inf  ;;  %v565_v29 = vsel %vm562_vm0, %v532_v10, -inf  ;;  %v566_v30 = vsel %vm562_vm0, %v533_v11, -inf  ;;  %v3429_v31 = vld [vmem:[%s3358_s14 + $0xa0] sm:$0xff]  ;;  %v3432_v32 = vld [vmem:[%s3358_s14 + $0xa8] sm:$0xff] }
  0x19   : > { %5158 = vst [vmem:[#allocation6_spill] sm:$0xff] %v3400_v17  ;;  %v3435_v33 = vld [vmem:[%s3358_s14 + $0xb0] sm:$0xff]  ;;  %v537_v34 = vand.u32 2147483647, %v3381_v8  ;;  %v538_v35 = vand.u32 2147483647, %v3387_v12 }
  0x1a   : > { %5159 = vst [vmem:[#allocation7_spill] sm:$0xff] %v3403_v18  ;;  %v567_v36 = vsel %vm562_vm0, %v534_v15, -inf  ;;  %v3441_v37 = vld [vmem:[%s3358_s14 + $0xb8] sm:$0xff]  ;;  %v3444_v38 = vld [vmem:[%s3358_s14 + $0xc0] sm:$0xff]  ;;  %v3447_v39 = vld [vmem:[%s3358_s14 + $0xc8] sm:$0xff]  ;;  %v569_v42 = vsel %vm562_vm0, %v535_v19, -inf }
  0x1b   : > { %5160 = vst [vmem:[#allocation8_spill] sm:$0xff] %v3407_v20  ;;  %v539_v40 = vand.u32 2147483647, %v3390_v13  ;;  %v540_v41 = vand.u32 2147483647, %v3393_v14  ;;  %v571_v43 = vsel %vm562_vm0, %v536_v23, -inf  ;;  %v568_v59 = vmax.f32 %v563_v24, %v567_v36 }
  0x1c   : > { %5161 = vst [vmem:[#allocation9_spill] sm:$0xff] %v3410_v21  ;;  %v3454_v44 = vld [vmem:[%s3358_s14 + $0xd0] sm:$0xff]  ;;  %v3457_v45 = vld [vmem:[%s3358_s14 + $0xd8] sm:$0xff]  ;;  %v3460_v46 = vld [vmem:[%s3358_s14 + $0xe0] sm:$0xff]  ;;  %v541_v47 = vand.u32 2147483647, %v3397_v16  ;;  %v570_v63 = vmax.f32 %v564_v28, %v569_v42  ;;  %v572_v9 = vmax.f32 %v565_v29, %v571_v43 }
  0x1d   : > { %v542_v48 = vand.u32 2147483647, %v3400_v17  ;;  %v543_v49 = vand.u32 2147483647, %v3403_v18  ;;  %v3466_v50 = vld [vmem:[%s3358_s14 + $0xe8] sm:$0xff]  ;;  %v3469_v51 = vld [vmem:[%s3358_s14 + $0xf0] sm:$0xff] }
  0x1e   : > { %v3472_v52 = vld [vmem:[%s3358_s14 + $0xf8] sm:$0xff]  ;;  %v544_v53 = vand.u32 2147483647, %v3407_v20  ;;  %v545_v54 = vand.u32 2147483647, %v3410_v21  ;;  %v573_v28 = vsel %vm562_vm0, %v537_v34, -inf }
  0x1f   : > { %5162 = vst [vmem:[#allocation10_spill] sm:$0xff] %v3472_v52  ;;  %v546_v55 = vand.u32 2147483647, %v3413_v22  ;;  %v547_v56 = vand.u32 2147483647, %v3417_v25  ;;  %v575_v36 = vsel %vm562_vm0, %v538_v35, -inf  ;;  %v574_v43 = vmax.f32 %v566_v30, %v573_v28 }
  0x20   : > { %v548_v57 = vand.u32 2147483647, %v3420_v26  ;;  %v549_v58 = vand.u32 2147483647, %v3423_v27  ;;  %v550_v60 = vand.u32 2147483647, %v3429_v31  ;;  %v576_v13 = vmax.f32 %v568_v59, %v575_v36 }
  0x21   : > { %v551_v61 = vand.u32 2147483647, %v3432_v32  ;;  %v552_v62 = vand.u32 2147483647, %v3435_v33  ;;  %v553_v6 = vand.u32 2147483647, %v3441_v37 }
  0x22   : > { %v554_v7 = vand.u32 2147483647, %v3444_v38  ;;  %v555_v8 = vand.u32 2147483647, %v3447_v39  ;;  %v556_v10 = vand.u32 2147483647, %v3454_v44 }
  0x23   : > { %v557_v11 = vand.u32 2147483647, %v3457_v45  ;;  %v558_v15 = vand.u32 2147483647, %v3460_v46  ;;  %v559_v19 = vand.u32 2147483647, %v3466_v50 }
  0x24   : > { %v560_v23 = vand.u32 2147483647, %v3469_v51  ;;  %v561_v24 = vand.u32 2147483647, %v3472_v52  ;;  %v577_v42 = vsel %vm562_vm0, %v539_v40, -inf  ;;  %v579_v29 = vsel %vm562_vm0, %v540_v41, -inf }
  0x25   : > { %v578_v12 = vmax.f32 %v570_v63, %v577_v42  ;;  %v580_v16 = vmax.f32 %v572_v9, %v579_v29  ;;  %v581_v14 = vsel %vm562_vm0, %v541_v47, -inf  ;;  %v583_v18 = vsel %vm562_vm0, %v542_v48, -inf }
  0x26   : > { %v585_v17 = vsel %vm562_vm0, %v543_v49, -inf  ;;  %v587_v21 = vsel %vm562_vm0, %v544_v53, -inf  ;;  %v582_v20 = vmax.f32 %v574_v43, %v581_v14  ;;  %v584_v34 = vmax.f32 %v576_v13, %v583_v18 }
  0x27   : > { %v586_v52 = vmax.f32 %v578_v12, %v585_v17  ;;  %v588_v35 = vmax.f32 %v580_v16, %v587_v21  ;;  %v589_v40 = vsel %vm562_vm0, %v545_v54, -inf  ;;  %v591_v41 = vsel %vm562_vm0, %v546_v55, -inf }
  0x28   : > { %v593_v30 = vsel %vm562_vm0, %v547_v56, -inf  ;;  %v595_v59 = vsel %vm562_vm0, %v548_v57, -inf  ;;  %v590_v63 = vmax.f32 %v582_v20, %v589_v40  ;;  %v592_v47 = vmax.f32 %v584_v34, %v591_v41 }
  0x29   : > { %v594_v9 = vmax.f32 %v586_v52, %v593_v30  ;;  %v596_v48 = vmax.f32 %v588_v35, %v595_v59  ;;  %v597_v49 = vsel %vm562_vm0, %v549_v58, -inf  ;;  %v599_v53 = vsel %vm562_vm0, %v550_v60, -inf }
  0x2a   : > { %v601_v13 = vsel %vm562_vm0, %v551_v61, -inf  ;;  %v603_v12 = vsel %vm562_vm0, %v552_v62, -inf  ;;  %v598_v14 = vmax.f32 %v590_v63, %v597_v49  ;;  %v600_v16 = vmax.f32 %v592_v47, %v599_v53  ;;  %v927_v53 = vld [vmem:[%s5122_s2 + $0x30] sm:$0xff] }
  0x2b   : > { %v602_v17 = vmax.f32 %v594_v9, %v601_v13  ;;  %v604_v18 = vmax.f32 %v596_v48, %v603_v12  ;;  %v605_v21 = vsel %vm562_vm0, %v553_v6, -inf  ;;  %v607_v54 = vsel %vm562_vm0, %v554_v7, -inf  ;;  %v3531_v13 = vld [vmem:[%s5122_s2 + $0x28] sm:$0xff] }
  0x2c   : > { %v609_v20 = vsel %vm562_vm0, %v555_v8, -inf  ;;  %v611_v52 = vsel %vm562_vm0, %v556_v10, -inf  ;;  %v606_v55 = vmax.f32 %v598_v14, %v605_v21  ;;  %v608_v56 = vmax.f32 %v600_v16, %v607_v54 }
  0x2d   : > { %v610_v57 = vmax.f32 %v602_v17, %v609_v20  ;;  %v612_v58 = vmax.f32 %v604_v18, %v611_v52  ;;  %v613_v60 = vsel %vm562_vm0, %v557_v11, -inf  ;;  %v615_v61 = vsel %vm562_vm0, %v558_v15, -inf  ;;  %v928_v17 = vld [vmem:[%s5122_s2 + $0x38] sm:$0xff] }
  0x2e   : > { %v617_v62 = vsel %vm562_vm0, %v559_v19, -inf  ;;  %v619_v28 = vsel %vm562_vm0, %v560_v23, -inf  ;;  %v614_v36 = vmax.f32 %v606_v55, %v613_v60  ;;  %v616_v6 = vmax.f32 %v608_v56, %v615_v61 }
  0x2f   : > { %v618_v42 = vmax.f32 %v610_v57, %v617_v62  ;;  %v620_v7 = vmax.f32 %v612_v58, %v619_v28  ;;  %v621_v8 = vsel %vm562_vm0, %v561_v24, -inf  ;;  %v3266_v35 = vmov 31.0   ;;  %v925_v58 = vld [vmem:[%s5122_s2 + $0x20] sm:$0xff] }
  0x30   : > { %v622_v29 = vmax.f32 %v614_v36, %v621_v8  ;;  %3236 = vrcp.f32 %v3266_v35  ;;  %v3267_v49 = vmov 0   ;;  %v921_v36 = vld [vmem:[%s5122_s2] sm:$0xff]  ;;  %v3564_v8 = vld [vmem:[%s5122_s2 + $0x10] sm:$0xff] }
  0x31   : > { %v623_v10 = vmax.f32 %v616_v6, %v618_v42  ;;  %3222 = vset.pattern.permute.xlu1 %v3267_v49  ;;  %3221 = vset.pattern.permute.xlu2 %v3267_v49  ;;  %v5143_v42 = vmov 1  }
  0x32   : > { %v624_v43 = vmax.f32 %v620_v7, %v622_v29  ;;  %3224 = vset.pattern.permute.xlu0 %v5143_v42 }
  0x34   : > { %v625_v34 = vmax.f32 %v623_v10, %v624_v43 }
  0x36   : > { %626 = vmax.xlane.f32.xlu0 %v625_v34  ;;  %v3237_v11 = vpop.eup %3236 }
  0x37   : > { %v637_v40 = vmul.f32 31.0, %v3237_v11  ;;  %vm641_vm1 = vweird.f32 %v3237_v11 }
  0x39   : > { %v638_v15 = vsub.f32 1.0, %v637_v40 }
  0x3b   : > { %v639_v23 = vmul.f32 %v3237_v11, %v638_v15  ;;  %v5163_v15 = vld [vmem:[#allocation10_spill] sm:$0xff] }
  0x3d   : > { %v640_v47 = vadd.f32 %v3237_v11, %v639_v23 }
  0x3f   : > { %v642_v48 = vsel %vm641_vm1, %v3237_v11, %v640_v47 }
  0xa9   : > { %v627_v41 = vpop.xlane.xlu0 %626 }
  0xaa   : > { %v628_v19 = vrot.slane %v627_v41, 4 }
  0xac   : > { %v629_v30 = vmax.f32 %v627_v41, %v628_v19 }
  0xae   : > { %v630_v59 = vrot.slane %v629_v30, 2 }
  0xb0   : > { %v631_v63 = vmax.f32 %v629_v30, %v630_v59 }
  0xb2   : > { %v632_v9 = vrot.slane %v631_v63, 1 }
  0xb4   : > { %v633_v24 = vmax.f32 %v631_v63, %v632_v9 }
  0xb6   : > { %2774 = vpush %v633_v24 }
  0xb7   : > { %2776 = vpush %v642_v48 }
  0xe7   : > { %s2775_s15 = spop %2774 }
  0xe8   : > { %s635_s17 = smax.f32 %s3268_s16, %s2775_s15  ;;  %s3520_s18 = spop %2776 }
  0xe9   : > { %s3523_s19 = smul.f32 %s3520_s18, %s635_s17  ;;  %s3272_s15 = smov 32  }
  0xeb   : > { %v3534_v12 = vstv %s3523_s19 }
  0xec   : > { %v1154_v14 = vmul.f32 %v927_v53, %v3534_v12  ;;  %v1153_v16 = vmul.f32 %v3531_v13, %v3534_v12  ;;  %3238 = vrcp.f32 %v3534_v12  ;;  %v1155_v54 = vmul.f32 %v928_v17, %v3534_v12 }
  0xed   : > { %v657_v52 = vand.u32 2147483648, %v3534_v12  ;;  %v655_v56 = vand.u32 2147483647, %v3534_v12  ;;  %vm651_vm3 = vweird.f32 %v3534_v12  ;;  %v1152_v28 = vmul.f32 %v925_v58, %v3534_v12 }
  0xee   : > { %1188 = vperm.xlu2 %3221, %v1154_v14   ;;  %1183 = vperm.xlu1 %3222, %v1153_v16   ;;  %v1148_v6 = vmul.f32 %v921_v36, %v3534_v12  ;;  %v3572_v10 = vmul.f32 %v3564_v8, %v3534_v12 }
  0xef   : > { %v658_v60 = vor.u32 1.1754944e-38, %v657_v52  ;;  %vm656_vm5 = vcmp.eq.f32.partialorder %v655_v56, 8.507059e+37 }
  0xf2   : > { %v3239_v18 = vpop.eup %3238 }
  0xf3   : > { %v647_v21 = vmul.f32 %v3239_v18, %v3534_v12  ;;  %vm652_vm2 = vweird.f32 %v3239_v18 }
  0xf4   : > { %vm653_vm4 = vmor %vm651_vm3, %vm652_vm2 }
  0xf5   : > { %v648_v20 = vsub.f32 1.0, %v647_v21 }
  0xf6   : > { %1193 = vperm.xlu2 %3221, %v1155_v54   ;;  %3223 = vset.pattern.permute.xlu1 %v5143_v42 }
  0xf7   : > { %v649_v55 = vmul.f32 %v3239_v18, %v648_v20 }
  0xf9   : > { %v650_v57 = vadd.f32 %v3239_v18, %v649_v55 }
  0xfb   : > { %v654_v61 = vsel %vm653_vm4, %v3239_v18, %v650_v57 }
  0xfc   : > { %v659_v62 = vsel %vm656_vm5, %v658_v60, %v654_v61  ;;  %v5168_v60 = vld [vmem:[#allocation8_spill] sm:$0xff] }
  0xfd   : > { %2778 = vpush %v659_v62  ;;  %v5169_v62 = vld [vmem:[#allocation9_spill] sm:$0xff] }
  0xfe   : > { %1178 = vperm.xlu2 %3221, %v1152_v28  }
 0x106   : > { %1158 = vperm.xlu2 %3221, %v1148_v6  }
 0x10e   : > { %3225 = vset.pattern.permute.xlu2 %v5143_v42 }
 0x12e   : > { %s2779_s17 = spop %2778 }
 0x12f   : > { %v3559_v7 = vstv %s2779_s17 }
 0x130   : > { %v3568_v29 = vmul.f32 %v3559_v7, %v3361_v0  ;;  %v3576_v43 = vmul.f32 %v3559_v7, %v3364_v1  ;;  %v3580_v34 = vmul.f32 %v3559_v7, %v3367_v2  ;;  %v3584_v35 = vmul.f32 %v3559_v7, %v3370_v3 }
 0x131   : > { %v3588_v0 = vmul.f32 %v3559_v7, %v3373_v4  ;;  %v3592_v11 = vmul.f32 %v3559_v7, %v3376_v5  ;;  %v3596_v1 = vmul.f32 %v3559_v7, %v3413_v22  ;;  %v3600_v2 = vmul.f32 %v3559_v7, %v3417_v25 }
 0x132   : > { %v3604_v3 = vmul.f32 %v3559_v7, %v3420_v26  ;;  %v3608_v4 = vmul.f32 %v3559_v7, %v3423_v27  ;;  %v3612_v5 = vmul.f32 %v3559_v7, %v3429_v31  ;;  %v3616_v22 = vmul.f32 %v3559_v7, %v3432_v32 }
 0x133   : > { %v3620_v25 = vmul.f32 %v3559_v7, %v3435_v33  ;;  %v3624_v26 = vmul.f32 %v3559_v7, %v3441_v37  ;;  %v3628_v27 = vmul.f32 %v3559_v7, %v3444_v38  ;;  %v3632_v31 = vmul.f32 %v3559_v7, %v3447_v39 }
 0x134   : > { %v935_v40 = vmul.f32 %v927_v53, %v3559_v7  ;;  %v3637_v32 = vmul.f32 %v3559_v7, %v3454_v44  ;;  %v3641_v33 = vmul.f32 %v3559_v7, %v3457_v45  ;;  %v3645_v37 = vmul.f32 %v3559_v7, %v3460_v46 }
 0x135   : > { %v3649_v38 = vmul.f32 %v3559_v7, %v3466_v50  ;;  %v3653_v39 = vmul.f32 %v3559_v7, %v3469_v51  ;;  %v3657_v44 = vmul.f32 %v3559_v7, %v5163_v15  ;;  %v929_v41 = vmul.f32 %v921_v36, %v3559_v7 }
 0x136   : > { %v933_v45 = vmul.f32 %v925_v58, %v3559_v7  ;;  %v3663_v46 = vmul.f32 %v3531_v13, %v3559_v7  ;;  %v3666_v19 = vmul.f32 %v928_v17, %v3559_v7  ;;  %v2910_v50 = vcvt.f32.s32 %v3596_v1 }
 0x137   : > { %v2913_v51 = vand.u32 2147483648, %v3596_v1  ;;  %v2918_v30 = vcvt.f32.s32 %v3600_v2  ;;  %v2926_v59 = vcvt.f32.s32 %v3604_v3  ;;  %v3088_v63 = vcvt.f32.s32 %v935_v40 }
 0x138   : > { %v2934_v9 = vcvt.f32.s32 %v3608_v4  ;;  %v3086_v48 = vand.u32 2147483647, %v935_v40  ;;  %v2942_v53 = vcvt.f32.s32 %v3612_v5  ;;  %v3070_v14 = vand.u32 2147483647, %v933_v45 }
 0x139   : > { %v3089_v13 = vcvt.s32.f32 %v3088_v63  ;;  %v3072_v16 = vcvt.f32.s32 %v933_v45  ;;  %v3091_v18 = vand.u32 2147483648, %v935_v40  ;;  %v3038_v21 = vand.u32 2147483647, %v929_v41 }
 0x13a   : > { %v3040_v54 = vcvt.f32.s32 %v929_v41  ;;  %vm3678_vm6 = vcmp.lt.f32.partialorder %v3086_v48, 8388608.0  ;;  %v3075_v56 = vand.u32 2147483648, %v933_v45  ;;  %vm3682_vm7 = vcmp.lt.f32.partialorder %v3070_v14, 8388608.0 }
 0x13b   : > { %v3090_v52 = vand.u32 2147483647, %v3089_v13  ;;  %v3073_v55 = vcvt.s32.f32 %v3072_v16  ;;  %v676_v61 = vmul.f32 %v3559_v7, %v5168_v60  ;;  %v677_v28 = vmul.f32 %v3559_v7, %v5169_v62 }
 0x13c   : > { %v3041_v58 = vcvt.s32.f32 %v3040_v54  ;;  %vm3690_vm8 = vcmp.lt.f32.partialorder %v3038_v21, 8388608.0  ;;  %v3043_v63 = vand.u32 2147483648, %v929_v41  ;;  %v3020_v16 = vand.u32 2147483647, %v3653_v39 }
 0x13d   : > { %v3092_v36 = vor.u32 %v3091_v18, %v3090_v52  ;;  %v3074_v6 = vand.u32 2147483647, %v3073_v55  ;;  %v2892_v13 = vand.u32 2147483647, %v676_v61  ;;  %v2894_v14 = vcvt.f32.s32 %v676_v61 }
 0x13e   : > { %v3042_v48 = vand.u32 2147483647, %v3041_v58  ;;  %v2902_v60 = vcvt.f32.s32 %v677_v28  ;;  %v3022_v42 = vcvt.f32.s32 %v3653_v39  ;;  %v2897_v21 = vand.u32 2147483648, %v676_v61 }
 0x13f   : > { %v3093_v54 = vsel %vm3678_vm6, %v3092_v36, %v935_v40  ;;  %v3076_v17 = vor.u32 %v3075_v56, %v3074_v6  ;;  %v2895_v52 = vcvt.s32.f32 %v2894_v14  ;;  %vm3700_vm9 = vcmp.lt.f32.partialorder %v2892_v13, 8388608.0 }
 0x140   : > { %v951_v62 = vmax.f32 %v3093_v54, -32.0  ;;  %v3044_v18 = vor.u32 %v3043_v63, %v3042_v48  ;;  %v2900_v24 = vand.u32 2147483647, %v677_v28  ;;  %v2903_v47 = vcvt.s32.f32 %v2902_v60 }
 0x141   : > { %v3077_v55 = vsel %vm3682_vm7, %v3076_v17, %v933_v45  ;;  %v2896_v56 = vand.u32 2147483647, %v2895_v52  ;;  %v2905_v63 = vand.u32 2147483648, %v677_v28  ;;  %v3023_v48 = vcvt.s32.f32 %v3022_v42 }
 0x142   : > { %v959_v23 = vmin.f32 %v951_v62, 31.0  ;;  %v949_v20 = vmax.f32 %v3077_v55, -32.0  ;;  %v3045_v40 = vsel %vm3690_vm8, %v3044_v18, %v929_v41  ;;  %v2904_v6 = vand.u32 2147483647, %v2903_v47 }
 0x143   : > { %v945_v36 = vmax.f32 %v3045_v40, -32.0  ;;  %v2898_v57 = vor.u32 %v2897_v21, %v2896_v56  ;;  %v3025_v45 = vand.u32 2147483648, %v3653_v39  ;;  %v3028_v17 = vand.u32 2147483647, %v3657_v44 }
 0x144   : > { %1001 = vperm.xlu1 %3223, %v959_v23   ;;  %v957_v14 = vmin.f32 %v949_v20, 31.0  ;;  %v2906_v54 = vor.u32 %v2905_v63, %v2904_v6  ;;  %v3024_v60 = vand.u32 2147483647, %v3023_v48  ;;  %v3030_v62 = vcvt.f32.s32 %v3657_v44 }
 0x145   : > { %v953_v13 = vmin.f32 %v945_v36, 31.0  ;;  %v2950_v15 = vcvt.f32.s32 %v3616_v22  ;;  %v2899_v41 = vsel %vm3700_vm9, %v2898_v57, %v676_v61  ;;  %vm2901_vm10 = vcmp.lt.f32.partialorder %v2900_v24, 8388608.0 }
 0x146   : > { %991 = vperm.xlu0 %3224, %v957_v14   ;;  %vm3021_vm11 = vcmp.lt.f32.partialorder %v3020_v16, 8388608.0  ;;  %v2907_v42 = vsel %vm2901_vm10, %v2906_v54, %v677_v28  ;;  %v740_v23 = vmax.f32 %v2899_v41, -32.0  ;;  %v3026_v47 = vor.u32 %v3025_v45, %v3024_v60 }
 0x147   : > { %971 = vperm.xlu2 %3225, %v953_v13   ;;  %v3031_v18 = vcvt.s32.f32 %v3030_v62  ;;  %v741_v52 = vmax.f32 %v2907_v42, -32.0  ;;  %vm3712_vm12 = vcmp.lt.f32.partialorder %v3028_v17, 8388608.0  ;;  %v3033_v55 = vand.u32 2147483648, %v3657_v44  ;;  %v5176_v13 = vld [vmem:[#allocation6_spill] sm:$0xff] }
 0x148   : > { %v3096_v20 = vcvt.f32.s32 %v3666_v19  ;;  %v772_v40 = vmin.f32 %v740_v23, 31.0  ;;  %v3027_v58 = vsel %vm3021_vm11, %v3026_v47, %v3653_v39  ;;  %v931_v24 = vmul.f32 %v3564_v8, %v3559_v7 }
 0x149   : > { %v3032_v61 = vand.u32 2147483647, %v3031_v18  ;;  %v773_v28 = vmin.f32 %v741_v52, 31.0  ;;  %v3721_v16 = vmax.f32 %v3027_v58, -32.0  ;;  %v3094_v56 = vand.u32 2147483647, %v3666_v19 }
 0x14a   : > { %v3097_v36 = vcvt.s32.f32 %v3096_v20  ;;  %v820_v6 = vand.u32 2147483647, %v772_v40  ;;  %v3099_v48 = vand.u32 2147483648, %v3666_v19  ;;  %v3056_v14 = vcvt.f32.s32 %v931_v24  ;;  %v5177_v20 = vld [vmem:[#allocation7_spill] sm:$0xff] }
 0x14b   : > { %v3034_v63 = vor.u32 %v3033_v55, %v3032_v61  ;;  %v797_v57 = vpack.c.bf16 %v773_v28, %v772_v40  ;;  %v821_v45 = vand.u32 2147483647, %v773_v28  ;;  %v674_v39 = vmul.f32 %v3559_v7, %v5176_v13 }
 0x14c   : > { %v3098_v17 = vand.u32 2147483647, %v3097_v36  ;;  %v3728_v54 = vsel %vm562_vm0, %v820_v6, -inf  ;;  %v3054_v60 = vand.u32 2147483647, %v931_v24  ;;  %v3057_v62 = vcvt.s32.f32 %v3056_v14 }
 0x14d   : > { %v3035_v8 = vsel %vm3712_vm12, %v3034_v63, %v3657_v44  ;;  %v3734_v41 = vsel %vm562_vm0, %v821_v45, -inf  ;;  %v1063_v42 = vsel %vm562_vm0, %v797_v57, 0  ;;  %v5146_v47 = vmin.f32 %v3721_v16, 31.0 }
 0x14e   : > { %v3737_v23 = vmax.f32 %v3035_v8, -32.0  ;;  %3228 = vset.pattern.permute.xlu0 %v3267_v49  ;;  %v859_v18 = vmax.f32 %v3734_v41, %v3728_v54  ;;  %1089 = vmatpush.bf16.xpose.msra.mxu0 %v1063_v42  ;;  %v3100_v52 = vor.u32 %v3099_v48, %v3098_v17  ;;  %v3058_v21 = vand.u32 2147483647, %v3057_v62  ;;  %v3832_v54 = vld [vmem:[%s5122_s2 + $0x8] sm:$0xff] }
 0x14f   : > { %v3059_v44 = vand.u32 2147483648, %v931_v24  ;;  %vm3095_vm13 = vcmp.lt.f32.partialorder %v3094_v56, 8388608.0  ;;  %v675_v40 = vmul.f32 %v3559_v7, %v5177_v20  ;;  %v2878_v58 = vcvt.f32.s32 %v674_v39 }
 0x150   : > { %v5145_v55 = vmin.f32 %v3737_v23, 31.0  ;;  %v2953_v61 = vand.u32 2147483648, %v3616_v22  ;;  %v3080_v28 = vcvt.f32.s32 %v3663_v46  ;;  %v3101_v36 = vsel %vm3095_vm13, %v3100_v52, %v3666_v19 }
 0x151   : > { %v3060_v6 = vor.u32 %v3059_v44, %v3058_v21  ;;  %v952_v48 = vmax.f32 %v3101_v36, -32.0  ;;  %vm3055_vm14 = vcmp.lt.f32.partialorder %v3054_v60, 8388608.0  ;;  %v2876_v14 = vand.u32 2147483647, %v674_v39 }
 0x152   : > { %v805_v63 = vpack.c.bf16 %v5145_v55, %v5146_v47  ;;  %v2879_v57 = vcvt.s32.f32 %v2878_v58  ;;  %v2884_v45 = vand.u32 2147483647, %v675_v40  ;;  %v2886_v17 = vcvt.f32.s32 %v675_v40  ;;  %v5182_v47 = vld [vmem:[#allocation4_spill] sm:$0xff] }
 0x153   : > { %v3061_v56 = vsel %vm3055_vm14, %v3060_v6, %v931_v24  ;;  %v3755_v13 = vcvt.s32.f32 %v2910_v50  ;;  %v960_v19 = vmin.f32 %v952_v48, 31.0  ;;  %v2881_v52 = vand.u32 2147483648, %v674_v39 }
 0x154   : > { %v1087_v8 = vsel %vm562_vm0, %v805_v63, 0  ;;  %v947_v62 = vmax.f32 %v3061_v56, -32.0  ;;  %v2880_v42 = vand.u32 2147483647, %v2879_v57  ;;  %v2887_v21 = vcvt.s32.f32 %v2886_v17 }
 0x155   : > { %1118 = vmatpush.bf16.xpose.msra.mxu1 %v1087_v8  ;;  %v3004_v44 = vand.u32 2147483647, %v3645_v37  ;;  %1006 = vperm.xlu1 %3223, %v960_v19   ;;  %vm3759_vm15 = vcmp.lt.f32.partialorder %v2876_v14, 8388608.0  ;;  %v2889_v20 = vand.u32 2147483648, %v675_v40  ;;  %v3006_v50 = vcvt.f32.s32 %v3645_v37 }
 0x156   : > { %v955_v60 = vmin.f32 %v947_v62, 31.0  ;;  %v2882_v58 = vor.u32 %v2881_v52, %v2880_v42  ;;  %vm3764_vm1 = vcmp.lt.f32.partialorder %v2884_v45, 8388608.0  ;;  %v2888_v6 = vand.u32 2147483647, %v2887_v21 }
 0x157   : > { %v3014_v63 = vcvt.f32.s32 %v3649_v38  ;;  %v3007_v48 = vcvt.s32.f32 %v3006_v50  ;;  %v3009_v56 = vand.u32 2147483648, %v3645_v37  ;;  %v3012_v14 = vand.u32 2147483647, %v3649_v38 }
 0x158   : > { %981 = vperm.xlu2 %3225, %v955_v60   ;;  %v3081_v57 = vcvt.s32.f32 %v3080_v28  ;;  %v2883_v17 = vsel %vm3759_vm15, %v2882_v58, %v674_v39  ;;  %v2890_v8 = vor.u32 %v2889_v20, %v2888_v6  ;;  %v3078_v45 = vand.u32 2147483647, %v3663_v46 }
 0x159   : > { %v3015_v19 = vcvt.s32.f32 %v3014_v63  ;;  %v738_v62 = vmax.f32 %v2883_v17, -32.0  ;;  %v3008_v42 = vand.u32 2147483647, %v3007_v48  ;;  %v3083_v21 = vand.u32 2147483648, %v3663_v46 }
 0x15a   : > { %v3082_v52 = vand.u32 2147483647, %v3081_v57  ;;  %v2891_v60 = vsel %vm3764_vm1, %v2890_v8, %v675_v40  ;;  %v3017_v55 = vand.u32 2147483648, %v3649_v38  ;;  %v672_v28 = vmul.f32 %v3559_v7, %v5182_v47  ;;  %v5183_v47 = vld [vmem:[#allocation5_spill] sm:$0xff] }
 0x15b   : > { %v3016_v50 = vand.u32 2147483647, %v3015_v19  ;;  %v739_v24 = vmax.f32 %v2891_v60, -32.0  ;;  %v770_v39 = vmin.f32 %v738_v62, 31.0  ;;  %v3010_v20 = vor.u32 %v3009_v56, %v3008_v42 }
 0x15c   : > { %v3084_v58 = vor.u32 %v3083_v21, %v3082_v52  ;;  %vm3005_vm2 = vcmp.lt.f32.partialorder %v3004_v44, 8388608.0  ;;  %vm3079_vm3 = vcmp.lt.f32.partialorder %v3078_v45, 8388608.0  ;;  %v2862_v63 = vcvt.f32.s32 %v672_v28 }
 0x15d   : > { %v3018_v6 = vor.u32 %v3017_v55, %v3016_v50  ;;  %v771_v48 = vmin.f32 %v739_v24, 31.0  ;;  %v3011_v57 = vsel %vm3005_vm2, %v3010_v20, %v3645_v37  ;;  %vm3013_vm4 = vcmp.lt.f32.partialorder %v3012_v14, 8388608.0 }
 0x15e   : > { %v3085_v40 = vsel %vm3079_vm3, %v3084_v58, %v3663_v46  ;;  %v3783_v17 = vmax.f32 %v3011_v57, -32.0  ;;  %v673_v19 = vmul.f32 %v3559_v7, %v5183_v47  ;;  %v3789_v44 = vcvt.s32.f32 %v2918_v30 }
 0x15f   : > { %v3019_v36 = vsel %vm3013_vm4, %v3018_v6, %v3649_v38  ;;  %v950_v8 = vmax.f32 %v3085_v40, -32.0  ;;  %v796_v55 = vpack.c.bf16 %v771_v48, %v770_v39  ;;  %v2860_v37 = vand.u32 2147483647, %v672_v28 }
 0x160   : > { %v3791_v56 = vmax.f32 %v3019_v36, -32.0  ;;  %3227 = vset.pattern.permute.xlu2 %v3267_v49  ;;  %v818_v14 = vand.u32 2147483647, %v770_v39  ;;  %v5148_v46 = vmin.f32 %v3783_v17, 31.0  ;;  %v2863_v45 = vcvt.s32.f32 %v2862_v63 }
 0x161   : > { %v958_v38 = vmin.f32 %v950_v8, 31.0  ;;  %1168 = vperm.xlu2 %3227, %v3572_v10   ;;  %v3798_v62 = vcvt.s32.f32 %v2926_v59  ;;  %v3802_v30 = vcvt.s32.f32 %v2934_v9  ;;  %v1060_v42 = vsel %vm562_vm0, %v796_v55, 0 }
 0x162   : > { %v5147_v52 = vmin.f32 %v3791_v56, 31.0  ;;  %v3808_v21 = vcvt.s32.f32 %v2942_v53  ;;  %1090 = vmatpush.bf16.xpose.msra.mxu0 %v1060_v42  ;;  %v2864_v10 = vand.u32 2147483647, %v2863_v45  ;;  %v2865_v60 = vand.u32 2147483648, %v672_v28 }
 0x163   : > { %996 = vperm.xlu1 %3223, %v958_v38   ;;  %v2870_v50 = vcvt.f32.s32 %v673_v19  ;;  %v3812_v59 = vcvt.s32.f32 %v2950_v15  ;;  %v819_v24 = vand.u32 2147483647, %v771_v48  ;;  %vm2861_vm5 = vcmp.lt.f32.partialorder %v2860_v37, 8388608.0 }
 0x164   : > { %v804_v9 = vpack.c.bf16 %v5147_v52, %v5148_v46  ;;  %v858_v39 = vsel %vm562_vm0, %v818_v14, -inf  ;;  %v2866_v53 = vor.u32 %v2865_v60, %v2864_v10  ;;  %v2990_v58 = vcvt.f32.s32 %v3637_v32 }
 0x165   : > { %v2871_v20 = vcvt.s32.f32 %v2870_v50  ;;  %v3823_v6 = vmax.f32 %v858_v39, %v859_v18  ;;  %v2868_v63 = vand.u32 2147483647, %v673_v19  ;;  %v2998_v48 = vcvt.f32.s32 %v3641_v33 }
 0x166   : > { %v1084_v15 = vsel %vm562_vm0, %v804_v9, 0  ;;  %v2867_v57 = vsel %vm2861_vm5, %v2866_v53, %v672_v28  ;;  %v2873_v36 = vand.u32 2147483648, %v673_v19  ;;  %v2991_v8 = vcvt.s32.f32 %v2990_v58 }
 0x167   : > { %1119 = vmatpush.bf16.xpose.msra.mxu1 %v1084_v15  ;;  %v2872_v40 = vand.u32 2147483647, %v2871_v20  ;;  %v736_v47 = vmax.f32 %v2867_v57, -32.0  ;;  %v2988_v55 = vand.u32 2147483647, %v3637_v32  ;;  %v2999_v14 = vcvt.s32.f32 %v2998_v48 }
 0x168   : > { %v2996_v37 = vand.u32 2147483647, %v3641_v33  ;;  %v2992_v18 = vand.u32 2147483647, %v2991_v8  ;;  %v2993_v38 = vand.u32 2147483648, %v3637_v32  ;;  %v930_v28 = vmul.f32 %v3832_v54, %v3559_v7 }
 0x169   : > { %v2874_v41 = vor.u32 %v2873_v36, %v2872_v40  ;;  %vm2869_vm6 = vcmp.lt.f32.partialorder %v2868_v63, 8388608.0  ;;  %v768_v45 = vmin.f32 %v736_v47, 31.0  ;;  %v3000_v42 = vand.u32 2147483647, %v2999_v14 }
 0x16a   : > { %v3001_v10 = vand.u32 2147483648, %v3641_v33  ;;  %v3839_v60 = vsel %vm562_vm0, %v819_v24, -inf  ;;  %v2994_v9 = vor.u32 %v2993_v38, %v2992_v18  ;;  %v3048_v39 = vcvt.f32.s32 %v930_v28 }
 0x16b   : > { %v2875_v50 = vsel %vm2869_vm6, %v2874_v41, %v673_v19  ;;  %vm2989_vm7 = vcmp.lt.f32.partialorder %v2988_v55, 8388608.0  ;;  %vm2997_vm8 = vcmp.lt.f32.partialorder %v2996_v37, 8388608.0  ;;  %v3046_v15 = vand.u32 2147483647, %v930_v28  ;;  %v5184_v41 = vld [vmem:[#allocation2_spill] sm:$0xff] }
 0x16c   : > { %v737_v53 = vmax.f32 %v2875_v50, -32.0  ;;  %v3002_v20 = vor.u32 %v3001_v10, %v3000_v42  ;;  %v2995_v58 = vsel %vm2989_vm7, %v2994_v9, %v3637_v32  ;;  %v3049_v48 = vcvt.s32.f32 %v3048_v39  ;;  %v5185_v42 = vld [vmem:[#allocation3_spill] sm:$0xff] }
 0x16d   : > { %v2780_v63 = vand.u32 2147483647, %v3568_v29  ;;  %v816_v40 = vand.u32 2147483647, %v768_v45  ;;  %v3844_v8 = vmax.f32 %v2995_v58, -32.0  ;;  %v3051_v47 = vand.u32 2147483648, %v930_v28 }
 0x16e   : > { %v769_v57 = vmin.f32 %v737_v53, 31.0  ;;  %v3003_v36 = vsel %vm2997_vm8, %v3002_v20, %v3641_v33  ;;  %v3050_v19 = vand.u32 2147483647, %v3049_v48  ;;  %v2782_v55 = vcvt.f32.s32 %v3568_v29 }
 0x16f   : > { %v3846_v24 = vmax.f32 %v3003_v36, -32.0  ;;  %v855_v37 = vmax.f32 %v3839_v60, %v3823_v6  ;;  %v5152_v14 = vmin.f32 %v3844_v8, 31.0  ;;  %v3854_v18 = vmul.f32 %v3559_v7, %v5184_v41 }
 0x170   : > { %v795_v32 = vpack.c.bf16 %v769_v57, %v768_v45  ;;  %v3052_v38 = vor.u32 %v3051_v47, %v3050_v19  ;;  %v3859_v10 = vmul.f32 %v3559_v7, %v5185_v42  ;;  %v2783_v50 = vcvt.s32.f32 %v2782_v55 }
 0x171   : > { %v5151_v33 = vmin.f32 %v3846_v24, 31.0  ;;  %vm3047_vm9 = vcmp.lt.f32.partialorder %v3046_v15, 8388608.0  ;;  %vm3862_vm10 = vcmp.lt.f32.partialorder %v2780_v63, 8388608.0  ;;  %v2790_v45 = vcvt.f32.s32 %v3576_v43 }
 0x172   : > { %v1057_v9 = vsel %vm562_vm0, %v795_v32, 0  ;;  %v3868_v53 = vsel %vm562_vm0, %v816_v40, -inf  ;;  %v3053_v58 = vsel %vm3047_vm9, %v3052_v38, %v930_v28  ;;  %v2788_v48 = vand.u32 2147483647, %v3576_v43 }
 0x173   : > { %1091 = vmatpush.bf16.xpose.msra.mxu0 %v1057_v9  ;;  %v803_v20 = vpack.c.bf16 %v5151_v33, %v5152_v14  ;;  %v946_v36 = vmax.f32 %v3053_v58, -32.0  ;;  %v2784_v15 = vand.u32 2147483647, %v2783_v50  ;;  %v2785_v63 = vand.u32 2147483648, %v3568_v29 }
 0x174   : > { %v2791_v19 = vcvt.s32.f32 %v2790_v45  ;;  %v3876_v47 = vand.u32 2147483647, %v769_v57  ;;  %v2812_v40 = vand.u32 2147483647, %v3588_v0  ;;  %v2814_v32 = vcvt.f32.s32 %v3588_v0 }
 0x175   : > { %v1081_v55 = vsel %vm562_vm0, %v803_v20, 0  ;;  %v954_v41 = vmin.f32 %v946_v36, 31.0  ;;  %v2786_v42 = vor.u32 %v2785_v63, %v2784_v15  ;;  %v2793_v28 = vand.u32 2147483648, %v3576_v43 }
 0x176   : > { %1120 = vmatpush.bf16.xpose.msra.mxu1 %v1081_v55  ;;  %v2792_v9 = vand.u32 2147483647, %v2791_v19  ;;  %vm3882_vm11 = vcmp.lt.f32.partialorder %v2788_v48, 8388608.0  ;;  %v2815_v50 = vcvt.s32.f32 %v2814_v32  ;;  %v2820_v57 = vand.u32 2147483647, %v3592_v11 }
 0x177   : > { %v2822_v45 = vcvt.f32.s32 %v3592_v11  ;;  %976 = vperm.xlu1 %3223, %v954_v41   ;;  %vm3888_vm12 = vcmp.lt.f32.partialorder %v2812_v40, 8388608.0  ;;  %v2817_v36 = vand.u32 2147483648, %v3588_v0  ;;  %v2844_v15 = vand.u32 2147483647, %v3854_v18 }
 0x178   : > { %v2794_v20 = vor.u32 %v2793_v28, %v2792_v9  ;;  %v2787_v48 = vsel %vm3862_vm10, %v2786_v42, %v3568_v29  ;;  %v2816_v63 = vand.u32 2147483647, %v2815_v50  ;;  %v2846_v55 = vcvt.f32.s32 %v3854_v18 }
 0x179   : > { %v2823_v19 = vcvt.s32.f32 %v2822_v45  ;;  %vm3901_vm13 = vcmp.lt.f32.partialorder %v2820_v57, 8388608.0  ;;  %v2825_v41 = vand.u32 2147483648, %v3592_v11  ;;  %vm3906_vm14 = vcmp.lt.f32.partialorder %v2844_v15, 8388608.0 }
 0x17a   : > { %v2795_v32 = vsel %vm3882_vm11, %v2794_v20, %v3576_v43  ;;  %v2818_v39 = vor.u32 %v2817_v36, %v2816_v63  ;;  %v2847_v42 = vcvt.s32.f32 %v2846_v55  ;;  %v2854_v28 = vcvt.f32.s32 %v3859_v10 }
 0x17b   : > { %v2824_v29 = vand.u32 2147483647, %v2823_v19  ;;  %v2849_v50 = vand.u32 2147483648, %v3854_v18  ;;  %v2852_v38 = vand.u32 2147483647, %v3859_v10  ;;  %v3913_v43 = vmax.f32 %v2787_v48, -32.0 }
 0x17c   : > { %v3915_v57 = vmax.f32 %v2795_v32, -32.0  ;;  %v2819_v45 = vsel %vm3888_vm12, %v2818_v39, %v3588_v0  ;;  %v2848_v15 = vand.u32 2147483647, %v2847_v42  ;;  %v2855_v52 = vcvt.s32.f32 %v2854_v28 }
 0x17d   : > { %v2826_v20 = vor.u32 %v2825_v41, %v2824_v29  ;;  %v2857_v36 = vand.u32 2147483648, %v3859_v10  ;;  %v3921_v63 = vmax.f32 %v2819_v45, -32.0  ;;  %v5150_v19 = vmin.f32 %v3913_v43, 31.0 }
 0x17e   : > { %v5149_v55 = vmin.f32 %v3915_v57, 31.0  ;;  %v2850_v32 = vor.u32 %v2849_v50, %v2848_v15  ;;  %v2856_v46 = vand.u32 2147483647, %v2855_v52  ;;  %v2974_v58 = vcvt.f32.s32 %v3628_v27 }
 0x17f   : > { %v2827_v48 = vsel %vm3901_vm13, %v2826_v20, %v3592_v11  ;;  %vm3929_vm15 = vcmp.lt.f32.partialorder %v2852_v38, 8388608.0  ;;  %v762_v39 = vmin.f32 %v3921_v63, 31.0  ;;  %v806_v29 = vand.u32 2147483647, %v5150_v19 }
 0x180   : > { %v3933_v41 = vmax.f32 %v2827_v48, -32.0  ;;  %v2851_v40 = vsel %vm3906_vm14, %v2850_v32, %v3854_v18  ;;  %v2858_v11 = vor.u32 %v2857_v36, %v2856_v46  ;;  %v2972_v52 = vand.u32 2147483647, %v3628_v27 }
 0x181   : > { %v2975_v42 = vcvt.s32.f32 %v2974_v58  ;;  %v734_v28 = vmax.f32 %v2851_v40, -32.0  ;;  %v807_v38 = vand.u32 2147483647, %v5149_v55  ;;  %v810_v45 = vand.u32 2147483647, %v762_v39 }
 0x182   : > { %v5153_v50 = vmin.f32 %v3933_v41, 31.0  ;;  %v2859_v20 = vsel %vm3929_vm15, %v2858_v11, %v3859_v10  ;;  %v838_v9 = vsel %vm562_vm0, %v806_v29, -inf  ;;  %v2977_v46 = vand.u32 2147483648, %v3628_v27 }
 0x183   : > { %v2976_v18 = vand.u32 2147483647, %v2975_v42  ;;  %v735_v15 = vmax.f32 %v2859_v20, -32.0  ;;  %v766_v36 = vmin.f32 %v734_v28, 31.0  ;;  %v842_v32 = vsel %vm562_vm0, %v810_v45, -inf }
 0x184   : > { %v811_v48 = vand.u32 2147483647, %v5153_v50  ;;  %v857_v58 = vmax.f32 %v3868_v53, %v855_v37  ;;  %vm2973_vm1 = vcmp.lt.f32.partialorder %v2972_v52, 8388608.0  ;;  %v2982_v10 = vcvt.f32.s32 %v3632_v31  ;;  %v3971_v52 = vld [vmem:[%s5122_s2 + $0x18] sm:$0xff] }
 0x185   : > { %v2978_v0 = vor.u32 %v2977_v46, %v2976_v18  ;;  %v767_v29 = vmin.f32 %v735_v15, 31.0  ;;  %v814_v40 = vand.u32 2147483647, %v766_v36  ;;  %v839_v11 = vsel %vm562_vm0, %v807_v38, -inf }
 0x186   : > { %v2980_v42 = vand.u32 2147483647, %v3632_v31  ;;  %v843_v28 = vmax.f32 %v838_v9, %v842_v32  ;;  %v844_v20 = vsel %vm562_vm0, %v811_v48, -inf  ;;  %v2983_v55 = vcvt.s32.f32 %v2982_v10 }
 0x187   : > { %v2979_v45 = vsel %vm2973_vm1, %v2978_v0, %v3628_v27  ;;  %v856_v6 = vsel %vm562_vm0, %v3876_v47, -inf  ;;  %v794_v60 = vpack.c.bf16 %v767_v29, %v766_v36  ;;  %v815_v37 = vand.u32 2147483647, %v767_v29 }
 0x188   : > { %v3966_v53 = vmax.f32 %v2979_v45, -32.0  ;;  %v863_v38 = vmax.f32 %v856_v6, %v857_v58  ;;  %v2984_v9 = vand.u32 2147483647, %v2983_v55  ;;  %v2985_v18 = vand.u32 2147483648, %v3632_v31  ;;  %v3256_v55 = vld [vmem:[%s3358_s14 + $0x30] sm:$0xff] }
 0x189   : > { %v932_v27 = vmul.f32 %v3971_v52, %v3559_v7  ;;  %v845_v46 = vmax.f32 %v839_v11, %v844_v20  ;;  %v850_v47 = vsel %vm562_vm0, %v814_v40, -inf  ;;  %v1054_v15 = vsel %vm562_vm0, %v794_v60, 0 }
 0x18a   : > { %vm3978_vm2 = vcmp.lt.f32.partialorder %v2980_v42, 8388608.0  ;;  %v851_v48 = vmax.f32 %v843_v28, %v850_v47  ;;  %1092 = vmatpush.bf16.xpose.msra.mxu0 %v1054_v15  ;;  %v2986_v32 = vor.u32 %v2985_v18, %v2984_v9  ;;  %v668_v0 = vmul.f32 %v3256_v55, %v3559_v7  ;;  %v3257_v28 = vld [vmem:[%s3358_s14 + $0x38] sm:$0xff] }
 0x18b   : > { %v3062_v58 = vand.u32 2147483647, %v932_v27  ;;  %v852_v10 = vsel %vm562_vm0, %v815_v37, -inf  ;;  %v782_v29 = vmin.f32 %v3966_v53, 31.0  ;;  %v3064_v11 = vcvt.f32.s32 %v932_v27 }
 0x18c   : > { %v2796_v40 = vand.u32 2147483647, %v3580_v34  ;;  %v3987_v20 = vmax.f32 %v851_v48, %v863_v38  ;;  %v2987_v42 = vsel %vm3978_vm2, %v2986_v32, %v3632_v31  ;;  %v3994_v45 = vmul.f32 %v3257_v28, %v3559_v7 }
 0x18d   : > { %v2798_v6 = vcvt.f32.s32 %v3580_v34  ;;  %v3997_v60 = vmax.f32 %v845_v46, %v852_v10  ;;  %v3999_v37 = vmax.f32 %v2987_v42, -32.0  ;;  %v3065_v9 = vcvt.s32.f32 %v3064_v11 }
 0x18e   : > { %v3067_v18 = vand.u32 2147483648, %v932_v27  ;;  %vm4001_vm3 = vcmp.lt.f32.partialorder %v3062_v58, 8388608.0  ;;  %v2804_v15 = vand.u32 2147483647, %v3584_v35  ;;  %v2806_v31 = vcvt.f32.s32 %v3584_v35 }
 0x18f   : > { %v2799_v38 = vcvt.s32.f32 %v2798_v6  ;;  %v783_v7 = vmin.f32 %v3999_v37, 31.0  ;;  %v3066_v36 = vand.u32 2147483647, %v3065_v9  ;;  %vm4008_vm4 = vcmp.lt.f32.partialorder %v2796_v40, 8388608.0 }
 0x190   : > { %v2830_v46 = vcvt.f32.s32 %v668_v0  ;;  %v2801_v55 = vand.u32 2147483648, %v3580_v34  ;;  %v2807_v58 = vcvt.s32.f32 %v2806_v31  ;;  %v2809_v10 = vand.u32 2147483648, %v3584_v35 }
 0x191   : > { %v2800_v32 = vand.u32 2147483647, %v2799_v38  ;;  %v802_v11 = vpack.c.bf16 %v783_v7, %v782_v29  ;;  %v3068_v42 = vor.u32 %v3067_v18, %v3066_v36  ;;  %vm4018_vm5 = vcmp.lt.f32.partialorder %v2804_v15, 8388608.0 }
 0x192   : > { %v2828_v40 = vand.u32 2147483647, %v668_v0  ;;  %v2808_v9 = vand.u32 2147483647, %v2807_v58  ;;  %v2831_v19 = vcvt.s32.f32 %v2830_v46  ;;  %v2833_v38 = vand.u32 2147483648, %v668_v0 }
 0x193   : > { %v2802_v6 = vor.u32 %v2801_v55, %v2800_v32  ;;  %v1078_v33 = vsel %vm562_vm0, %v802_v11, 0  ;;  %v3069_v31 = vsel %vm4001_vm3, %v3068_v42, %v932_v27  ;;  %v2836_v14 = vand.u32 2147483647, %v3994_v45 }
 0x194   : > { %v2838_v50 = vcvt.f32.s32 %v3994_v45  ;;  %1121 = vmatpush.bf16.xpose.msra.mxu1 %v1078_v33  ;;  %v948_v18 = vmax.f32 %v3069_v31, -32.0  ;;  %v2810_v36 = vor.u32 %v2809_v10, %v2808_v9  ;;  %v2832_v32 = vand.u32 2147483647, %v2831_v19 }
 0x195   : > { %v2803_v15 = vsel %vm4008_vm4, %v2802_v6, %v3580_v34  ;;  %vm4030_vm6 = vcmp.lt.f32.partialorder %v2828_v40, 8388608.0  ;;  %v2956_v27 = vand.u32 2147483647, %v3620_v25  ;;  %v2958_v48 = vcvt.f32.s32 %v3620_v25 }
 0x196   : > { %v2839_v55 = vcvt.s32.f32 %v2838_v50  ;;  %v4034_v58 = vmax.f32 %v2803_v15, -32.0  ;;  %v956_v47 = vmin.f32 %v948_v18, 31.0  ;;  %v2811_v33 = vsel %vm4018_vm5, %v2810_v36, %v3584_v35 }
 0x197   : > { %v2834_v11 = vor.u32 %v2833_v38, %v2832_v32  ;;  %v2841_v19 = vand.u32 2147483648, %v3994_v45  ;;  %v4042_v10 = vmax.f32 %v2811_v33, -32.0  ;;  %v867_v50 = vmax.f32 %v3997_v60, %v3987_v20 }
 0x198   : > { %v2840_v34 = vand.u32 2147483647, %v2839_v55  ;;  %v760_v42 = vmin.f32 %v4034_v58, 31.0  ;;  %986 = vperm.xlu1 %3223, %v956_v47   ;;  %vm2837_vm7 = vcmp.lt.f32.partialorder %v2836_v14, 8388608.0  ;;  %v2959_v28 = vcvt.s32.f32 %v2958_v48 }
 0x199   : > { %v2835_v40 = vsel %vm4030_vm6, %v2834_v11, %v668_v0  ;;  %v761_v9 = vmin.f32 %v4042_v10, 31.0  ;;  %vm4052_vm8 = vcmp.lt.f32.partialorder %v2956_v27, 8388608.0  ;;  %v2961_v20 = vand.u32 2147483648, %v3620_v25 }
 0x19a   : > { %v2842_v35 = vor.u32 %v2841_v19, %v2840_v34  ;;  %v732_v6 = vmax.f32 %v2835_v40, -32.0  ;;  %v808_v38 = vand.u32 2147483647, %v760_v42  ;;  %v2960_v18 = vand.u32 2147483647, %v2959_v28 }
 0x19b   : > { %v2966_v60 = vcvt.f32.s32 %v3624_v26  ;;  %v809_v15 = vand.u32 2147483647, %v761_v9  ;;  %v2964_v36 = vand.u32 2147483647, %v3624_v26  ;;  %v2969_v27 = vand.u32 2147483648, %v3624_v26 }
 0x19c   : > { %v2843_v0 = vsel %vm2837_vm7, %v2842_v35, %v3994_v45  ;;  %v764_v14 = vmin.f32 %v732_v6, 31.0  ;;  %v2962_v46 = vor.u32 %v2961_v20, %v2960_v18  ;;  %v840_v33 = vsel %vm562_vm0, %v808_v38, -inf }
 0x19d   : > { %v733_v32 = vmax.f32 %v2843_v0, -32.0  ;;  %v2967_v55 = vcvt.s32.f32 %v2966_v60  ;;  %v841_v11 = vsel %vm562_vm0, %v809_v15, -inf  ;;  %v1149_v48 = vmul.f32 %v3832_v54, %v3534_v12 }
 0x19e   : > { %v812_v47 = vand.u32 2147483647, %v764_v14  ;;  %v2963_v34 = vsel %vm4052_vm8, %v2962_v46, %v3620_v25  ;;  %v2912_v40 = vand.u32 2147483647, %v3755_v13  ;;  %v2908_v6 = vand.u32 2147483647, %v3596_v1 }
 0x19f   : > { %v765_v45 = vmin.f32 %v733_v32, 31.0  ;;  %v2968_v19 = vand.u32 2147483647, %v2967_v55  ;;  %v748_v35 = vmax.f32 %v2963_v34, -32.0  ;;  %v2916_v38 = vand.u32 2147483647, %v3600_v2 }
 0x1a0   : > { %v846_v28 = vsel %vm562_vm0, %v812_v47, -inf  ;;  %3226 = vset.pattern.permute.xlu1 %v3267_v49  ;;  %vm2965_vm9 = vcmp.lt.f32.partialorder %v2964_v36, 8388608.0  ;;  %v2914_v25 = vor.u32 %v2913_v51, %v2912_v40  ;;  %v2920_v13 = vand.u32 2147483647, %v3789_v44 }
 0x1a1   : > { %v793_v18 = vpack.c.bf16 %v765_v45, %v764_v14  ;;  %v813_v20 = vand.u32 2147483647, %v765_v45  ;;  %v847_v60 = vmax.f32 %v840_v33, %v846_v28  ;;  %v2970_v0 = vor.u32 %v2969_v27, %v2968_v19  ;;  %1163 = vperm.xlu1 %3226, %v1149_v48  }
 0x1a2   : > { %v780_v54 = vmin.f32 %v748_v35, 31.0  ;;  %vm4081_vm10 = vcmp.lt.f32.partialorder %v2908_v6, 8388608.0  ;;  %vm4085_vm11 = vcmp.lt.f32.partialorder %v2916_v38, 8388608.0  ;;  %v5214_v51 = vand.u32 2147483648, %v3600_v2 }
 0x1a3   : > { %v869_v31 = vmax.f32 %v847_v60, %v867_v50  ;;  %v848_v15 = vsel %vm562_vm0, %v813_v20, -inf  ;;  %v1051_v32 = vsel %vm562_vm0, %v793_v18, 0  ;;  %v2971_v14 = vsel %vm2965_vm9, %v2970_v0, %v3624_v26 }
 0x1a4   : > { %v849_v46 = vmax.f32 %v841_v11, %v848_v15  ;;  %1093 = vmatpush.bf16.xpose.msra.mxu0 %v1051_v32  ;;  %v749_v55 = vmax.f32 %v2971_v14, -32.0  ;;  %v2922_v44 = vor.u32 %v5214_v51, %v2920_v13  ;;  %v2924_v50 = vand.u32 2147483647, %v3604_v3 }
 0x1a5   : > { %v2928_v47 = vand.u32 2147483647, %v3798_v62  ;;  %v2932_v26 = vand.u32 2147483647, %v3608_v4  ;;  %v828_v11 = vand.u32 2147483647, %v780_v54  ;;  %v2915_v48 = vsel %vm4081_vm10, %v2914_v25, %v3596_v1 }
 0x1a6   : > { %v781_v33 = vmin.f32 %v749_v55, 31.0  ;;  %v2936_v45 = vand.u32 2147483647, %v3802_v30  ;;  %v871_v34 = vmax.f32 %v849_v46, %v869_v31  ;;  %v2923_v19 = vsel %vm4085_vm11, %v2922_v44, %v3600_v2 }
 0x1a7   : > { %vm4101_vm12 = vcmp.lt.f32.partialorder %v2924_v50, 8388608.0  ;;  %v5217_v62 = vand.u32 2147483648, %v3604_v3  ;;  %vm4107_vm13 = vcmp.lt.f32.partialorder %v2932_v26, 8388608.0  ;;  %v5220_v1 = vand.u32 2147483648, %v3608_v4 }
 0x1a8   : > { %v801_v35 = vpack.c.bf16 %v781_v33, %v780_v54  ;;  %v829_v6 = vand.u32 2147483647, %v781_v33  ;;  %v2940_v18 = vand.u32 2147483647, %v3612_v5  ;;  %v2944_v20 = vand.u32 2147483647, %v3808_v21 }
 0x1a9   : > { %v2930_v28 = vor.u32 %v5217_v62, %v2928_v47  ;;  %v2938_v30 = vor.u32 %v5220_v1, %v2936_v45  ;;  %v2948_v60 = vand.u32 2147483647, %v3616_v22  ;;  %v878_v0 = vsel %vm562_vm0, %v828_v11, -inf }
 0x1aa   : > { %v1075_v54 = vsel %vm562_vm0, %v801_v35, 0  ;;  %v2952_v13 = vand.u32 2147483647, %v3812_v59  ;;  %v5221_v31 = vmov 1   ;;  %v873_v15 = vmax.f32 %v878_v0, %v871_v34 }
 0x1ab   : > { %v2931_v2 = vsel %vm4101_vm12, %v2930_v28, %v3604_v3  ;;  %v2939_v25 = vsel %vm4107_vm13, %v2938_v30, %v3608_v4  ;;  %3231 = vset.pattern.permute.xlu1 %v5221_v31  ;;  %1122 = vmatpush.bf16.xpose.msra.mxu1 %v1075_v54  ;;  %vm2941_vm14 = vcmp.lt.f32.partialorder %v2940_v18, 8388608.0  ;;  %v5222_v3 = vand.u32 2147483648, %v3612_v5 }
 0x1ac   : > { %v2954_v32 = vor.u32 %v2953_v61, %v2952_v13  ;;  %v742_v14 = vmax.f32 %v2915_v48, -32.0  ;;  %v743_v46 = vmax.f32 %v2923_v19, -32.0  ;;  %v744_v55 = vmax.f32 %v2931_v2, -32.0 }
 0x1ad   : > { %v2946_v21 = vor.u32 %v5222_v3, %v2944_v20  ;;  %v880_v27 = vsel %vm562_vm0, %v829_v6, -inf  ;;  %vm2949_vm15 = vcmp.lt.f32.partialorder %v2948_v60, 8388608.0  ;;  %v745_v59 = vmax.f32 %v2939_v25, -32.0 }
 0x1ae   : > { %v2955_v36 = vsel %vm2949_vm15, %v2954_v32, %v3616_v22  ;;  %v774_v44 = vmin.f32 %v742_v14, 31.0  ;;  %v775_v50 = vmin.f32 %v743_v46, 31.0  ;;  %v875_v47 = vmax.f32 %v880_v27, %v873_v15 }
 0x1af   : > { %v2947_v4 = vsel %vm2941_vm14, %v2946_v21, %v3612_v5  ;;  %v747_v26 = vmax.f32 %v2955_v36, -32.0  ;;  %v776_v33 = vmin.f32 %v744_v55, 31.0  ;;  %v777_v11 = vmin.f32 %v745_v59, 31.0 }
 0x1b0   : > { %v746_v51 = vmax.f32 %v2947_v4, -32.0  ;;  %v822_v61 = vand.u32 2147483647, %v774_v44  ;;  %v823_v48 = vand.u32 2147483647, %v775_v50  ;;  %v5223_v22 = vmin.f32 %v3933_v41, 31.0 }
 0x1b1   : > { %v779_v34 = vmin.f32 %v747_v26, 31.0  ;;  %v824_v19 = vand.u32 2147483647, %v776_v33  ;;  %v825_v5 = vand.u32 2147483647, %v777_v11  ;;  %v799_v25 = vpack.c.bf16 %v777_v11, %v776_v33 }
 0x1b2   : > { %v778_v45 = vmin.f32 %v746_v51, 31.0  ;;  %v866_v40 = vsel %vm562_vm0, %v822_v61, -inf  ;;  %v868_v28 = vsel %vm562_vm0, %v823_v48, -inf  ;;  %v792_v35 = vpack.c.bf16 %v5223_v22, %v762_v39  ;;  %v2769_v22 = vld [vmem:[%s5121_s1 + $0x18] sm:$0xff] }
 0x1b3   : > { %v877_v62 = vmax.f32 %v866_v40, %v875_v47  ;;  %v870_v30 = vsel %vm562_vm0, %v824_v19, -inf  ;;  %v827_v60 = vand.u32 2147483647, %v779_v34  ;;  %v872_v0 = vsel %vm562_vm0, %v825_v5, -inf }
 0x1b4   : > { %v800_v6 = vpack.c.bf16 %v779_v34, %v778_v45  ;;  %v826_v1 = vand.u32 2147483647, %v778_v45  ;;  %v1048_v2 = vsel %vm562_vm0, %v792_v35, 0  ;;  %v830_v63 = vand.u32 2147483647, %v782_v29 }
 0x1b5   : > { %v879_v38 = vmax.f32 %v868_v28, %v877_v62  ;;  %1094 = vmatpush.bf16.xpose.msra.mxu0 %v1048_v2  ;;  %v791_v39 = vpack.c.bf16 %v761_v9, %v760_v42  ;;  %v831_v15 = vand.u32 2147483647, %v783_v7  ;;  %v876_v3 = vsel %vm562_vm0, %v827_v60, -inf  ;;  %v2768_v28 = vld [vmem:[%s5121_s1 + $0x10] sm:$0xff] }
 0x1b6   : > { %v1072_v18 = vsel %vm562_vm0, %v800_v6, 0  ;;  %v874_v41 = vsel %vm562_vm0, %v826_v1, -inf  ;;  %v5224_v32 = vmin.f32 %v3844_v8, 31.0  ;;  %v882_v53 = vsel %vm562_vm0, %v830_v63, -inf  ;;  %v4203_v6 = vpop.permute.xlu2 %1188 }
 0x1b7   : > { %v881_v20 = vmax.f32 %v870_v30, %v879_v38  ;;  %1123 = vmatpush.bf16.xpose.msra.mxu1 %v1072_v18  ;;  %v1045_v29 = vsel %vm562_vm0, %v791_v39, 0  ;;  %v1069_v58 = vsel %vm562_vm0, %v799_v25, 0  ;;  %v5225_v10 = vmin.f32 %v3846_v24, 31.0 }
 0x1b8   : > { %v832_v14 = vand.u32 2147483647, %v5224_v32  ;;  %v884_v37 = vsel %vm562_vm0, %v831_v15, -inf  ;;  %v5226_v9 = vmin.f32 %v3783_v17, 31.0  ;;  %v5227_v27 = vmin.f32 %v3913_v43, 31.0  ;;  %v992_v35 = vpop.permute.xlu0 %991 }
 0x1b9   : > { %v883_v54 = vmax.f32 %v872_v0, %v881_v20  ;;  %v833_v42 = vand.u32 2147483647, %v5225_v10  ;;  %v5228_v4 = vmin.f32 %v3915_v57, 31.0  ;;  %v798_v36 = vpack.c.bf16 %v775_v50, %v774_v44 }
 0x1ba   : > { %v834_v55 = vand.u32 2147483647, %v5226_v9  ;;  %v886_v8 = vsel %vm562_vm0, %v832_v14, -inf  ;;  %v5229_v47 = vmin.f32 %v3791_v56, 31.0  ;;  %v5230_v11 = vmin.f32 %v3721_v16, 31.0  ;;  %v2766_v16 = vld [vmem:[%s5121_s1] sm:$0xff] }
 0x1bb   : > { %v885_v13 = vmax.f32 %v874_v41, %v883_v54  ;;  %v790_v59 = vpack.c.bf16 %v5228_v4, %v5227_v27  ;;  %v888_v24 = vsel %vm562_vm0, %v833_v42, -inf  ;;  %v1066_v43 = vsel %vm562_vm0, %v798_v36, 0 }
 0x1bc   : > { %v835_v26 = vand.u32 2147483647, %v5229_v47  ;;  %v836_v45 = vand.u32 2147483647, %v5230_v11  ;;  %v890_v17 = vsel %vm562_vm0, %v834_v55, -inf  ;;  %v5231_v57 = vmin.f32 %v3737_v23, 31.0 }
 0x1bd   : > { %v887_v21 = vmax.f32 %v876_v3, %v885_v13  ;;  %1095 = vmatpush.bf16.xpose.msra.mxu0 %v1045_v29  ;;  %v1042_v61 = vsel %vm562_vm0, %v790_v59, 0  ;;  %v2767_v23 = vld [vmem:[%s5121_s1 + $0x8] sm:$0xff]  ;;  %v1151_v5 = vmul.f32 %v3971_v52, %v3534_v12  ;;  %v4205_v12 = vpop.permute.xlu1 %1183  ;;  %vm1536_vm9 = vcmask 261120  }
 0x1be   : > { %v837_v44 = vand.u32 2147483647, %v5231_v57  ;;  %v892_v56 = vsel %vm562_vm0, %v835_v26, -inf  ;;  %v894_v34 = vsel %vm562_vm0, %v836_v45, -inf  ;;  %v4207_v18 = vpop.permute.xlu2 %1193 }
 0x1bf   : > { %v889_v46 = vmax.f32 %v882_v53, %v887_v21  ;;  %1124 = vmatpush.bf16.xpose.msra.mxu1 %v1069_v58 }
 0x1c0   : > { %v896_v40 = vsel %vm562_vm0, %v837_v44, -inf }
 0x1c1   : > { %v891_v7 = vmax.f32 %v884_v37, %v889_v46 }
 0x1c3   : > { %v893_v51 = vmax.f32 %v886_v8, %v891_v7 }
 0x1c5   : > { %v895_v33 = vmax.f32 %v888_v24, %v893_v51  ;;  %1096 = vmatpush.bf16.xpose.msra.mxu0 %v1042_v61  ;;  %v1002_v20 = vpop.permute.xlu1 %1001 }
 0x1c6   : > { %v4209_v25 = vpop.permute.xlu2 %1178 }
 0x1c7   : > { %v897_v48 = vmax.f32 %v890_v17, %v895_v33  ;;  %1125 = vmatpush.bf16.xpose.msra.mxu1 %v1066_v43 }
 0x1c9   : > { %v898_v50 = vmax.f32 %v892_v56, %v897_v48 }
 0x1cb   : > { %v899_v19 = vmax.f32 %v894_v34, %v898_v50 }
 0x1cc   : > { %2730 = vmatmul.msk.bf16.vlgmr.msra.gmra.mxu0 %vm562_vm0, %v2766_v16 }
 0x1cd   : > { %v900_v62 = vmax.f32 %v896_v40, %v899_v19  ;;  %v4211_v13 = vpop.permute.xlu1 %1006 }
 0x1ce   : > { %2734 = vmatmul.msk.bf16.vlgmr.msra.gmra.mxu1 %vm562_vm0, %v2766_v16  ;;  %v1159_v21 = vpop.permute.xlu2 %1158 }
 0x1cf   : > { %901 = vmax.xlane.f32.xlu0 %v900_v62 }
 0x1d5   : > { %v997_v32 = vpop.permute.xlu1 %996 }
 0x1d6   : > { %v972_v29 = vpop.permute.xlu2 %971 }
 0x1dc   : > { %2731 = vmatmul.msk.bf16.gmra.mxu0 %vm562_vm0, %v2767_v23 }
 0x1de   : > { %2735 = vmatmul.msk.bf16.gmra.mxu1 %vm562_vm0, %v2767_v23  ;;  %v982_v42 = vpop.permute.xlu2 %981 }
 0x1e3   : > { %1173 = vperm.xlu0 %3228, %v1151_v5  }
 0x1e6   : > { %v1169_v27 = vpop.permute.xlu2 %1168 }
 0x1e9   : > { %v977_v58 = vpop.permute.xlu1 %976 }
 0x1ec   : > { %2732 = vmatmul.msk.bf16.gmra.mxu0 %vm562_vm0, %v2768_v28 }
 0x1ee   : > { %2736 = vmatmul.msk.bf16.gmra.mxu1 %vm562_vm0, %v2768_v28 }
 0x1fc   : > { %2733 = vmatmul.msk.bf16.gmra.mxu0 %vm562_vm0, %v2769_v22 }
 0x1fe   : > { %2737 = vmatmul.msk.bf16.gmra.mxu1 %vm562_vm0, %v2769_v22  ;;  %vm1321_vm0 = vcmask 523264  }
 0x20a   : > { %v987_v37 = vpop.permute.xlu1 %986 }
 0x213   : > { %v1164_v17 = vpop.permute.xlu1 %1163 }
 0x242   : > { %v902_v52 = vpop.xlane.xlu0 %901 }
 0x243   : > { %v903_v38 = vrot.slane %v902_v52, 4 }
 0x245   : > { %v904_v1 = vmax.f32 %v902_v52, %v903_v38 }
 0x247   : > { %v905_v30 = vrot.slane %v904_v1, 2 }
 0x249   : > { %v906_v2 = vmax.f32 %v904_v1, %v905_v30  ;;  %v1098_v0 = vpop.f32.mrf.mxu0 }
 0x24a   : > { %v1099_v8 = vadd.f32 %v1098_v0, %v972_v29 }
 0x24b   : > { %v907_v60 = vrot.slane %v906_v2, 1  ;;  %v1127_v54 = vpop.f32.mrf.mxu1 }
 0x24c   : > { %v1128_v4 = vadd.f32 %v1127_v54, %v972_v29  ;;  %v4215_v11 = vmul.f32 %v1159_v21, %v1099_v8 }
 0x24d   : > { %v908_v63 = vmax.f32 %v906_v2, %v907_v60 }
 0x24e   : > { %v4217_v57 = vmul.f32 %v1159_v21, %v1128_v4  ;;  %v1212_v40 = vmax.f32 %v4215_v11, 0.0 }
 0x24f   : > { %3036 = vpush %v908_v63 }
 0x250   : > { %v1213_v38 = vmax.f32 %v4217_v57, 0.0 }
 0x251   : > { %v1100_v41 = vpop.f32.mrf.mxu0 }
 0x252   : > { %v1101_v59 = vadd.f32 %v1100_v41, %v977_v58  ;;  %v4256_v41 = vld [vmem:[%s5124_s4 + $0x10] sm:$0xff] }
 0x253   : > { %v1129_v39 = vpop.f32.mrf.mxu1 }
 0x254   : > { %v1130_v51 = vadd.f32 %v1129_v39, %v977_v58  ;;  %v4219_v44 = vmul.f32 %v1164_v17, %v1101_v59  ;;  %v4261_v39 = vld [vmem:[%s5124_s4] sm:$0xff] }
 0x255   : > { %v1174_v48 = vpop.permute.xlu0 %1173 }
 0x256   : > { %v4223_v50 = vmul.f32 %v1164_v17, %v1130_v51  ;;  %v1214_v1 = vmax.f32 %v4219_v44, 0.0 }
 0x258   : > { %v1215_v2 = vmax.f32 %v4223_v50, 0.0 }
 0x259   : > { %v1103_v15 = vpop.f32.mrf.mxu0 }
 0x25a   : > { %v1104_v55 = vadd.f32 %v1103_v15, %v982_v42 }
 0x25b   : > { %v1132_v3 = vpop.f32.mrf.mxu1 }
 0x25c   : > { %v1133_v36 = vadd.f32 %v1132_v3, %v982_v42  ;;  %v4213_v47 = vmul.f32 %v1169_v27, %v1104_v55 }
 0x25e   : > { %v4221_v56 = vmul.f32 %v1169_v27, %v1133_v36  ;;  %v1216_v34 = vmax.f32 %v4213_v47, 0.0 }
 0x260   : > { %v1217_v30 = vmax.f32 %v4221_v56, 0.0 }
 0x261   : > { %v1105_v14 = vpop.f32.mrf.mxu0 }
 0x262   : > { %v1106_v45 = vadd.f32 %v1105_v14, %v987_v37  ;;  %v1237_v58 = vmax.f32 %v1213_v38, %v1217_v30 }
 0x263   : > { %v1134_v53 = vpop.f32.mrf.mxu1 }
 0x264   : > { %v1135_v26 = vadd.f32 %v1134_v53, %v987_v37  ;;  %v4229_v62 = vmul.f32 %v1174_v48, %v1106_v45  ;;  %v4305_v45 = vld [vmem:[%s5124_s4 + $0x18] sm:$0xff] }
 0x266   : > { %v4226_v16 = vmul.f32 %v1174_v48, %v1135_v26  ;;  %v1218_v63 = vmax.f32 %v4229_v62, 0.0 }
 0x268   : > { %v1238_v37 = vmax.f32 %v1214_v1, %v1218_v63 }
 0x269   : > { %v1108_v46 = vpop.f32.mrf.mxu0 }
 0x26a   : > { %v1109_v5 = vadd.f32 %v1108_v46, %v992_v35 }
 0x26b   : > { %v1137_v10 = vpop.f32.mrf.mxu1 }
 0x26c   : > { %v1138_v61 = vadd.f32 %v1137_v10, %v992_v35  ;;  %v1236_v35 = vmax.f32 %v1212_v40, %v1216_v34 }
 0x26e   : > { %v4233_v28 = vmul.f32 %v4209_v25, %v1138_v61 }
 0x270   : > { %v1221_v53 = vmax.f32 %v4233_v28, 0.0 }
 0x271   : > { %v1110_v7 = vpop.f32.mrf.mxu0 }
 0x272   : > { %v1111_v22 = vadd.f32 %v1110_v7, %v997_v32  ;;  %v1241_v55 = vmax.f32 %v1237_v58, %v1221_v53 }
 0x273   : > { %v1139_v9 = vpop.f32.mrf.mxu1 }
 0x274   : > { %v1140_v43 = vadd.f32 %v1139_v9, %v997_v32  ;;  %v4269_v32 = vmul.f32 %v4209_v25, %v1109_v5  ;;  %v4272_v14 = vmul.f32 %v4205_v12, %v1111_v22 }
 0x276   : > { %v4236_v52 = vmul.f32 %v4205_v12, %v1140_v43  ;;  %v1220_v27 = vmax.f32 %v4269_v32, 0.0  ;;  %v1222_v4 = vmax.f32 %v4272_v14, 0.0 }
 0x278   : > { %v1223_v29 = vmax.f32 %v4236_v52, 0.0  ;;  %v1240_v51 = vmax.f32 %v1236_v35, %v1220_v27  ;;  %v1242_v26 = vmax.f32 %v1238_v37, %v1222_v4  ;;  %v1232_v48 = vpack.c.bf16 %v1222_v4, %v1220_v27 }
 0x279   : > { %v1113_v24 = vpop.f32.mrf.mxu0  ;;  %v1230_v35 = vpack.c.bf16 %v1218_v63, %v1216_v34 }
 0x27a   : > { %v1114_v23 = vadd.f32 %v1113_v24, %v1002_v20  ;;  %v1233_v43 = vpack.c.bf16 %v1223_v29, %v1221_v53 }
 0x27b   : > { %v1142_v33 = vpop.f32.mrf.mxu1 }
 0x27c   : > { %v1143_v19 = vadd.f32 %v1142_v33, %v1002_v20  ;;  %v1219_v20 = vmax.f32 %v4226_v16, 0.0  ;;  %v4264_v15 = vmul.f32 %v4203_v6, %v1114_v23 }
 0x27e   : > { %v4249_v60 = vmul.f32 %v4203_v6, %v1143_v19  ;;  %v1239_v25 = vmax.f32 %v1215_v2, %v1219_v20  ;;  %v1224_v7 = vmax.f32 %v4264_v15, 0.0 }
 0x280   : > { %s3037_s22 = spop %3036  ;;  %v1225_v42 = vmax.f32 %v4249_v60, 0.0  ;;  %v1243_v8 = vmax.f32 %v1239_v25, %v1223_v29  ;;  %v1244_v17 = vmax.f32 %v1240_v51, %v1224_v7 }
 0x281   : > { %s910_s23 = smul.f32 %s3037_s22, %s3523_s19  ;;  %v1115_v0 = vpop.f32.mrf.mxu0 }
 0x282   : > { %v1116_v3 = vadd.f32 %v1115_v0, %v4211_v13  ;;  %v1245_v24 = vmax.f32 %v1241_v55, %v1225_v42  ;;  %v1231_v0 = vpack.c.bf16 %v1219_v20, %v1217_v30  ;;  %v2770_v30 = vld [vmem:[%s5123_s3] sm:$0xff] }
 0x283   : > { %s911_s19 = smax.f32 %s3268_s16, %s910_s23  ;;  %v1144_v54 = vpop.f32.mrf.mxu1 }
 0x284   : > { %s920_s24 = smul.f32 %s3520_s18, %s911_s19  ;;  %v1145_v21 = vadd.f32 %v1144_v54, %v4211_v13  ;;  %v4281_v6 = vmul.f32 %v4207_v18, %v1116_v3  ;;  %v1248_v23 = vmax.f32 %v1244_v17, %v1245_v24  ;;  %v1287_v54 = vld [vmem:[%s5124_s4 + $0x8] sm:$0xff]  ;;  %v1228_v3 = vpack.c.bf16 %v1214_v1, %v1212_v40 }
 0x285   : > { %v2771_v40 = vld [vmem:[%s5123_s3 + $0x8] sm:$0xff] }
 0x286   : > { %v4278_v46 = vstv %s920_s24  ;;  %v4284_v13 = vmul.f32 %v4207_v18, %v1145_v21  ;;  %v1226_v9 = vmax.f32 %v4281_v6, 0.0  ;;  %v1229_v21 = vpack.c.bf16 %v1215_v2, %v1213_v38 }
 0x287   : > { %v1397_v12 = vmul.f32 %v4256_v41, %v4278_v46  ;;  %v1395_v10 = vmul.f32 %v4261_v39, %v4278_v46  ;;  %v1398_v19 = vmul.f32 %v4305_v45, %v4278_v46  ;;  %v1396_v34 = vmul.f32 %v1287_v54, %v4278_v46 }
 0x288   : > { %v1227_v18 = vmax.f32 %v4284_v13, 0.0  ;;  %v1234_v59 = vpack.c.bf16 %v1226_v9, %v1224_v7  ;;  %v1246_v61 = vmax.f32 %v1242_v26, %v1226_v9  ;;  %3240 = vrcp.f32 %v4278_v46 }
 0x289   : > { %1407 = vrot.lane.b32.xlu2 %v1397_v12, %s3270_s30  ;;  %1403 = vrot.lane.b32.xlu0 %v1395_v10, %s3270_s30  ;;  %v1282_v10 = vand.u32 2147483648, %v4278_v46  ;;  %vm1276_vm2 = vweird.f32 %v4278_v46 }
 0x28a   : > { %v1235_v36 = vpack.c.bf16 %v1227_v18, %v1225_v42  ;;  %v1247_v33 = vmax.f32 %v1243_v8, %v1227_v18  ;;  %1332 = vmatpush.bf16.msra.mxu2 %v1234_v59  ;;  %v1280_v42 = vand.u32 2147483647, %v4278_v46 }
 0x28b   : > { %v1283_v18 = vor.u32 1.1754944e-38, %v1282_v10 }
 0x28c   : > { %1351 = vmatpush.bf16.msra.mxu3 %v1235_v36  ;;  %v1249_v5 = vmax.f32 %v1246_v61, %v1247_v33  ;;  %vm1281_vm4 = vcmp.eq.f32.partialorder %v1280_v42, 8.507059e+37 }
 0x28e   : > { %1333 = vmatpush.bf16.msra.mxu2 %v1232_v48  ;;  %v1250_v22 = vmax.f32 %v1248_v23, %v1249_v5  ;;  %v3241_v38 = vpop.eup %3240 }
 0x28f   : > { %v1272_v1 = vmul.f32 %v3241_v38, %v4278_v46  ;;  %vm1277_vm1 = vweird.f32 %v3241_v38 }
 0x290   : > { %1352 = vmatpush.bf16.msra.mxu3 %v1233_v43  ;;  %1251 = vmax.xlane.f32.xlu1 %v1250_v22  ;;  %vm1278_vm3 = vmor %vm1276_vm2, %vm1277_vm1 }
 0x291   : > { %1409 = vrot.lane.b32.xlu2 %v1398_v19, %s3270_s30  ;;  %1378 = vperm.xlu0 %3228, %v4256_v41   ;;  %v1273_v2 = vsub.f32 1.0, %v1272_v1 }
 0x292   : > { %1334 = vmatpush.bf16.msra.mxu2 %v1230_v35 }
 0x293   : > { %v1274_v53 = vmul.f32 %v3241_v38, %v1273_v2 }
 0x294   : > { %1353 = vmatpush.bf16.msra.mxu3 %v1231_v0 }
 0x295   : > { %v1275_v25 = vadd.f32 %v3241_v38, %v1274_v53 }
 0x296   : > { %1335 = vmatpush.bf16.msra.mxu2 %v1228_v3 }
 0x297   : > { %v1279_v7 = vsel %vm1278_vm3, %v3241_v38, %v1275_v25 }
 0x298   : > { %1354 = vmatpush.bf16.msra.mxu3 %v1229_v21  ;;  %v1284_v55 = vsel %vm1281_vm4, %v1283_v18, %v1279_v7 }
 0x299   : > { %1405 = vrot.lane.b32.xlu2 %v1396_v34, %s3270_s30  ;;  %1368 = vperm.xlu0 %3228, %v4261_v39  }
 0x29a   : > { %2746 = vmatmul.msk.bf16.vlgmr.msra.gmra.mxu2 %vm1321_vm0, %v2770_v30 }
 0x29b   : > { %2748 = vmatmul.msk.bf16.vlgmr.msra.gmra.mxu3 %vm1321_vm0, %v2770_v30 }
 0x2a1   : > { %1383 = vperm.xlu2 %3227, %v4305_v45   ;;  %3229 = vset.pattern.permute.xlu0 %v5221_v31 }
 0x2a9   : > { %1373 = vperm.xlu2 %3227, %v1287_v54  }
 0x2aa   : > { %2747 = vmatmul.msk.bf16.gmra.mxu2 %vm1321_vm0, %v2771_v40 }
 0x2ab   : > { %2749 = vmatmul.msk.bf16.gmra.mxu3 %vm1321_vm0, %v2771_v40 }
 0x2b1   : > { %3230 = vset.pattern.permute.xlu2 %v5221_v31 }
 0x2e3   : > { %v1408_v26 = vpop.permute.xlu2 %1407 }
 0x2fb   : > { %v1404_v10 = vpop.permute.xlu0 %1403 }
 0x303   : > { %v1252_v20 = vpop.xlane.xlu1 %1251 }
 0x304   : > { %v1253_v63 = vrot.slane %v1252_v20, 4 }
 0x306   : > { %v1254_v29 = vmax.f32 %v1252_v20, %v1253_v63 }
 0x308   : > { %v1255_v58 = vrot.slane %v1254_v29, 2 }
 0x30a   : > { %v1256_v12 = vmax.f32 %v1254_v29, %v1255_v58  ;;  %v1410_v58 = vpop.permute.xlu2 %1409 }
 0x30c   : > { %v1257_v37 = vrot.slane %v1256_v12, 1 }
 0x30e   : > { %v1258_v9 = vmax.f32 %v1256_v12, %v1257_v37 }
 0x310   : > { %3102 = vpush %v1258_v9 }
 0x311   : > { %3104 = vpush %v1284_v55 }
 0x341   : > { %s4345_s26 = spop %3102 }
 0x342   : > { %s3105_s14 = spop %3104  ;;  %s1260_s27 = smax.f32 %s3268_s16, %s4345_s26 }
 0x343   : > { %v1290_v8 = vstv %s3105_s14  ;;  %s1269_s29 = smul.f32 %s3520_s18, %s1260_s27  ;;  %s4514_s27 = scalar_lea.vmem %s5130_s10, %s3352_s28 }
 0x344   : > { %v1291_v27 = vmul.f32 %v1290_v8, %v4261_v39  ;;  %v1292_v4 = vmul.f32 %v1290_v8, %v1287_v54  ;;  %v1293_v59 = vmul.f32 %v1290_v8, %v4256_v41  ;;  %v1294_v46 = vmul.f32 %v1290_v8, %v4305_v45 }
 0x346   : > { %v3108_v36 = vcvt.f32.s32 %v1291_v27  ;;  %v3116_v51 = vcvt.f32.s32 %v1292_v4  ;;  %v3124_v24 = vcvt.f32.s32 %v1293_v59  ;;  %v3132_v33 = vcvt.f32.s32 %v1294_v46 }
 0x347   : > { %v3111_v43 = vand.u32 2147483648, %v1291_v27  ;;  %v3106_v23 = vand.u32 2147483647, %v1291_v27  ;;  %v3130_v5 = vand.u32 2147483647, %v1294_v46  ;;  %v3127_v39 = vand.u32 2147483648, %v1293_v59 }
 0x348   : > { %v3109_v17 = vcvt.s32.f32 %v3108_v36  ;;  %v3117_v61 = vcvt.s32.f32 %v3116_v51  ;;  %v3125_v48 = vcvt.s32.f32 %v3124_v24  ;;  %v3133_v19 = vcvt.s32.f32 %v3132_v33  ;;  %v4365_v36 = vld [vmem:[%s5126_s6] sm:$0xff]  ;;  %v4378_v24 = vld [vmem:[%s5126_s6 + $0x8] sm:$0xff] }
 0x349   : > { %v3122_v22 = vand.u32 2147483647, %v1293_v59  ;;  %v3135_v0 = vand.u32 2147483648, %v1294_v46  ;;  %v3119_v3 = vand.u32 2147483648, %v1292_v4  ;;  %v3114_v21 = vand.u32 2147483647, %v1292_v4 }
 0x34a   : > { %v3110_v35 = vand.u32 2147483647, %v3109_v17  ;;  %v3134_v54 = vand.u32 2147483647, %v3133_v19  ;;  %v3126_v41 = vand.u32 2147483647, %v3125_v48 }
 0x34b   : > { %v3118_v34 = vand.u32 2147483647, %v3117_v61  ;;  %vm3107_vm5 = vcmp.lt.f32.partialorder %v3106_v23, 8388608.0  ;;  %vm3131_vm6 = vcmp.lt.f32.partialorder %v3130_v5, 8388608.0  ;;  %vm3123_vm7 = vcmp.lt.f32.partialorder %v3122_v22, 8388608.0  ;;  %v1337_v61 = vpop.f32.mrf.mxu2  ;;  %v1379_v22 = vpop.permute.xlu0 %1378 }
 0x34c   : > { %v3112_v45 = vor.u32 %v3111_v43, %v3110_v35  ;;  %v3136_v30 = vor.u32 %v3135_v0, %v3134_v54  ;;  %v3128_v40 = vor.u32 %v3127_v39, %v3126_v41  ;;  %vm3115_vm8 = vcmp.lt.f32.partialorder %v3114_v21, 8388608.0  ;;  %v1356_v43 = vpop.f32.mrf.mxu3 }
 0x34d   : > { %v3120_v1 = vor.u32 %v3119_v3, %v3118_v34 }
 0x34e   : > { %v3113_v38 = vsel %vm3107_vm5, %v3112_v45, %v1291_v27  ;;  %v3137_v2 = vsel %vm3131_vm6, %v3136_v30, %v1294_v46  ;;  %v3129_v20 = vsel %vm3123_vm7, %v3128_v40, %v1293_v59  ;;  %v1406_v27 = vpop.permute.xlu2 %1405  ;;  %v4360_v46 = vstv %s1269_s29  ;;  %s3271_s29 = smov 64  }
 0x34f   : > { %v1299_v63 = vmax.f32 %v3113_v38, -32.0  ;;  %v1302_v53 = vmax.f32 %v3137_v2, -32.0  ;;  %v1301_v29 = vmax.f32 %v3129_v20, -32.0  ;;  %v3121_v12 = vsel %vm3115_vm8, %v3120_v1, %v1292_v4  ;;  %v4357_v4 = vld [vmem:[%s5126_s6 + $0x10] sm:$0xff] }
 0x350   : > { %v1300_v55 = vmax.f32 %v3121_v12, -32.0  ;;  %v1610_v51 = vmul.f32 %v4365_v36, %v4360_v46  ;;  %v1611_v33 = vmul.f32 %v4378_v24, %v4360_v46  ;;  %3242 = vrcp.f32 %v4360_v46 }
 0x351   : > { %v1303_v25 = vmin.f32 %v1299_v63, 31.0  ;;  %v1306_v42 = vmin.f32 %v1302_v53, 31.0  ;;  %v1305_v37 = vmin.f32 %v1301_v29, 31.0  ;;  %vm1491_vm11 = vweird.f32 %v4360_v46 }
 0x352   : > { %v1304_v8 = vmin.f32 %v1300_v55, 31.0 }
 0x353   : > { %v1415_v7 = vmul.f32 %v1404_v10, %v1303_v25  ;;  %v1418_v9 = vmul.f32 %v1410_v58, %v1306_v42  ;;  %v1417_v18 = vmul.f32 %v1408_v26, %v1305_v37  ;;  %v1612_v26 = vmul.f32 %v4357_v4, %v4360_v46  ;;  %v1339_v19 = vpop.f32.mrf.mxu2  ;;  %v1369_v54 = vpop.permute.xlu0 %1368 }
 0x354   : > { %v1416_v59 = vmul.f32 %v1406_v27, %v1304_v8  ;;  %v1358_v23 = vpop.f32.mrf.mxu3  ;;  %v1386_v63 = vmul.f32 %v1369_v54, %v1337_v61  ;;  %v1387_v53 = vmul.f32 %v1369_v54, %v1356_v43  ;;  %v2773_v54 = vld [vmem:[%s5125_s5 + $0x8] sm:$0xff] }
 0x355   : > { %1421 = vperm.xlu1 %3231, %v1415_v7   ;;  %1436 = vperm.xlu2 %3230, %v1418_v9  }
 0x356   : > { %1431 = vperm.xlu0 %3229, %v1417_v18   ;;  %v1384_v48 = vpop.permute.xlu2 %1383 }
 0x35b   : > { %v1342_v35 = vpop.f32.mrf.mxu2 }
 0x35c   : > { %v1361_v39 = vpop.f32.mrf.mxu3  ;;  %v1390_v29 = vmul.f32 %v1379_v22, %v1342_v35 }
 0x35d   : > { %3233 = vset.pattern.permute.xlu1 %v3267_v49  ;;  %1426 = vperm.xlu2 %3230, %v1416_v59   ;;  %v1391_v58 = vmul.f32 %v1379_v22, %v1361_v39 }
 0x35e   : > { %1593 = vperm.xlu1 %3233, %v4357_v4   ;;  %v1374_v5 = vpop.permute.xlu2 %1373 }
 0x35f   : > { %v1388_v21 = vmul.f32 %v1374_v5, %v1339_v19  ;;  %v1389_v34 = vmul.f32 %v1374_v5, %v1358_v23 }
 0x363   : > { %v1344_v41 = vpop.f32.mrf.mxu2 }
 0x364   : > { %v1363_v3 = vpop.f32.mrf.mxu3  ;;  %v1392_v30 = vmul.f32 %v1384_v48, %v1344_v41  ;;  %v4431_v41 = vld [vmem:[%s5128_s8] sm:$0xff] }
 0x365   : > { %3232 = vset.pattern.permute.xlu2 %v3267_v49  ;;  %v4385_v49 = vld [vmem:[%s5126_s6 + $0x18] sm:$0xff]  ;;  %v1393_v40 = vmul.f32 %v1384_v48, %v1363_v3  ;;  %v3243_v3 = vpop.eup %3242 }
 0x366   : > { %1618 = vrot.lane.b32.xlu1 %v1610_v51, %s3270_s30  ;;  %1583 = vperm.xlu2 %3232, %v4365_v36   ;;  %v1613_v17 = vmul.f32 %v4385_v49, %v4360_v46  ;;  %vm1492_vm10 = vweird.f32 %v3243_v3 }
 0x367   : > { %3234 = vset.pattern.permute.xlu1 %v5221_v31  ;;  %vm1493_vm12 = vmor %vm1491_vm11, %vm1492_vm10 }
 0x36e   : > { %1622 = vrot.lane.b32.xlu1 %v1612_v26, %s3270_s30  ;;  %1588 = vperm.xlu2 %3232, %v4378_v24  }
 0x376   : > { %1598 = vperm.xlu2 %3232, %v4385_v49  }
 0x37e   : > { %1620 = vrot.lane.b32.xlu2 %v1611_v33, %s3270_s30 }
 0x386   : > { %1624 = vrot.lane.b32.xlu2 %v1613_v17, %s3270_s30 }
 0x38e   : > { %1728 = vperm.xlu2 %3232, %v4431_v41  }
 0x396   : > { %3235 = vset.pattern.permute.xlu2 %v5221_v31 }
 0x3af   : > { %v1437_v0 = vpop.permute.xlu2 %1436 }
 0x3b0   : > { %v4398_v2 = vadd.f32 %v1437_v0, %v1392_v30  ;;  %v4400_v20 = vadd.f32 %v1437_v0, %v1393_v40  ;;  %v2772_v0 = vld [vmem:[%s5125_s5] sm:$0xff] }
 0x3b2   : > { %v1453_v55 = vmax.f32 %v4398_v2, 0.0  ;;  %v1454_v8 = vmax.f32 %v4400_v20, 0.0 }
 0x3b7   : > { %v1427_v45 = vpop.permute.xlu2 %1426 }
 0x3b8   : > { %v4394_v38 = vadd.f32 %v1427_v45, %v1388_v21  ;;  %v4396_v1 = vadd.f32 %v1427_v45, %v1389_v34  ;;  %v1487_v45 = vmul.f32 %v3243_v3, %v4360_v46 }
 0x3ba   : > { %v1449_v25 = vmax.f32 %v4394_v38, 0.0  ;;  %v1450_v10 = vmax.f32 %v4396_v1, 0.0  ;;  %v1488_v21 = vsub.f32 1.0, %v1487_v45 }
 0x3bc   : > { %v1461_v33 = vmax.f32 %v1449_v25, %v1453_v55  ;;  %v1462_v17 = vmax.f32 %v1450_v10, %v1454_v8  ;;  %v1489_v40 = vmul.f32 %v3243_v3, %v1488_v21 }
 0x3be   : > { %v1464_v5 = vmax.f32 %v1461_v33, %v1462_v17 }
 0x3c7   : > { %v1422_v12 = vpop.permute.xlu1 %1421 }
 0x3c8   : > { %v1432_v42 = vpop.permute.xlu0 %1431  ;;  %v4404_v37 = vadd.f32 %v1422_v12, %v1386_v63  ;;  %v4406_v7 = vadd.f32 %v1422_v12, %v1387_v53  ;;  %v1495_v12 = vand.u32 2147483647, %v4360_v46 }
 0x3c9   : > { %v4408_v9 = vadd.f32 %v1432_v42, %v1390_v29  ;;  %v4410_v18 = vadd.f32 %v1432_v42, %v1391_v58  ;;  %v1490_v29 = vadd.f32 %v3243_v3, %v1489_v40 }
 0x3ca   : > { %v1447_v27 = vmax.f32 %v4404_v37, 0.0  ;;  %v1448_v59 = vmax.f32 %v4406_v7, 0.0  ;;  %vm1496_vm13 = vcmp.eq.f32.partialorder %v1495_v12, 8.507059e+37 }
 0x3cb   : > { %v1451_v51 = vmax.f32 %v4408_v9, 0.0  ;;  %v1452_v26 = vmax.f32 %v4410_v18, 0.0  ;;  %v1494_v31 = vsel %vm1493_vm12, %v3243_v3, %v1490_v29 }
 0x3cc   : > { %v1456_v22 = vpack.c.bf16 %v1450_v10, %v1448_v59  ;;  %v1455_v39 = vpack.c.bf16 %v1449_v25, %v1447_v27  ;;  %v1497_v25 = vand.u32 2147483648, %v4360_v46 }
 0x3cd   : > { %v1457_v61 = vpack.c.bf16 %v1453_v55, %v1451_v51  ;;  %v1458_v43 = vpack.c.bf16 %v1454_v8, %v1452_v26  ;;  %v1459_v48 = vmax.f32 %v1447_v27, %v1451_v51  ;;  %v1460_v19 = vmax.f32 %v1448_v59, %v1452_v26  ;;  %v4440_v27 = vpop.permute.xlu2 %1583 }
 0x3ce   : > { %v1498_v55 = vor.u32 1.1754944e-38, %v1497_v25 }
 0x3cf   : > { %1549 = vmatpush.bf16.msrb.mxu2 %v1457_v61  ;;  %1568 = vmatpush.bf16.msrb.mxu3 %v1458_v43  ;;  %v1463_v23 = vmax.f32 %v1459_v48, %v1460_v19 }
 0x3d0   : > { %v1499_v8 = vsel %vm1496_vm13, %v1498_v55, %v1494_v31  ;;  %v4444_v51 = vpop.permute.xlu1 %1593 }
 0x3d1   : > { %v1465_v35 = vmax.f32 %v1463_v23, %v1464_v5 }
 0x3d3   : > { %1569 = vmatpush.bf16.msrb.mxu3 %v1456_v22  ;;  %1466 = vmax.xlane.f32.xlu0 %v1465_v35 }
 0x3d4   : > { %1550 = vmatpush.bf16.msrb.mxu2 %v1455_v39 }
 0x3d5   : > { %v4442_v59 = vpop.permute.xlu2 %1588 }
 0x3d6   : > { %2760 = vmatmul.msk.bf16.vlgmr.msrb.gmra.mxu3 %vm1536_vm9, %v2772_v0 }
 0x3d7   : > { %2758 = vmatmul.msk.bf16.vlgmr.msrb.gmra.mxu2 %vm1536_vm9, %v2772_v0 }
 0x3dd   : > { %v4456_v48 = vpop.permute.xlu2 %1598 }
 0x3e6   : > { %2761 = vmatmul.msk.bf16.gmra.mxu3 %vm1536_vm9, %v2773_v54 }
 0x3e7   : > { %2759 = vmatmul.msk.bf16.gmra.mxu2 %vm1536_vm9, %v2773_v54 }
 0x446   : > { %v1467_v34 = vpop.xlane.xlu0 %1466 }
 0x447   : > { %v1468_v30 = vrot.slane %v1467_v34, 4 }
 0x449   : > { %v1469_v63 = vmax.f32 %v1467_v34, %v1468_v30 }
 0x44b   : > { %v1470_v53 = vrot.slane %v1469_v63, 2 }
 0x44d   : > { %v1471_v58 = vmax.f32 %v1469_v63, %v1470_v53 }
 0x44f   : > { %v1472_v10 = vrot.slane %v1471_v58, 1 }
 0x451   : > { %v1473_v42 = vmax.f32 %v1471_v58, %v1472_v10 }
 0x453   : > { %3138 = vpush %v1473_v42 }
 0x454   : > { %3140 = vpush %v1499_v8 }
 0x484   : > { %s3139_s20 = spop %3138 }
 0x485   : > { %s1475_s21 = smax.f32 %s3268_s16, %s3139_s20  ;;  %s3141_s22 = spop %3140 }
 0x486   : > { %s1484_s23 = smul.f32 %s3520_s18, %s1475_s21  ;;  %v1505_v46 = vstv %s3141_s22  ;;  %s4665_s21 = scalar_lea.vmem %s5131_s11, %s3352_s28 }
 0x487   : > { %v1506_v26 = vmul.f32 %v1505_v46, %v4365_v36  ;;  %v1507_v33 = vmul.f32 %v1505_v46, %v4378_v24  ;;  %v1508_v17 = vmul.f32 %v1505_v46, %v4357_v4  ;;  %v4452_v61 = vmul.f32 %v1505_v46, %v4385_v49  ;;  %v1619_v24 = vpop.permute.xlu1 %1618  ;;  %s4970_s20 = scalar_lea.vmem %s5129_s9, %s3352_s28 }
 0x488   : > { %v4454_v43 = vstv %s1484_s23 }
 0x489   : > { %3244 = vrcp.f32 %v4454_v43  ;;  %v3144_v19 = vcvt.f32.s32 %v1506_v26  ;;  %v3152_v23 = vcvt.f32.s32 %v1507_v33  ;;  %v3147_v5 = vand.u32 2147483648, %v1506_v26 }
 0x48a   : > { %v3160_v22 = vcvt.f32.s32 %v1508_v17  ;;  %v3168_v36 = vcvt.f32.s32 %v4452_v61  ;;  %v1734_v4 = vmul.f32 %v4431_v41, %v4454_v43  ;;  %v3155_v49 = vand.u32 2147483648, %v1507_v33 }
 0x48b   : > { %v3145_v35 = vcvt.s32.f32 %v3144_v19  ;;  %v3153_v39 = vcvt.s32.f32 %v3152_v23  ;;  %v3158_v54 = vand.u32 2147483647, %v1508_v17  ;;  %v3150_v3 = vand.u32 2147483647, %v1507_v33 }
 0x48c   : > { %v3161_v0 = vcvt.s32.f32 %v3160_v22  ;;  %1736 = vrot.lane.b32.xlu1 %v1734_v4, %s3270_s30  ;;  %v3142_v21 = vand.u32 2147483647, %v1506_v26  ;;  %v3163_v30 = vand.u32 2147483648, %v1508_v17  ;;  %v3169_v53 = vcvt.s32.f32 %v3168_v36  ;;  %v1621_v22 = vpop.permute.xlu2 %1620 }
 0x48d   : > { %v3154_v45 = vand.u32 2147483647, %v3153_v39  ;;  %v3146_v34 = vand.u32 2147483647, %v3145_v35  ;;  %v3171_v29 = vand.u32 2147483648, %v4452_v61  ;;  %vm3151_vm14 = vcmp.lt.f32.partialorder %v3150_v3, 8388608.0 }
 0x48e   : > { %v3162_v40 = vand.u32 2147483647, %v3161_v0  ;;  %vm3143_vm15 = vcmp.lt.f32.partialorder %v3142_v21, 8388608.0  ;;  %vm3159_vm1 = vcmp.lt.f32.partialorder %v3158_v54, 8388608.0  ;;  %v3166_v55 = vand.u32 2147483647, %v4452_v61 }
 0x48f   : > { %v3245_v63 = vpop.eup %3244  ;;  %v3156_v58 = vor.u32 %v3155_v49, %v3154_v45  ;;  %v3148_v25 = vor.u32 %v3147_v5, %v3146_v34  ;;  %v1684_v39 = vand.u32 2147483647, %v4454_v43  ;;  %v1686_v5 = vand.u32 2147483648, %v4454_v43 }
 0x490   : > { %v1676_v12 = vmul.f32 %v3245_v63, %v4454_v43  ;;  %v3164_v10 = vor.u32 %v3163_v30, %v3162_v40  ;;  %v3170_v36 = vand.u32 2147483647, %v3169_v53  ;;  %vm1681_vm2 = vweird.f32 %v3245_v63 }
 0x491   : > { %v3157_v31 = vsel %vm3151_vm14, %v3156_v58, %v1507_v33  ;;  %v3149_v42 = vsel %vm3143_vm15, %v3148_v25, %v1506_v26  ;;  %vm1680_vm3 = vweird.f32 %v4454_v43  ;;  %v1623_v33 = vpop.permute.xlu1 %1622  ;;  %vm3167_vm4 = vcmp.lt.f32.partialorder %v3166_v55, 8388608.0 }
 0x492   : > { %v3165_v8 = vsel %vm3159_vm1, %v3164_v10, %v1508_v17  ;;  %v1515_v46 = vmax.f32 %v3157_v31, -32.0  ;;  %v1514_v19 = vmax.f32 %v3149_v42, -32.0  ;;  %v1677_v23 = vsub.f32 1.0, %v1676_v12  ;;  %vm1682_vm5 = vmor %vm1680_vm3, %vm1681_vm2  ;;  %v1571_v10 = vpop.f32.mrf.mxu3  ;;  %v1552_v31 = vpop.f32.mrf.mxu2 }
 0x493   : > { %v1516_v35 = vmax.f32 %v3165_v8, -32.0  ;;  %v3172_v26 = vor.u32 %v3171_v29, %v3170_v36  ;;  %v1687_v34 = vor.u32 1.1754944e-38, %v1686_v5  ;;  %vm1685_vm6 = vcmp.eq.f32.partialorder %v1684_v39, 8.507059e+37 }
 0x494   : > { %v1519_v4 = vmin.f32 %v1515_v46, 31.0  ;;  %v1518_v49 = vmin.f32 %v1514_v19, 31.0  ;;  %v1678_v0 = vmul.f32 %v3245_v63, %v1677_v23  ;;  %v1625_v29 = vpop.permute.xlu2 %1624  ;;  %v1601_v36 = vmul.f32 %v4440_v27, %v1552_v31 }
 0x495   : > { %v1520_v54 = vmin.f32 %v1516_v35, 31.0  ;;  %v3173_v30 = vsel %vm3167_vm4, %v3172_v26, %v4452_v61 }
 0x496   : > { %v1631_v17 = vmul.f32 %v1621_v22, %v1519_v4  ;;  %v1630_v3 = vmul.f32 %v1619_v24, %v1518_v49  ;;  %v1679_v45 = vadd.f32 %v3245_v63, %v1678_v0  ;;  %v1517_v53 = vmax.f32 %v3173_v30, -32.0 }
 0x497   : > { %v1632_v21 = vmul.f32 %v1623_v33, %v1520_v54  ;;  %v1602_v4 = vmul.f32 %v4440_v27, %v1571_v10 }
 0x498   : > { %1641 = vperm.xlu2 %3235, %v1631_v17   ;;  %1636 = vperm.xlu1 %3234, %v1630_v3   ;;  %v1683_v40 = vsel %vm1682_vm5, %v3245_v63, %v1679_v45  ;;  %v1521_v43 = vmin.f32 %v1517_v53, 31.0 }
 0x499   : > { %1646 = vperm.xlu0 %3229, %v1632_v21   ;;  %v1688_v58 = vsel %vm1685_vm6, %v1687_v34, %v1683_v40 }
 0x49a   : > { %3174 = vpush %v1688_v58  ;;  %v1633_v25 = vmul.f32 %v1625_v29, %v1521_v43  ;;  %v1554_v55 = vpop.f32.mrf.mxu2 }
 0x49c   : > { %v4481_v23 = vpop.permute.xlu2 %1728 }
 0x4a0   : > { %1651 = vperm.xlu1 %3234, %v1633_v25  }
 0x4a2   : > { %v1557_v19 = vpop.f32.mrf.mxu2 }
 0x4a3   : > { %v1605_v5 = vmul.f32 %v4444_v51, %v1557_v19 }
 0x4aa   : > { %v1559_v35 = vpop.f32.mrf.mxu2 }
 0x4bb   : > { %1864 = vxpose.xlu0.b32.start [1/16] %v4215_v11, 128 }
 0x4c3   : > { %1865 = vxpose.xlu0.b32.cont [2/16] %v4219_v44, 128 }
 0x4cb   : > { %1866 = vxpose.xlu0.b32.cont [3/16] %v4213_v47, 128  ;;  %s3175_s30 = spop %3174 }
 0x4cc   : > { %v1691_v61 = vstv %s3175_s30  ;;  %s4714_s30 = scalar_lea.vmem %s5132_s12, %s3352_s28 }
 0x4cd   : > { %v1692_v24 = vmul.f32 %v1691_v61, %v4431_v41 }
 0x4cf   : > { %v3178_v63 = vcvt.f32.s32 %v1692_v24  ;;  %v3181_v44 = vand.u32 2147483648, %v1692_v24  ;;  %v3176_v42 = vand.u32 2147483647, %v1692_v24 }
 0x4d1   : > { %v3179_v12 = vcvt.s32.f32 %v3178_v63  ;;  %vm3177_vm7 = vcmp.lt.f32.partialorder %v3176_v42, 8388608.0 }
 0x4d3   : > { %1867 = vxpose.xlu0.b32.cont [4/16] %v4229_v62, 128  ;;  %v3180_v11 = vand.u32 2147483647, %v3179_v12 }
 0x4d5   : > { %v3182_v47 = vor.u32 %v3181_v44, %v3180_v11 }
 0x4d7   : > { %v3183_v62 = vsel %vm3177_vm7, %v3182_v47, %v1692_v24 }
 0x4d8   : > { %v1694_v8 = vmax.f32 %v3183_v62, -32.0 }
 0x4db   : > { %1868 = vxpose.xlu0.b32.cont [5/16] %v4269_v32, 128  ;;  %v1573_v32 = vpop.f32.mrf.mxu3 }
 0x4dc   : > { %v1604_v33 = vmul.f32 %v4442_v59, %v1573_v32 }
 0x4e3   : > { %1869 = vxpose.xlu0.b32.cont [6/16] %v4272_v14, 128  ;;  %v1695_v14 = vmin.f32 %v1694_v8, 31.0 }
 0x4eb   : > { %1870 = vxpose.xlu0.b32.cont [7/16] %v4264_v15, 128  ;;  %v1576_v15 = vpop.f32.mrf.mxu3 }
 0x4f2   : > { %v1642_v0 = vpop.permute.xlu2 %1641 }
 0x4f3   : > { %1871 = vxpose.xlu0.b32.cont [8/16] %v4281_v6, 128  ;;  %v1578_v6 = vpop.f32.mrf.mxu3  ;;  %v1657_v27 = vadd.f32 %v1642_v0, %v1604_v33 }
 0x4f4   : > { %v1608_v49 = vmul.f32 %v4456_v48, %v1578_v6 }
 0x4f5   : > { %v1665_v24 = vmax.f32 %v1657_v27, 0.0 }
 0x4fb   : > { %1872 = vxpose.xlu0.b32.cont [9/16] %v4404_v37, 128  ;;  %v1606_v37 = vmul.f32 %v4444_v51, %v1576_v15 }
 0x4fe   : > { %v1737_v41 = vpop.permute.xlu1 %1736 }
 0x4ff   : > { %v1739_v46 = vmul.f32 %v1737_v41, %v1695_v14 }
 0x501   : > { %1742 = vperm.xlu2 %3235, %v1739_v46  }
 0x503   : > { %1873 = vxpose.xlu0.b32.cont [10/16] %v4394_v38, 128  ;;  %v1607_v38 = vmul.f32 %v4456_v48, %v1559_v35 }
 0x50a   : > { %v1637_v22 = vpop.permute.xlu1 %1636 }
 0x50b   : > { %1874 = vxpose.xlu0.b32.cont [11/16] %v4408_v9, 128  ;;  %v1647_v39 = vpop.permute.xlu0 %1646  ;;  %v1603_v9 = vmul.f32 %v4442_v59, %v1554_v55  ;;  %v1654_v3 = vadd.f32 %v1637_v22, %v1601_v36  ;;  %v1655_v45 = vadd.f32 %v1637_v22, %v1602_v4 }
 0x50c   : > { %v1658_v54 = vadd.f32 %v1647_v39, %v1605_v5  ;;  %v1659_v26 = vadd.f32 %v1647_v39, %v1606_v37 }
 0x50d   : > { %v1656_v34 = vadd.f32 %v1642_v0, %v1603_v9  ;;  %v1662_v58 = vmax.f32 %v1654_v3, 0.0  ;;  %v1663_v43 = vmax.f32 %v1655_v45, 0.0 }
 0x50e   : > { %v1666_v30 = vmax.f32 %v1658_v54, 0.0  ;;  %v1667_v40 = vmax.f32 %v1659_v26, 0.0 }
 0x50f   : > { %v1664_v61 = vmax.f32 %v1656_v34, 0.0  ;;  %v1671_v63 = vpack.c.bf16 %v1665_v24, %v1663_v43 }
 0x511   : > { %v1670_v59 = vpack.c.bf16 %v1664_v61, %v1662_v58 }
 0x512   : > { %v1652_v17 = vpop.permute.xlu1 %1651 }
 0x513   : > { %1875 = vxpose.xlu0.b32.cont [12/16] %v4398_v2, 128  ;;  %v1660_v51 = vadd.f32 %v1652_v17, %v1607_v38  ;;  %v1661_v21 = vadd.f32 %v1652_v17, %v1608_v49  ;;  %v1696_v2 = vld [vmem:[%s5127_s7] sm:$0xf] }
 0x515   : > { %v1668_v53 = vmax.f32 %v1660_v51, 0.0  ;;  %v1669_v48 = vmax.f32 %v1661_v21, 0.0 }
 0x517   : > { %v1672_v29 = vpack.c.bf16 %v1668_v53, %v1666_v30  ;;  %v1673_v25 = vpack.c.bf16 %v1669_v48, %v1667_v40 }
 0x519   : > { %1706 = vmatpush.bf16.msra.mxu2 %v1672_v29  ;;  %1719 = vmatpush.bf16.msra.mxu3 %v1673_v25 }
 0x51b   : > { %1876 = vxpose.xlu0.b32.cont [13/16] %v1654_v3, 128 }
 0x51d   : > { %1707 = vmatpush.bf16.msra.mxu2 %v1670_v59  ;;  %1720 = vmatpush.bf16.msra.mxu3 %v1671_v63 }
 0x520   : > { %2762 = vmatmul.msk.bf16.vlgmr.msra.gmra.mxu2 %vm1536_vm9, %v1696_v2  ;;  %2763 = vmatmul.msk.bf16.vlgmr.msra.gmra.mxu3 %vm1536_vm9, %v1696_v2 }
 0x523   : > { %1877 = vxpose.xlu0.b32.cont [14/16] %v1656_v34, 128 }
 0x527   : > { %1896 = vxpose.xlu2.b32.start [1/16] %v4217_v57, 128 }
 0x52b   : > { %1878 = vxpose.xlu0.b32.cont [15/16] %v1658_v54, 128 }
 0x52f   : > { %1897 = vxpose.xlu2.b32.cont [2/16] %v4223_v50, 128 }
 0x533   : > { %1879 = vxpose.xlu0.b32.end [16/16] %v1660_v51, 128 }
 0x537   : > { %1898 = vxpose.xlu2.b32.cont [3/16] %v4221_v56, 128 }
 0x53f   : > { %1899 = vxpose.xlu2.b32.cont [4/16] %v4226_v16, 128 }
 0x547   : > { %1900 = vxpose.xlu2.b32.cont [5/16] %v4233_v28, 128 }
 0x54f   : > { %1901 = vxpose.xlu2.b32.cont [6/16] %v4236_v52, 128 }
 0x557   : > { %1902 = vxpose.xlu2.b32.cont [7/16] %v4249_v60, 128 }
 0x55f   : > { %1903 = vxpose.xlu2.b32.cont [8/16] %v4284_v13, 128  ;;  %v4516_v57 = vpop.trf.xlu0 }
 0x560   : > { %1992 = vst.msk [vmem:[%s4514_s27] sm:$0xff] %vm1321_vm0, %v4516_v57 }
 0x567   : > { %1904 = vxpose.xlu2.b32.cont [9/16] %v4406_v7, 128  ;;  %v4521_v56 = vpop.trf.xlu0  ;;  %v4548_v7 = vpop.permute.xlu2 %1742 }
 0x568   : > { %1993 = vst.msk [vmem:[%s4514_s27 + $0x8] sm:$0xff] %vm1321_vm0, %v4521_v56 }
 0x56f   : > { %1905 = vxpose.xlu2.b32.cont [10/16] %v4396_v1, 128  ;;  %v4526_v50 = vpop.trf.xlu0 }
 0x570   : > { %1994 = vst.msk [vmem:[%s4514_s27 + $0x10] sm:$0xff] %vm1321_vm0, %v4526_v50  ;;  %2060 = vrot.lane.b32.xlu1 %v4526_v50, %s3271_s29 }
 0x577   : > { %1906 = vxpose.xlu2.b32.cont [11/16] %v4410_v18, 128  ;;  %v1883_v16 = vpop.trf.xlu0 }
 0x578   : > { %1995 = vst.msk [vmem:[%s4514_s27 + $0x18] sm:$0xff] %vm1321_vm0, %v1883_v16 }
 0x57f   : > { %1907 = vxpose.xlu2.b32.cont [12/16] %v4400_v20, 128  ;;  %v4541_v60 = vpop.trf.xlu0 }
 0x580   : > { %1996 = vst.msk [vmem:[%s4514_s27 + $0x20] sm:$0xff] %vm1321_vm0, %v4541_v60 }
 0x587   : > { %1908 = vxpose.xlu2.b32.cont [13/16] %v1655_v45, 128  ;;  %v1885_v20 = vpop.trf.xlu0 }
 0x588   : > { %1997 = vst.msk [vmem:[%s4514_s27 + $0x28] sm:$0xff] %vm1321_vm0, %v1885_v20 }
 0x58f   : > { %1909 = vxpose.xlu2.b32.cont [14/16] %v1657_v27, 128  ;;  %v4550_v18 = vpop.trf.xlu0 }
 0x590   : > { %1998 = vst.msk [vmem:[%s4514_s27 + $0x30] sm:$0xff] %vm1321_vm0, %v4550_v18 }
 0x597   : > { %1910 = vxpose.xlu2.b32.cont [15/16] %v1659_v26, 128  ;;  %v4558_v10 = vpop.trf.xlu0 }
 0x598   : > { %1999 = vst.msk [vmem:[%s4514_s27 + $0x38] sm:$0xff] %vm1321_vm0, %v4558_v10 }
 0x59f   : > { %1911 = vxpose.xlu2.b32.end [16/16] %v1661_v21, 128  ;;  %v4566_v31 = vpop.trf.xlu0 }
 0x5a0   : > { %2000 = vst.msk [vmem:[%s4514_s27 + $0x40] sm:$0xff] %vm1321_vm0, %v4566_v31 }
 0x5a1   : > { %2056 = vrot.lane.b32.xlu0 %v4516_v57, %s3271_s29 }
 0x5a3   : > { %v4535_v28 = vpop.f32.mrf.mxu2  ;;  %v4537_v52 = vpop.f32.mrf.mxu3 }
 0x5a4   : > { %v1731_v4 = vmul.f32 %v4481_v23, %v4535_v28  ;;  %v1732_v49 = vmul.f32 %v4481_v23, %v4537_v52 }
 0x5a6   : > { %v4685_v0 = vadd.f32 %v4548_v7, %v1731_v4  ;;  %v4688_v54 = vadd.f32 %v4548_v7, %v1732_v49 }
 0x5a7   : > { %v4580_v42 = vpop.trf.xlu0 }
 0x5a8   : > { %2001 = vst.msk [vmem:[%s4514_s27 + $0x48] sm:$0xff] %vm1321_vm0, %v4580_v42  ;;  %v1747_v23 = vand.u32 2147483647, %v4685_v0  ;;  %v1748_v26 = vand.u32 2147483647, %v4688_v54 }
 0x5aa   : > { %v1749_v33 = vmax.f32 %v1747_v23, %v1748_v26 }
 0x5ab   : > { %v1711_v13 = vpop.f32.mrf.mxu2  ;;  %v1724_v1 = vpop.f32.mrf.mxu3 }
 0x5af   : > { %v4588_v62 = vpop.trf.xlu0 }
 0x5b0   : > { %2002 = vst.msk [vmem:[%s4514_s27 + $0x50] sm:$0xff] %vm1321_vm0, %v4588_v62 }
 0x5b7   : > { %v4599_v55 = vpop.trf.xlu0 }
 0x5b8   : > { %2003 = vst.msk [vmem:[%s4514_s27 + $0x58] sm:$0xff] %vm1321_vm0, %v4599_v55 }
 0x5bf   : > { %v4608_v14 = vpop.trf.xlu0 }
 0x5c0   : > { %v1912_v12 = vpop.trf.xlu2  ;;  %2004 = vst.msk [vmem:[%s4514_s27 + $0x60] sm:$0xff] %vm1321_vm0, %v4608_v14 }
 0x5c1   : > { %2008 = vst.msk [vmem:[%s4514_s27 + $0x80] sm:$0xff] %vm1321_vm0, %v1912_v12  ;;  %2216 = vrot.lane.b32.xlu0 %v1912_v12, %s3272_s15 }
 0x5c7   : > { %v4619_v46 = vpop.trf.xlu0 }
 0x5c8   : > { %v1913_v11 = vpop.trf.xlu2  ;;  %2005 = vst.msk [vmem:[%s4514_s27 + $0x68] sm:$0xff] %vm1321_vm0, %v4619_v46 }
 0x5c9   : > { %2009 = vst.msk [vmem:[%s4514_s27 + $0x88] sm:$0xff] %vm1321_vm0, %v1913_v11  ;;  %2090 = vrot.lane.b32.xlu0 %v1913_v11, %s3271_s29 }
 0x5cf   : > { %v4630_v19 = vpop.trf.xlu0 }
 0x5d0   : > { %v4571_v44 = vpop.trf.xlu2  ;;  %2006 = vst.msk [vmem:[%s4514_s27 + $0x70] sm:$0xff] %vm1321_vm0, %v4630_v19 }
 0x5d1   : > { %2010 = vst.msk [vmem:[%s4514_s27 + $0x90] sm:$0xff] %vm1321_vm0, %v4571_v44  ;;  %2186 = vrot.lane.b32.xlu0 %v4521_v56, %s3272_s15  ;;  %2220 = vrot.lane.b32.xlu1 %v4571_v44, %s3272_s15 }
 0x5d7   : > { %v4643_v6 = vpop.trf.xlu0 }
 0x5d8   : > { %v1915_v47 = vpop.trf.xlu2  ;;  %2007 = vst.msk [vmem:[%s4514_s27 + $0x78] sm:$0xff] %vm1321_vm0, %v4643_v6 }
 0x5d9   : > { %2011 = vst.msk [vmem:[%s4514_s27 + $0x98] sm:$0xff] %vm1321_vm0, %v1915_v47  ;;  %2062 = vrot.lane.b32.xlu0 %v1883_v16, %s3271_s29 }
 0x5e0   : > { %v4593_v32 = vpop.trf.xlu2 }
 0x5e1   : > { %2012 = vst.msk [vmem:[%s4514_s27 + $0xa0] sm:$0xff] %vm1321_vm0, %v4593_v32  ;;  %2094 = vrot.lane.b32.xlu0 %v1915_v47, %s3271_s29 }
 0x5e2   : > { %v2061_v36 = vpop.permute.xlu1 %2060 }
 0x5e3   : > { %2154 = vst.msk [vmem:[%s4665_s21 + $0x10] sm:$0xff] %vm1536_vm9, %v2061_v36 }
 0x5e8   : > { %v1917_v8 = vpop.trf.xlu2 }
 0x5e9   : > { %2013 = vst.msk [vmem:[%s4514_s27 + $0xa8] sm:$0xff] %vm1321_vm0, %v1917_v8  ;;  %2226 = vrot.lane.b32.xlu1 %v1917_v8, %s3272_s15  ;;  %2190 = vrot.lane.b32.xlu0 %v1883_v16, %s3272_s15 }
 0x5f0   : > { %v4613_v41 = vpop.trf.xlu2 }
 0x5f1   : > { %2014 = vst.msk [vmem:[%s4514_s27 + $0xb0] sm:$0xff] %vm1321_vm0, %v4613_v41  ;;  %2222 = vrot.lane.b32.xlu0 %v1915_v47, %s3272_s15 }
 0x5f8   : > { %v4624_v15 = vpop.trf.xlu2 }
 0x5f9   : > { %2015 = vst.msk [vmem:[%s4514_s27 + $0xb8] sm:$0xff] %vm1321_vm0, %v4624_v15  ;;  %2066 = vrot.lane.b32.xlu0 %v1885_v20, %s3271_s29 }
 0x600   : > { %v4635_v22 = vpop.trf.xlu2 }
 0x601   : > { %2016 = vst.msk [vmem:[%s4514_s27 + $0xc0] sm:$0xff] %vm1321_vm0, %v4635_v22  ;;  %2232 = vrot.lane.b32.xlu1 %v4635_v22, %s3272_s15  ;;  %2098 = vrot.lane.b32.xlu0 %v1917_v8, %s3271_s29 }
 0x608   : > { %2088 = vrot.lane.b32.xlu2 %v1912_v12, %s3271_s29  ;;  %v1921_v35 = vpop.trf.xlu2 }
 0x609   : > { %2194 = vrot.lane.b32.xlu0 %v1885_v20, %s3272_s15  ;;  %2017 = vst.msk [vmem:[%s4514_s27 + $0xc8] sm:$0xff] %vm1321_vm0, %v1921_v35 }
 0x610   : > { %2184 = vrot.lane.b32.xlu2 %v4516_v57, %s3272_s15  ;;  %v4654_v39 = vpop.trf.xlu2 }
 0x611   : > { %2228 = vrot.lane.b32.xlu0 %v4613_v41, %s3272_s15  ;;  %2018 = vst.msk [vmem:[%s4514_s27 + $0xd0] sm:$0xff] %vm1321_vm0, %v4654_v39 }
 0x613   : > { %v2057_v5 = vpop.permute.xlu0 %2056 }
 0x614   : > { %2152 = vst.msk [vmem:[%s4665_s21] sm:$0xff] %vm1536_vm9, %v2057_v5 }
 0x618   : > { %2058 = vrot.lane.b32.xlu2 %v4521_v56, %s3271_s29  ;;  %v1923_v37 = vpop.trf.xlu2 }
 0x619   : > { %2070 = vrot.lane.b32.xlu0 %v4558_v10, %s3271_s29  ;;  %2019 = vst.msk [vmem:[%s4514_s27 + $0xd8] sm:$0xff] %vm1321_vm0, %v1923_v37 }
 0x620   : > { %2218 = vrot.lane.b32.xlu2 %v1913_v11, %s3272_s15  ;;  %v4682_v38 = vpop.trf.xlu2 }
 0x621   : > { %2102 = vrot.lane.b32.xlu0 %v4624_v15, %s3271_s29  ;;  %2020 = vst.msk [vmem:[%s4514_s27 + $0xe0] sm:$0xff] %vm1321_vm0, %v4682_v38 }
 0x628   : > { %2092 = vrot.lane.b32.xlu2 %v4571_v44, %s3271_s29  ;;  %v4699_v9 = vpop.trf.xlu2 }
 0x629   : > { %2021 = vst.msk [vmem:[%s4514_s27 + $0xe8] sm:$0xff] %vm1321_vm0, %v4699_v9  ;;  %2198 = vrot.lane.b32.xlu0 %v4558_v10, %s3272_s15 }
 0x62b   : > { %1750 = vmax.xlane.f32.xlu1 %v1749_v33 }
 0x630   : > { %2188 = vrot.lane.b32.xlu2 %v4526_v50, %s3272_s15  ;;  %v4708_v17 = vpop.trf.xlu2 }
 0x631   : > { %2022 = vst.msk [vmem:[%s4514_s27 + $0xf0] sm:$0xff] %vm1321_vm0, %v4708_v17  ;;  %2074 = vrot.lane.b32.xlu0 %v4580_v42, %s3271_s29 }
 0x633   : > { %v2217_v3 = vpop.permute.xlu0 %2216 }
 0x634   : > { %2296 = vst.msk [vmem:[%s4714_s30 + $0x80] sm:$0xff] %vm1536_vm9, %v2217_v3 }
 0x638   : > { %2064 = vrot.lane.b32.xlu2 %v4541_v60, %s3271_s29  ;;  %v4725_v45 = vpop.trf.xlu2 }
 0x639   : > { %2023 = vst.msk [vmem:[%s4514_s27 + $0xf8] sm:$0xff] %vm1321_vm0, %v4725_v45  ;;  %2106 = vrot.lane.b32.xlu0 %v1921_v35, %s3271_s29  ;;  %s4933_s27 = scalar_lea.vmem %s5133_s13, %s3352_s28 }
 0x63b   : > { %v2091_v51 = vpop.permute.xlu0 %2090 }
 0x63c   : > { %2169 = vst.msk [vmem:[%s4665_s21 + $0x88] sm:$0xff] %vm1536_vm9, %v2091_v51  ;;  %v1797_v51 = vlaneseq }
 0x640   : > { %2096 = vrot.lane.b32.xlu2 %v4593_v32, %s3271_s29 }
 0x641   : > { %2202 = vrot.lane.b32.xlu0 %v4580_v42, %s3272_s15 }
 0x643   : > { %v2221_v21 = vpop.permute.xlu1 %2220  ;;  %v2187_v34 = vpop.permute.xlu0 %2186 }
 0x644   : > { %2298 = vst.msk [vmem:[%s4714_s30 + $0x90] sm:$0xff] %vm1536_vm9, %v2221_v21  ;;  %2238 = vrot.lane.b32.xlu1 %v1923_v37, %s3272_s15 }
 0x645   : > { %2281 = vst.msk [vmem:[%s4714_s30 + $0x8] sm:$0xff] %vm1536_vm9, %v2187_v34 }
 0x648   : > { %2192 = vrot.lane.b32.xlu2 %v4541_v60, %s3272_s15 }
 0x649   : > { %2234 = vrot.lane.b32.xlu0 %v1921_v35, %s3272_s15 }
 0x64b   : > { %v2063_v27 = vpop.permute.xlu0 %2062 }
 0x64c   : > { %2155 = vst.msk [vmem:[%s4665_s21 + $0x18] sm:$0xff] %vm1536_vm9, %v2063_v27  ;;  %2244 = vrot.lane.b32.xlu1 %v4708_v17, %s3272_s15 }
 0x650   : > { %2224 = vrot.lane.b32.xlu2 %v4593_v32, %s3272_s15 }
 0x651   : > { %2078 = vrot.lane.b32.xlu0 %v4599_v55, %s3271_s29 }
 0x653   : > { %v2095_v30 = vpop.permute.xlu0 %2094 }
 0x654   : > { %2171 = vst.msk [vmem:[%s4665_s21 + $0x98] sm:$0xff] %vm1536_vm9, %v2095_v30  ;;  %2214 = vrot.lane.b32.xlu1 %v4643_v6, %s3272_s15 }
 0x658   : > { %2068 = vrot.lane.b32.xlu2 %v4550_v18, %s3271_s29 }
 0x659   : > { %2110 = vrot.lane.b32.xlu0 %v1923_v37, %s3271_s29 }
 0x65b   : > { %v2227_v40 = vpop.permute.xlu1 %2226  ;;  %v2191_v53 = vpop.permute.xlu0 %2190 }
 0x65c   : > { %2301 = vst.msk [vmem:[%s4714_s30 + $0xa8] sm:$0xff] %vm1536_vm9, %v2227_v40  ;;  %v1798_v40 = vshrl.u32 %v1797_v51, 7 }
 0x65d   : > { %2283 = vst.msk [vmem:[%s4714_s30 + $0x18] sm:$0xff] %vm1536_vm9, %v2191_v53 }
 0x65e   : > { %vm1799_vm14 = vcmp.lt.s32.totalorder %v1798_v40, 5 }
 0x660   : > { %2100 = vrot.lane.b32.xlu2 %v4613_v41, %s3271_s29 }
 0x661   : > { %2206 = vrot.lane.b32.xlu0 %v4599_v55, %s3272_s15 }
 0x662   : > { %v2089_v48 = vpop.permute.xlu2 %2088 }
 0x663   : > { %2168 = vst.msk [vmem:[%s4665_s21 + $0x80] sm:$0xff] %vm1536_vm9, %v2089_v48  ;;  %v2223_v58 = vpop.permute.xlu0 %2222 }
 0x664   : > { %2299 = vst.msk [vmem:[%s4714_s30 + $0x98] sm:$0xff] %vm1536_vm9, %v2223_v58 }
 0x668   : > { %2196 = vrot.lane.b32.xlu2 %v4550_v18, %s3272_s15 }
 0x669   : > { %2240 = vrot.lane.b32.xlu0 %v4682_v38, %s3272_s15 }
 0x66a   : > { %v2185_v43 = vpop.permute.xlu2 %2184 }
 0x66b   : > { %2280 = vst.msk [vmem:[%s4714_s30] sm:$0xff] %vm1536_vm9, %v2185_v43  ;;  %v2067_v29 = vpop.permute.xlu0 %2066 }
 0x66c   : > { %2157 = vst.msk [vmem:[%s4665_s21 + $0x28] sm:$0xff] %vm1536_vm9, %v2067_v29 }
 0x670   : > { %2230 = vrot.lane.b32.xlu2 %v4624_v15, %s3272_s15 }
 0x671   : > { %2082 = vrot.lane.b32.xlu0 %v4619_v46, %s3271_s29 }
 0x672   : > { %v2059_v25 = vpop.permute.xlu2 %2058 }
 0x673   : > { %2153 = vst.msk [vmem:[%s4665_s21 + $0x8] sm:$0xff] %vm1536_vm9, %v2059_v25  ;;  %v2233_v61 = vpop.permute.xlu1 %2232  ;;  %v2099_v24 = vpop.permute.xlu0 %2098 }
 0x674   : > { %2304 = vst.msk [vmem:[%s4714_s30 + $0xc0] sm:$0xff] %vm1536_vm9, %v2233_v61 }
 0x675   : > { %2173 = vst.msk [vmem:[%s4665_s21 + $0xa8] sm:$0xff] %vm1536_vm9, %v2099_v24 }
 0x678   : > { %2072 = vrot.lane.b32.xlu2 %v4566_v31, %s3271_s29 }
 0x679   : > { %2114 = vrot.lane.b32.xlu0 %v4699_v9, %s3271_s29 }
 0x67a   : > { %v2219_v59 = vpop.permute.xlu2 %2218 }
 0x67b   : > { %2297 = vst.msk [vmem:[%s4714_s30 + $0x88] sm:$0xff] %vm1536_vm9, %v2219_v59  ;;  %v2195_v63 = vpop.permute.xlu0 %2194 }
 0x67c   : > { %2285 = vst.msk [vmem:[%s4714_s30 + $0x28] sm:$0xff] %vm1536_vm9, %v2195_v63 }
 0x680   : > { %2104 = vrot.lane.b32.xlu2 %v4635_v22, %s3271_s29 }
 0x681   : > { %2210 = vrot.lane.b32.xlu0 %v4619_v46, %s3272_s15 }
 0x682   : > { %v2093_v2 = vpop.permute.xlu2 %2092 }
 0x683   : > { %2170 = vst.msk [vmem:[%s4665_s21 + $0x90] sm:$0xff] %vm1536_vm9, %v2093_v2  ;;  %v2229_v57 = vpop.permute.xlu0 %2228 }
 0x684   : > { %2302 = vst.msk [vmem:[%s4714_s30 + $0xb0] sm:$0xff] %vm1536_vm9, %v2229_v57 }
 0x688   : > { %2200 = vrot.lane.b32.xlu2 %v4566_v31, %s3272_s15 }
 0x689   : > { %1928 = vxpose.xlu1.b32.start [1/2] (short) %v4685_v0, 128  ;;  %2086 = vrot.lane.b32.xlu0 %v4643_v6, %s3271_s29 }
 0x68a   : > { %v2189_v56 = vpop.permute.xlu2 %2188 }
 0x68b   : > { %2282 = vst.msk [vmem:[%s4714_s30 + $0x10] sm:$0xff] %vm1536_vm9, %v2189_v56  ;;  %v2071_v50 = vpop.permute.xlu0 %2070 }
 0x68c   : > { %2159 = vst.msk [vmem:[%s4665_s21 + $0x38] sm:$0xff] %vm1536_vm9, %v2071_v50 }
 0x690   : > { %2076 = vrot.lane.b32.xlu2 %v4588_v62, %s3271_s29 }
 0x691   : > { %2118 = vrot.lane.b32.xlu0 %v4725_v45, %s3271_s29 }
 0x692   : > { %v2065_v16 = vpop.permute.xlu2 %2064 }
 0x693   : > { %2156 = vst.msk [vmem:[%s4665_s21 + $0x20] sm:$0xff] %vm1536_vm9, %v2065_v16  ;;  %v2103_v28 = vpop.permute.xlu0 %2102 }
 0x694   : > { %2175 = vst.msk [vmem:[%s4665_s21 + $0xb8] sm:$0xff] %vm1536_vm9, %v2103_v28 }
 0x698   : > { %2108 = vrot.lane.b32.xlu2 %v4654_v39, %s3271_s29 }
 0x699   : > { %2246 = vrot.lane.b32.xlu0 %v4725_v45, %s3272_s15 }
 0x69a   : > { %v2097_v52 = vpop.permute.xlu2 %2096 }
 0x69b   : > { %2172 = vst.msk [vmem:[%s4665_s21 + $0xa0] sm:$0xff] %vm1536_vm9, %v2097_v52  ;;  %v2199_v23 = vpop.permute.xlu0 %2198 }
 0x69c   : > { %2287 = vst.msk [vmem:[%s4714_s30 + $0x38] sm:$0xff] %vm1536_vm9, %v2199_v23 }
 0x69e   : > { %v1751_v60 = vpop.xlane.xlu1 %1750 }
 0x69f   : > { %v1752_v13 = vrot.slane %v1751_v60, 4 }
 0x6a0   : > { %2204 = vrot.lane.b32.xlu2 %v4588_v62, %s3272_s15 }
 0x6a1   : > { %v1753_v1 = vmax.f32 %v1751_v60, %v1752_v13 }
 0x6a2   : > { %v2193_v20 = vpop.permute.xlu2 %2192 }
 0x6a3   : > { %v1754_v7 = vrot.slane %v1753_v1, 2  ;;  %2284 = vst.msk [vmem:[%s4714_s30 + $0x20] sm:$0xff] %vm1536_vm9, %v2193_v20  ;;  %v2075_v43 = vpop.permute.xlu0 %2074 }
 0x6a4   : > { %2161 = vst.msk [vmem:[%s4665_s21 + $0x48] sm:$0xff] %vm1536_vm9, %v2075_v43 }
 0x6a5   : > { %v1755_v18 = vmax.f32 %v1753_v1, %v1754_v7 }
 0x6a7   : > { %v1756_v12 = vrot.slane %v1755_v18, 1 }
 0x6a8   : > { %2236 = vrot.lane.b32.xlu2 %v4654_v39, %s3272_s15 }
 0x6a9   : > { %v1757_v10 = vmax.f32 %v1755_v18, %v1756_v12 }
 0x6aa   : > { %v2225_v11 = vpop.permute.xlu2 %2224 }
 0x6ab   : > { %2300 = vst.msk [vmem:[%s4714_s30 + $0xa0] sm:$0xff] %vm1536_vm9, %v2225_v11  ;;  %v2107_v50 = vpop.permute.xlu0 %2106 }
 0x6ac   : > { %3184 = vpush %v1757_v10 }
 0x6ad   : > { %2177 = vst.msk [vmem:[%s4665_s21 + $0xc8] sm:$0xff] %vm1536_vm9, %v2107_v50 }
 0x6b0   : > { %2080 = vrot.lane.b32.xlu2 %v4608_v14, %s3271_s29 }
 0x6b2   : > { %v2069_v31 = vpop.permute.xlu2 %2068 }
 0x6b3   : > { %2158 = vst.msk [vmem:[%s4665_s21 + $0x30] sm:$0xff] %vm1536_vm9, %v2069_v31  ;;  %v2203_v1 = vpop.permute.xlu0 %2202 }
 0x6b4   : > { %2289 = vst.msk [vmem:[%s4714_s30 + $0x48] sm:$0xff] %vm1536_vm9, %v2203_v1 }
 0x6b8   : > { %2112 = vrot.lane.b32.xlu2 %v4682_v38, %s3271_s29 }
 0x6ba   : > { %v2101_v44 = vpop.permute.xlu2 %2100 }
 0x6bb   : > { %2174 = vst.msk [vmem:[%s4665_s21 + $0xb0] sm:$0xff] %vm1536_vm9, %v2101_v44  ;;  %v2235_v10 = vpop.permute.xlu0 %2234 }
 0x6bc   : > { %2305 = vst.msk [vmem:[%s4714_s30 + $0xc8] sm:$0xff] %vm1536_vm9, %v2235_v10 }
 0x6c0   : > { %2208 = vrot.lane.b32.xlu2 %v4608_v14, %s3272_s15 }
 0x6c2   : > { %v2197_v42 = vpop.permute.xlu2 %2196 }
 0x6c3   : > { %2286 = vst.msk [vmem:[%s4714_s30 + $0x30] sm:$0xff] %vm1536_vm9, %v2197_v42  ;;  %v2079_v42 = vpop.permute.xlu0 %2078 }
 0x6c4   : > { %2163 = vst.msk [vmem:[%s4665_s21 + $0x58] sm:$0xff] %vm1536_vm9, %v2079_v42 }
 0x6c8   : > { %2242 = vrot.lane.b32.xlu2 %v4699_v9, %s3272_s15 }
 0x6ca   : > { %v2231_v47 = vpop.permute.xlu2 %2230 }
 0x6cb   : > { %2303 = vst.msk [vmem:[%s4714_s30 + $0xb8] sm:$0xff] %vm1536_vm9, %v2231_v47 }
 0x6d0   : > { %2084 = vrot.lane.b32.xlu2 %v4630_v19, %s3271_s29 }
 0x6d2   : > { %v2073_v62 = vpop.permute.xlu2 %2072 }
 0x6d3   : > { %2160 = vst.msk [vmem:[%s4665_s21 + $0x40] sm:$0xff] %vm1536_vm9, %v2073_v62 }
 0x6d8   : > { %2116 = vrot.lane.b32.xlu2 %v4708_v17, %s3271_s29  ;;  %s3273_s29 = smov 120  }
 0x6da   : > { %v2105_v32 = vpop.permute.xlu2 %2104 }
 0x6db   : > { %2176 = vst.msk [vmem:[%s4665_s21 + $0xc0] sm:$0xff] %vm1536_vm9, %v2105_v32 }
 0x6dd   : > { %s3185_s19 = spop %3184 }
 0x6de   : > { %s1759_s24 = smax.f32 %s3268_s16, %s3185_s19 }
 0x6df   : > { %s1768_s26 = smul.f32 %s3520_s18, %s1759_s24 }
 0x6e0   : > { %2212 = vrot.lane.b32.xlu2 %v4630_v19, %s3272_s15 }
 0x6e1   : > { %v1769_v55 = vstv %s1768_s26 }
 0x6e2   : > { %3246 = vrcp.f32 %v1769_v55  ;;  %v1781_v46 = vand.u32 2147483648, %v1769_v55  ;;  %v1779_v22 = vand.u32 2147483647, %v1769_v55  ;;  %vm1775_vm8 = vweird.f32 %v1769_v55  ;;  %v2201_v38 = vpop.permute.xlu2 %2200 }
 0x6e3   : > { %2288 = vst.msk [vmem:[%s4714_s30 + $0x40] sm:$0xff] %vm1536_vm9, %v2201_v38 }
 0x6e4   : > { %v1782_v35 = vor.u32 1.1754944e-38, %v1781_v46  ;;  %vm1780_vm11 = vcmp.eq.f32.partialorder %v1779_v22, 8.507059e+37 }
 0x6e8   : > { %v3247_v8 = vpop.eup %3246 }
 0x6e9   : > { %v1771_v14 = vmul.f32 %v3247_v8, %v1769_v55  ;;  %vm1776_vm0 = vweird.f32 %v3247_v8 }
 0x6ea   : > { %vm1777_vm10 = vmor %vm1775_vm8, %vm1776_vm0  ;;  %v2077_v58 = vpop.permute.xlu2 %2076  ;;  %vm2312_vm0 = vcmask 39936  }
 0x6eb   : > { %v1772_v41 = vsub.f32 1.0, %v1771_v14  ;;  %2162 = vst.msk [vmem:[%s4665_s21 + $0x50] sm:$0xff] %vm1536_vm9, %v2077_v58  ;;  %v2111_v14 = vpop.permute.xlu0 %2110 }
 0x6ec   : > { %2179 = vst.msk [vmem:[%s4665_s21 + $0xd8] sm:$0xff] %vm1536_vm9, %v2111_v14 }
 0x6ed   : > { %v1773_v15 = vmul.f32 %v3247_v8, %v1772_v41 }
 0x6ef   : > { %v1774_v6 = vadd.f32 %v3247_v8, %v1773_v15 }
 0x6f1   : > { %v1778_v39 = vsel %vm1777_vm10, %v3247_v8, %v1774_v6 }
 0x6f2   : > { %v1783_v5 = vsel %vm1780_vm11, %v1782_v35, %v1778_v39  ;;  %v2109_v56 = vpop.permute.xlu2 %2108  ;;  %v2239_v35 = vpop.permute.xlu1 %2238 }
 0x6f3   : > { %3186 = vpush %v1783_v5  ;;  %v2207_v22 = vpop.permute.xlu0 %2206 }
 0x6f4   : > { %2178 = vst.msk [vmem:[%s4665_s21 + $0xd0] sm:$0xff] %vm1536_vm9, %v2109_v56 }
 0x6f5   : > { %2291 = vst.msk [vmem:[%s4714_s30 + $0x58] sm:$0xff] %vm1536_vm9, %v2207_v22 }
 0x6f6   : > { %2307 = vst.msk [vmem:[%s4714_s30 + $0xd8] sm:$0xff] %vm1536_vm9, %v2239_v35 }
 0x6fa   : > { %v2205_v13 = vpop.permute.xlu2 %2204 }
 0x6fb   : > { %2290 = vst.msk [vmem:[%s4714_s30 + $0x50] sm:$0xff] %vm1536_vm9, %v2205_v13  ;;  %v2241_v38 = vpop.permute.xlu0 %2240 }
 0x6fc   : > { %2308 = vst.msk [vmem:[%s4714_s30 + $0xe0] sm:$0xff] %vm1536_vm9, %v2241_v38 }
 0x702   : > { %v2237_v12 = vpop.permute.xlu2 %2236 }
 0x703   : > { %2306 = vst.msk [vmem:[%s4714_s30 + $0xd0] sm:$0xff] %vm1536_vm9, %v2237_v12 }
 0x70a   : > { %v2081_v44 = vpop.permute.xlu2 %2080 }
 0x70b   : > { %2164 = vst.msk [vmem:[%s4665_s21 + $0x60] sm:$0xff] %vm1536_vm9, %v2081_v44 }
 0x712   : > { %v2113_v8 = vpop.permute.xlu2 %2112 }
 0x713   : > { %2180 = vst.msk [vmem:[%s4665_s21 + $0xe0] sm:$0xff] %vm1536_vm9, %v2113_v8 }
 0x71a   : > { %v2209_v15 = vpop.permute.xlu2 %2208 }
 0x71b   : > { %2292 = vst.msk [vmem:[%s4714_s30 + $0x60] sm:$0xff] %vm1536_vm9, %v2209_v15 }
 0x724   : > { %s3187_s16 = spop %3186 }
 0x725   : > { %v1785_v19 = vstv %s3187_s16 }
 0x726   : > { %v1786_v37 = vmul.f32 %v1785_v19, %v4685_v0  ;;  %v1787_v36 = vmul.f32 %v1785_v19, %v4688_v54 }
 0x728   : > { %v3190_v4 = vcvt.f32.s32 %v1786_v37  ;;  %v3198_v49 = vcvt.f32.s32 %v1787_v36  ;;  %v3188_v9 = vand.u32 2147483647, %v1786_v37  ;;  %v3193_v3 = vand.u32 2147483648, %v1786_v37 }
 0x729   : > { %v3196_v45 = vand.u32 2147483647, %v1787_v36  ;;  %v3201_v21 = vand.u32 2147483648, %v1787_v36 }
 0x72a   : > { %v3191_v26 = vcvt.s32.f32 %v3190_v4  ;;  %v3199_v33 = vcvt.s32.f32 %v3198_v49  ;;  %vm3189_vm12 = vcmp.lt.f32.partialorder %v3188_v9, 8388608.0  ;;  %v2243_v4 = vpop.permute.xlu2 %2242 }
 0x72b   : > { %vm3197_vm13 = vcmp.lt.f32.partialorder %v3196_v45, 8388608.0  ;;  %2309 = vst.msk [vmem:[%s4714_s30 + $0xe8] sm:$0xff] %vm1536_vm9, %v2243_v4 }
 0x72c   : > { %v3192_v17 = vand.u32 2147483647, %v3191_v26  ;;  %v3200_v0 = vand.u32 2147483647, %v3199_v33  ;;  %v2245_v26 = vpop.permute.xlu1 %2244 }
 0x72d   : > { %2310 = vst.msk [vmem:[%s4714_s30 + $0xf0] sm:$0xff] %vm1536_vm9, %v2245_v26 }
 0x72e   : > { %v3194_v34 = vor.u32 %v3193_v3, %v3192_v17  ;;  %v3202_v27 = vor.u32 %v3201_v21, %v3200_v0  ;;  %v2083_v3 = vpop.permute.xlu0 %2082 }
 0x72f   : > { %2165 = vst.msk [vmem:[%s4665_s21 + $0x68] sm:$0xff] %vm1536_vm9, %v2083_v3 }
 0x730   : > { %v3195_v30 = vsel %vm3189_vm12, %v3194_v34, %v1786_v37  ;;  %v3203_v53 = vsel %vm3197_vm13, %v3202_v27, %v1787_v36 }
 0x731   : > { %v1790_v48 = vmax.f32 %v3195_v30, -32.0  ;;  %v1791_v29 = vmax.f32 %v3203_v53, -32.0 }
 0x732   : > { %v2085_v17 = vpop.permute.xlu2 %2084 }
 0x733   : > { %v1792_v25 = vmin.f32 %v1790_v48, 31.0  ;;  %v1793_v61 = vmin.f32 %v1791_v29, 31.0  ;;  %2166 = vst.msk [vmem:[%s4665_s21 + $0x70] sm:$0xff] %vm1536_vm9, %v2085_v17 }
 0x734   : > { %v2215_v45 = vpop.permute.xlu1 %2214 }
 0x735   : > { %v1795_v24 = vmul.f32 %v1792_v25, %v1769_v55  ;;  %v1796_v59 = vmul.f32 %v1793_v61, %v1769_v55  ;;  %2295 = vst.msk [vmem:[%s4714_s30 + $0x78] sm:$0xff] %vm1536_vm9, %v2215_v45 }
 0x736   : > { %v2115_v0 = vpop.permute.xlu0 %2114 }
 0x737   : > { %v1800_v63 = vsel %vm1799_vm14, %v1795_v24, -inf  ;;  %v4875_v2 = vsel %vm1799_vm14, %v1796_v59, -inf  ;;  %2181 = vst.msk [vmem:[%s4665_s21 + $0xe8] sm:$0xff] %vm1536_vm9, %v2115_v0 }
 0x738   : > { %v1802_v57 = vrot.slane %v1800_v63, 4  ;;  %v1808_v30 = vrot.slane %v4875_v2, 4 }
 0x73a   : > { %v1803_v16 = vmax.f32 %v1800_v63, %v1802_v57  ;;  %v2117_v51 = vpop.permute.xlu2 %2116  ;;  %v1809_v40 = vmax.f32 %v4875_v2, %v1808_v30 }
 0x73b   : > { %2182 = vst.msk [vmem:[%s4665_s21 + $0xf0] sm:$0xff] %vm1536_vm9, %v2117_v51 }
 0x73c   : > { %v1804_v28 = vrot.slane %v1803_v16, 2  ;;  %v1810_v53 = vrot.slane %v1809_v40, 2 }
 0x73e   : > { %v1805_v52 = vmax.f32 %v1803_v16, %v1804_v28  ;;  %v2211_v34 = vpop.permute.xlu0 %2210  ;;  %v1811_v48 = vmax.f32 %v1809_v40, %v1810_v53 }
 0x73f   : > { %2293 = vst.msk [vmem:[%s4714_s30 + $0x68] sm:$0xff] %vm1536_vm9, %v2211_v34 }
 0x740   : > { %v1806_v60 = vrot.slane %v1805_v52, 1  ;;  %v1812_v58 = vrot.slane %v1811_v48, 1 }
 0x742   : > { %v1807_v20 = vmax.f32 %v1805_v52, %v1806_v60  ;;  %v2213_v21 = vpop.permute.xlu2 %2212  ;;  %v1813_v43 = vmax.f32 %v1811_v48, %v1812_v58 }
 0x743   : > { %2294 = vst.msk [vmem:[%s4714_s30 + $0x70] sm:$0xff] %vm1536_vm9, %v2213_v21 }
 0x744   : > { %v1814_v7 = vsub.f32 %v1800_v63, %v1807_v20  ;;  %v1815_v29 = vsub.f32 %v4875_v2, %v1813_v43 }
 0x746   : > { %v1816_v18 = vmul.f32 1.442695, %v1814_v7  ;;  %v2087_v27 = vpop.permute.xlu0 %2086  ;;  %v1818_v25 = vmul.f32 1.442695, %v1815_v29 }
 0x747   : > { %2167 = vst.msk [vmem:[%s4665_s21 + $0x78] sm:$0xff] %vm1536_vm9, %v2087_v27 }
 0x748   : > { %3248 = vpow2.f32 %v1816_v18 }
 0x74e   : > { %v3249_v11 = vpop.eup %3248 }
 0x74f   : > { %v1820_v31 = vrot.slane %v3249_v11, 4 }
 0x751   : > { %v1821_v47 = vadd.f32 %v3249_v11, %v1820_v31 }
 0x753   : > { %v1822_v62 = vrot.slane %v1821_v47, 2 }
 0x755   : > { %v1823_v32 = vadd.f32 %v1822_v62, %v1821_v47 }
 0x757   : > { %v1824_v55 = vrot.slane %v1823_v32, 1 }
 0x759   : > { %v1825_v41 = vadd.f32 %v1824_v55, %v1823_v32 }
 0x75b   : > { %3250 = vrcp.f32 %v1825_v41  ;;  %v1843_v5 = vand.u32 2147483648, %v1825_v41  ;;  %v1841_v37 = vand.u32 2147483647, %v1825_v41  ;;  %vm1837_vm1 = vweird.f32 %v1825_v41 }
 0x75c   : > { %3252 = vpow2.f32 %v1818_v25 }
 0x75d   : > { %v1844_v49 = vor.u32 1.1754944e-38, %v1843_v5  ;;  %vm1842_vm3 = vcmp.eq.f32.partialorder %v1841_v37, 8.507059e+37 }
 0x761   : > { %v3251_v46 = vpop.eup %3250 }
 0x762   : > { %v1833_v6 = vmul.f32 %v3251_v46, %v1825_v41  ;;  %vm1838_vm15 = vweird.f32 %v3251_v46  ;;  %v3253_v61 = vpop.eup %3252 }
 0x763   : > { %vm1839_vm2 = vmor %vm1837_vm1, %vm1838_vm15  ;;  %v1826_v24 = vrot.slane %v3253_v61, 4 }
 0x764   : > { %v1834_v39 = vsub.f32 1.0, %v1833_v6 }
 0x765   : > { %v1827_v59 = vadd.f32 %v3253_v61, %v1826_v24 }
 0x766   : > { %v1835_v19 = vmul.f32 %v3251_v46, %v1834_v39  ;;  %v2119_v39 = vpop.permute.xlu0 %2118 }
 0x767   : > { %v1828_v63 = vrot.slane %v1827_v59, 2  ;;  %2183 = vst.msk [vmem:[%s4665_s21 + $0xf8] sm:$0xff] %vm1536_vm9, %v2119_v39 }
 0x768   : > { %v1836_v36 = vadd.f32 %v3251_v46, %v1835_v19 }
 0x769   : > { %v1829_v57 = vadd.f32 %v1828_v63, %v1827_v59 }
 0x76a   : > { %v1840_v23 = vsel %vm1839_vm2, %v3251_v46, %v1836_v36 }
 0x76b   : > { %v1845_v9 = vsel %vm1842_vm3, %v1844_v49, %v1840_v23  ;;  %v1830_v56 = vrot.slane %v1829_v57, 1 }
 0x76c   : > { %v1862_v33 = vmul.f32 %v3249_v11, %v1845_v9 }
 0x76d   : > { %v1831_v50 = vadd.f32 %v1830_v56, %v1829_v57 }
 0x76e   : > { %1929 = vxpose.xlu1.b32.end [2/2] (short) %v1862_v33, 128  ;;  %v2247_v19 = vpop.permute.xlu0 %2246 }
 0x76f   : > { %3254 = vrcp.f32 %v1831_v50  ;;  %v1858_v1 = vand.u32 2147483648, %v1831_v50  ;;  %vm1852_vm5 = vweird.f32 %v1831_v50  ;;  %v1856_v2 = vand.u32 2147483647, %v1831_v50  ;;  %2311 = vst.msk [vmem:[%s4714_s30 + $0xf8] sm:$0xff] %vm1536_vm9, %v2247_v19 }
 0x771   : > { %v1859_v7 = vor.u32 1.1754944e-38, %v1858_v1  ;;  %vm1857_vm7 = vcmp.eq.f32.partialorder %v1856_v2, 8.507059e+37 }
 0x775   : > { %v3255_v16 = vpop.eup %3254 }
 0x776   : > { %v1848_v28 = vmul.f32 %v3255_v16, %v1831_v50  ;;  %vm1853_vm4 = vweird.f32 %v3255_v16 }
 0x777   : > { %vm1854_vm6 = vmor %vm1852_vm5, %vm1853_vm4 }
 0x778   : > { %v1849_v52 = vsub.f32 1.0, %v1848_v28 }
 0x77a   : > { %v1850_v60 = vmul.f32 %v3255_v16, %v1849_v52 }
 0x77c   : > { %v1851_v13 = vadd.f32 %v3255_v16, %v1850_v60 }
 0x77e   : > { %v1855_v20 = vsel %vm1854_vm6, %v3255_v16, %v1851_v13 }
 0x77f   : > { %v1860_v18 = vsel %vm1857_vm7, %v1859_v7, %v1855_v20 }
 0x780   : > { %v1863_v12 = vmul.f32 %v3253_v61, %v1860_v18 }
 0x7e6   : > { %1960 = vxpose.xlu1.b32.start [1/2] (short) %v4688_v54, 128 }
 0x7ee   : > { %1961 = vxpose.xlu1.b32.end [2/2] (short) %v1863_v12, 128 }
 0x80a   : > { %v1944_v54 = vpop.trf.xlu1 }
 0x80b   : > { %2313 = vst.msk [vmem:[%s4933_s27] sm:$0xff] %vm2312_vm0, %v1944_v54  ;;  %2377 = vrot.lane.b32.xlu2 %v1944_v54, %s3273_s29 }
 0x812   : > { %v1945_v10 = vpop.trf.xlu1 }
 0x813   : > { %2314 = vst.msk [vmem:[%s4933_s27 + $0x8] sm:$0xff] %vm2312_vm0, %v1945_v10 }
 0x81a   : > { %v1946_v11 = vpop.trf.xlu1 }
 0x81b   : > { %2315 = vst.msk [vmem:[%s4933_s27 + $0x10] sm:$0xff] %vm2312_vm0, %v1946_v11 }
 0x822   : > { %v1947_v31 = vpop.trf.xlu1 }
 0x823   : > { %2316 = vst.msk [vmem:[%s4933_s27 + $0x18] sm:$0xff] %vm2312_vm0, %v1947_v31 }
 0x82a   : > { %v1948_v44 = vpop.trf.xlu1 }
 0x82b   : > { %2317 = vst.msk [vmem:[%s4933_s27 + $0x20] sm:$0xff] %vm2312_vm0, %v1948_v44 }
 0x832   : > { %v1949_v42 = vpop.trf.xlu1 }
 0x833   : > { %2318 = vst.msk [vmem:[%s4933_s27 + $0x28] sm:$0xff] %vm2312_vm0, %v1949_v42 }
 0x83a   : > { %v1950_v47 = vpop.trf.xlu1 }
 0x83b   : > { %2319 = vst.msk [vmem:[%s4933_s27 + $0x30] sm:$0xff] %vm2312_vm0, %v1950_v47 }
 0x842   : > { %v4950_v62 = vpop.trf.xlu1 }
 0x843   : > { %2320 = vst.msk [vmem:[%s4933_s27 + $0x38] sm:$0xff] %vm2312_vm0, %v4950_v62 }
 0x84a   : > { %v1952_v32 = vpop.trf.xlu1 }
 0x84b   : > { %2321 = vst.msk [vmem:[%s4933_s27 + $0x40] sm:$0xff] %vm2312_vm0, %v1952_v32 }
 0x852   : > { %v1953_v55 = vpop.trf.xlu1 }
 0x853   : > { %2322 = vst.msk [vmem:[%s4933_s27 + $0x48] sm:$0xff] %vm2312_vm0, %v1953_v55 }
 0x85a   : > { %v4959_v8 = vpop.trf.xlu1 }
 0x85b   : > { %2323 = vst.msk [vmem:[%s4933_s27 + $0x50] sm:$0xff] %vm2312_vm0, %v4959_v8 }
 0x862   : > { %v1955_v14 = vpop.trf.xlu1 }
 0x863   : > { %2324 = vst.msk [vmem:[%s4933_s27 + $0x58] sm:$0xff] %vm2312_vm0, %v1955_v14 }
 0x865   : > { %v2378_v41 = vpop.permute.xlu2 %2377 }
 0x866   : > { %2473 = vst.msk [vmem:[%s4970_s20] sm:$0xff] %vm2312_vm0, %v2378_v41 }
 0x86a   : > { %v1956_v46 = vpop.trf.xlu1 }
 0x86b   : > { %2325 = vst.msk [vmem:[%s4933_s27 + $0x60] sm:$0xff] %vm2312_vm0, %v1956_v46 }
 0x872   : > { %v4976_v15 = vpop.trf.xlu1 }
 0x873   : > { %2326 = vst.msk [vmem:[%s4933_s27 + $0x68] sm:$0xff] %vm2312_vm0, %v4976_v15 }
 0x87a   : > { %v1958_v22 = vpop.trf.xlu1 }
 0x87b   : > { %2327 = vst.msk [vmem:[%s4933_s27 + $0x70] sm:$0xff] %vm2312_vm0, %v1958_v22 }
 0x882   : > { %v1959_v6 = vpop.trf.xlu1 }
 0x883   : > { %2328 = vst.msk [vmem:[%s4933_s27 + $0x78] sm:$0xff] %vm2312_vm0, %v1959_v6 }
 0x88a   : > { %v1976_v35 = vpop.trf.xlu1 }
 0x88b   : > { %2329 = vst.msk [vmem:[%s4933_s27 + $0x80] sm:$0xff] %vm2312_vm0, %v1976_v35 }
 0x892   : > { %v1977_v5 = vpop.trf.xlu1 }
 0x893   : > { %2330 = vst.msk [vmem:[%s4933_s27 + $0x88] sm:$0xff] %vm2312_vm0, %v1977_v5  ;;  %2411 = vrot.lane.b32.xlu0 %v1977_v5, %s3273_s29 }
 0x89a   : > { %v1978_v37 = vpop.trf.xlu1 }
 0x89b   : > { %2331 = vst.msk [vmem:[%s4933_s27 + $0x90] sm:$0xff] %vm2312_vm0, %v1978_v37  ;;  %2381 = vrot.lane.b32.xlu0 %v1946_v11, %s3273_s29  ;;  %2413 = vrot.lane.b32.xlu2 %v1978_v37, %s3273_s29 }
 0x8a2   : > { %v1979_v36 = vpop.trf.xlu1 }
 0x8a3   : > { %2332 = vst.msk [vmem:[%s4933_s27 + $0x98] sm:$0xff] %vm2312_vm0, %v1979_v36  ;;  %2383 = vrot.lane.b32.xlu2 %v1947_v31, %s3273_s29 }
 0x8aa   : > { %v1980_v4 = vpop.trf.xlu1 }
 0x8ab   : > { %2333 = vst.msk [vmem:[%s4933_s27 + $0xa0] sm:$0xff] %vm2312_vm0, %v1980_v4  ;;  %2417 = vrot.lane.b32.xlu0 %v1980_v4, %s3273_s29 }
 0x8b2   : > { %v1981_v49 = vpop.trf.xlu1 }
 0x8b3   : > { %2334 = vst.msk [vmem:[%s4933_s27 + $0xa8] sm:$0xff] %vm2312_vm0, %v1981_v49  ;;  %2387 = vrot.lane.b32.xlu0 %v1949_v42, %s3273_s29  ;;  %2419 = vrot.lane.b32.xlu2 %v1981_v49, %s3273_s29 }
 0x8b8   : > { %2409 = vrot.lane.b32.xlu1 %v1976_v35, %s3273_s29 }
 0x8ba   : > { %v1982_v38 = vpop.trf.xlu1 }
 0x8bb   : > { %2335 = vst.msk [vmem:[%s4933_s27 + $0xb0] sm:$0xff] %vm2312_vm0, %v1982_v38  ;;  %2389 = vrot.lane.b32.xlu2 %v1950_v47, %s3273_s29 }
 0x8c0   : > { %2379 = vrot.lane.b32.xlu1 %v1945_v10, %s3273_s29 }
 0x8c2   : > { %v1983_v23 = vpop.trf.xlu1 }
 0x8c3   : > { %2336 = vst.msk [vmem:[%s4933_s27 + $0xb8] sm:$0xff] %vm2312_vm0, %v1983_v23  ;;  %2423 = vrot.lane.b32.xlu0 %v1983_v23, %s3273_s29 }
 0x8c8   : > { %2415 = vrot.lane.b32.xlu1 %v1979_v36, %s3273_s29 }
 0x8ca   : > { %v1984_v26 = vpop.trf.xlu1 }
 0x8cb   : > { %2337 = vst.msk [vmem:[%s4933_s27 + $0xc0] sm:$0xff] %vm2312_vm0, %v1984_v26  ;;  %2393 = vrot.lane.b32.xlu0 %v1952_v32, %s3273_s29  ;;  %2425 = vrot.lane.b32.xlu2 %v1984_v26, %s3273_s29 }
 0x8d0   : > { %2385 = vrot.lane.b32.xlu1 %v1948_v44, %s3273_s29 }
 0x8d2   : > { %v1985_v9 = vpop.trf.xlu1 }
 0x8d3   : > { %2338 = vst.msk [vmem:[%s4933_s27 + $0xc8] sm:$0xff] %vm2312_vm0, %v1985_v9  ;;  %2395 = vrot.lane.b32.xlu2 %v1953_v55, %s3273_s29 }
 0x8d8   : > { %2421 = vrot.lane.b32.xlu1 %v1982_v38, %s3273_s29 }
 0x8da   : > { %v1986_v33 = vpop.trf.xlu1 }
 0x8db   : > { %2339 = vst.msk [vmem:[%s4933_s27 + $0xd0] sm:$0xff] %vm2312_vm0, %v1986_v33  ;;  %2429 = vrot.lane.b32.xlu0 %v1986_v33, %s3273_s29 }
 0x8e0   : > { %2391 = vrot.lane.b32.xlu1 %v4950_v62, %s3273_s29 }
 0x8e2   : > { %v1987_v17 = vpop.trf.xlu1 }
 0x8e3   : > { %2340 = vst.msk [vmem:[%s4933_s27 + $0xd8] sm:$0xff] %vm2312_vm0, %v1987_v17  ;;  %2399 = vrot.lane.b32.xlu0 %v1955_v14, %s3273_s29  ;;  %2431 = vrot.lane.b32.xlu2 %v1987_v17, %s3273_s29 }
 0x8e8   : > { %2427 = vrot.lane.b32.xlu1 %v1985_v9, %s3273_s29 }
 0x8ea   : > { %v1988_v3 = vpop.trf.xlu1 }
 0x8eb   : > { %2405 = vrot.lane.b32.xlu0 %v1958_v22, %s3273_s29  ;;  %2401 = vrot.lane.b32.xlu2 %v1956_v46, %s3273_s29  ;;  %2341 = vst.msk [vmem:[%s4933_s27 + $0xe0] sm:$0xff] %vm2312_vm0, %v1988_v3 }
 0x8f0   : > { %2397 = vrot.lane.b32.xlu1 %v4959_v8, %s3273_s29 }
 0x8f2   : > { %v1989_v45 = vpop.trf.xlu1 }
 0x8f3   : > { %2407 = vrot.lane.b32.xlu2 %v1959_v6, %s3273_s29  ;;  %2342 = vst.msk [vmem:[%s4933_s27 + $0xe8] sm:$0xff] %vm2312_vm0, %v1989_v45  ;;  %2435 = vrot.lane.b32.xlu0 %v1989_v45, %s3273_s29 }
 0x8f5   : > { %v2414_v51 = vpop.permute.xlu2 %2413 }
 0x8f6   : > { %2491 = vst.msk [vmem:[%s4970_s20 + $0x90] sm:$0xff] %vm2312_vm0, %v2414_v51 }
 0x8f8   : > { %2433 = vrot.lane.b32.xlu1 %v1988_v3, %s3273_s29 }
 0x8fa   : > { %v1990_v0 = vpop.trf.xlu1 }
 0x8fb   : > { %2343 = vst.msk [vmem:[%s4933_s27 + $0xf0] sm:$0xff] %vm2312_vm0, %v1990_v0  ;;  %2437 = vrot.lane.b32.xlu2 %v1990_v0, %s3273_s29 }
 0x8fd   : > { %v2384_v21 = vpop.permute.xlu2 %2383 }
 0x8fe   : > { %2476 = vst.msk [vmem:[%s4970_s20 + $0x18] sm:$0xff] %vm2312_vm0, %v2384_v21 }
 0x900   : > { %2403 = vrot.lane.b32.xlu1 %v4976_v15, %s3273_s29 }
 0x902   : > { %v1991_v34 = vpop.trf.xlu1 }
 0x903   : > { %2344 = vst.msk [vmem:[%s4933_s27 + $0xf8] sm:$0xff] %vm2312_vm0, %v1991_v34 }
 0x905   : > { %v2412_v27 = vpop.permute.xlu0 %2411 }
 0x906   : > { %2490 = vst.msk [vmem:[%s4970_s20 + $0x88] sm:$0xff] %vm2312_vm0, %v2412_v27 }
 0x908   : > { %2439 = vrot.lane.b32.xlu1 %v1991_v34, %s3273_s29 }
 0x90d   : > { %v2382_v30 = vpop.permute.xlu0 %2381  ;;  %v2420_v40 = vpop.permute.xlu2 %2419 }
 0x90e   : > { %2475 = vst.msk [vmem:[%s4970_s20 + $0x10] sm:$0xff] %vm2312_vm0, %v2382_v30 }
 0x90f   : > { %2494 = vst.msk [vmem:[%s4970_s20 + $0xa8] sm:$0xff] %vm2312_vm0, %v2420_v40 }
 0x915   : > { %v2390_v53 = vpop.permute.xlu2 %2389 }
 0x916   : > { %2479 = vst.msk [vmem:[%s4970_s20 + $0x30] sm:$0xff] %vm2312_vm0, %v2390_v53 }
 0x91d   : > { %v2418_v48 = vpop.permute.xlu0 %2417 }
 0x91e   : > { %2493 = vst.msk [vmem:[%s4970_s20 + $0xa0] sm:$0xff] %vm2312_vm0, %v2418_v48 }
 0x925   : > { %v2388_v58 = vpop.permute.xlu0 %2387  ;;  %v2426_v43 = vpop.permute.xlu2 %2425 }
 0x926   : > { %2478 = vst.msk [vmem:[%s4970_s20 + $0x28] sm:$0xff] %vm2312_vm0, %v2388_v58 }
 0x927   : > { %2497 = vst.msk [vmem:[%s4970_s20 + $0xc0] sm:$0xff] %vm2312_vm0, %v2426_v43 }
 0x92a   : > { %v2410_v29 = vpop.permute.xlu1 %2409 }
 0x92b   : > { %2489 = vst.msk [vmem:[%s4970_s20 + $0x80] sm:$0xff] %vm2312_vm0, %v2410_v29 }
 0x92d   : > { %v2396_v25 = vpop.permute.xlu2 %2395 }
 0x92e   : > { %2482 = vst.msk [vmem:[%s4970_s20 + $0x48] sm:$0xff] %vm2312_vm0, %v2396_v25 }
 0x932   : > { %v2380_v61 = vpop.permute.xlu1 %2379 }
 0x933   : > { %2474 = vst.msk [vmem:[%s4970_s20 + $0x8] sm:$0xff] %vm2312_vm0, %v2380_v61 }
 0x935   : > { %v2424_v24 = vpop.permute.xlu0 %2423 }
 0x936   : > { %2496 = vst.msk [vmem:[%s4970_s20 + $0xb8] sm:$0xff] %vm2312_vm0, %v2424_v24 }
 0x93a   : > { %v2416_v59 = vpop.permute.xlu1 %2415 }
 0x93b   : > { %2492 = vst.msk [vmem:[%s4970_s20 + $0x98] sm:$0xff] %vm2312_vm0, %v2416_v59 }
 0x93d   : > { %v2394_v63 = vpop.permute.xlu0 %2393  ;;  %v2432_v57 = vpop.permute.xlu2 %2431 }
 0x93e   : > { %2481 = vst.msk [vmem:[%s4970_s20 + $0x40] sm:$0xff] %vm2312_vm0, %v2394_v63 }
 0x93f   : > { %2500 = vst.msk [vmem:[%s4970_s20 + $0xd8] sm:$0xff] %vm2312_vm0, %v2432_v57 }
 0x942   : > { %v2386_v56 = vpop.permute.xlu1 %2385 }
 0x943   : > { %2477 = vst.msk [vmem:[%s4970_s20 + $0x20] sm:$0xff] %vm2312_vm0, %v2386_v56 }
 0x945   : > { %v2402_v50 = vpop.permute.xlu2 %2401 }
 0x946   : > { %2485 = vst.msk [vmem:[%s4970_s20 + $0x60] sm:$0xff] %vm2312_vm0, %v2402_v50 }
 0x94a   : > { %v2422_v16 = vpop.permute.xlu1 %2421 }
 0x94b   : > { %2495 = vst.msk [vmem:[%s4970_s20 + $0xb0] sm:$0xff] %vm2312_vm0, %v2422_v16 }
 0x94d   : > { %v2430_v28 = vpop.permute.xlu0 %2429  ;;  %v2408_v52 = vpop.permute.xlu2 %2407 }
 0x94e   : > { %2499 = vst.msk [vmem:[%s4970_s20 + $0xd0] sm:$0xff] %vm2312_vm0, %v2430_v28 }
 0x94f   : > { %2488 = vst.msk [vmem:[%s4970_s20 + $0x78] sm:$0xff] %vm2312_vm0, %v2408_v52 }
 0x952   : > { %v2392_v60 = vpop.permute.xlu1 %2391 }
 0x953   : > { %2480 = vst.msk [vmem:[%s4970_s20 + $0x38] sm:$0xff] %vm2312_vm0, %v2392_v60 }
 0x955   : > { %v2400_v13 = vpop.permute.xlu0 %2399  ;;  %v2438_v1 = vpop.permute.xlu2 %2437 }
 0x956   : > { %2484 = vst.msk [vmem:[%s4970_s20 + $0x58] sm:$0xff] %vm2312_vm0, %v2400_v13 }
 0x957   : > { %2503 = vst.msk [vmem:[%s4970_s20 + $0xf0] sm:$0xff] %vm2312_vm0, %v2438_v1 }
 0x95a   : > { %v2428_v2 = vpop.permute.xlu1 %2427 }
 0x95b   : > { %2498 = vst.msk [vmem:[%s4970_s20 + $0xc8] sm:$0xff] %vm2312_vm0, %v2428_v2 }
 0x95d   : > { %v2406_v20 = vpop.permute.xlu0 %2405 }
 0x95e   : > { %2487 = vst.msk [vmem:[%s4970_s20 + $0x70] sm:$0xff] %vm2312_vm0, %v2406_v20 }
 0x962   : > { %v2398_v7 = vpop.permute.xlu1 %2397 }
 0x963   : > { %2483 = vst.msk [vmem:[%s4970_s20 + $0x50] sm:$0xff] %vm2312_vm0, %v2398_v7 }
 0x965   : > { %v2436_v18 = vpop.permute.xlu0 %2435 }
 0x966   : > { %2502 = vst.msk [vmem:[%s4970_s20 + $0xe8] sm:$0xff] %vm2312_vm0, %v2436_v18 }
 0x96a   : > { %v2434_v12 = vpop.permute.xlu1 %2433 }
 0x96b   : > { %2501 = vst.msk [vmem:[%s4970_s20 + $0xe0] sm:$0xff] %vm2312_vm0, %v2434_v12 }
 0x972   : > { %v2404_v54 = vpop.permute.xlu1 %2403 }
 0x973   : > { %2486 = vst.msk [vmem:[%s4970_s20 + $0x68] sm:$0xff] %vm2312_vm0, %v2404_v54 }
 0x97a   : > { %v2440_v10 = vpop.permute.xlu1 %2439 }
 0x97b   : > { %2504 = vst.msk [vmem:[%s4970_s20 + $0xf8] sm:$0xff] %vm2312_vm0, %v2440_v10 }
 0x97c PF: > { %s24_s25 = sadd.s32 1, %s3264_s25  }
 0x97d   : > { %p21_p4 = scmp.ge.s32.totalorder %s24_s25, 4  }
 0x97f   :  { %23 = sbr.rel (!%p21_p4) target bundleno = 1 (0x1), region = 134 }

</bundles_post_ra>
